<compile_context>
chip_gen: v6e
topology: v6e:2x2x1
jax: 0.10.0
libtpu: 0.0.40
codegen_flags: <defaults>
</compile_context>

<pallas_src>
import numpy as np

import jax
import jax.numpy as jnp
from jax.experimental import pallas as pl
from jax.experimental.pallas import tpu as pltpu


# ---------------------------------------------------------------------------
# Fused kernel
# ---------------------------------------------------------------------------
def _leaky(x):
    return jnp.maximum(x, 0.2 * x)  # LeakyReLU(0.2)


def discriminator_kernel(
    cols1_ref, w1_ref, b1_ref,                    # conv1 (im2col GEMM)
    g2_ref, w2_ref, b2_ref, gam2_ref, bet2_ref,   # conv2 + BatchNorm2d(128)
    g3_ref, w3_ref, b3_ref, gam3_ref, bet3_ref,   # conv3 + BatchNorm2d(256)
    pool_ref, fw_ref, fb_ref,                     # avgpool + Linear(256,1)
    o_ref,
    *, eps=1e-5,
):
    f32 = jnp.float32

    def conv_taps(x, g_ref, w_ref):
        # x: (M_in, Cin); g_ref: (9, M_out, M_in); w_ref: (9, Cin, Cout).
        m_out, c_out = g_ref.shape[1], w_ref.shape[2]
        acc = jnp.zeros((m_out, c_out), f32)
        for t in range(9):  # static, unrolled shift-and-matmul over the 3x3 taps
            p = jnp.dot(g_ref[t], x, preferred_element_type=f32)          # (M_out, Cin)
            acc = acc + jnp.dot(p, w_ref[t], preferred_element_type=f32)  # (M_out, Cout)
        return acc

    def bn_lrelu(z, gam_ref, bet_ref):
        # Training-mode BatchNorm2d: biased batch variance over M = N*H*W rows,
        # folded into a single per-channel scale/shift, then LeakyReLU(0.2).
        # TODO(synk): nn.BatchNorm2d running_mean/running_var buffer updates
        #             (training side effects) are not emulated here.
        m = jnp.mean(z, axis=0, keepdims=True)
        var = jnp.mean(z * z, axis=0, keepdims=True) - m * m
        scale = gam_ref[...] * jax.lax.rsqrt(var + eps)
        shift = bet_ref[...] - m * scale
        return _leaky(z * scale + shift)

    # conv1: Conv2d(1, 64, 3, 2, 1) + LeakyReLU  ->  h1 (N*8*8, 64)
    h1 = _leaky(
        jnp.dot(cols1_ref[...], w1_ref[...], preferred_element_type=f32) + b1_ref[...]
    )

    # conv2: Conv2d(64, 128, 3, 2, 1) + BN(128) + LeakyReLU  ->  h2 (N*4*4, 128)
    h2 = bn_lrelu(conv_taps(h1, g2_ref, w2_ref) + b2_ref[...], gam2_ref, bet2_ref)

    # conv3: Conv2d(128, 256, 3, 2, 1) + BN(256) + LeakyReLU  ->  h3 (N*2*2, 256)
    h3 = bn_lrelu(conv_taps(h2, g3_ref, w3_ref) + b3_ref[...], gam3_ref, bet3_ref)

    # AdaptiveAvgPool2d((1,1)) as an (N, N*2*2) averaging matmul, then FC + sigmoid.
    pooled = jnp.dot(pool_ref[...], h3, preferred_element_type=f32)        # (N, 256)
    logits = jnp.dot(pooled, fw_ref[...], preferred_element_type=f32) + fb_ref[...]
    o_ref[...] = jax.nn.sigmoid(logits)                                    # (N, 1)


# ---------------------------------------------------------------------------
# pallas_call wrapper (single fused dispatch)
# ---------------------------------------------------------------------------
def _full_spec(shape):
    nd = len(shape)
    return pl.BlockSpec(shape, lambda i, _nd=nd: (0,) * _nd)


def _im2col_conv1(x_nchw):
    """Conv1 has Cin=1: build its (N*Ho*Wo, 9) patch matrix with a few cheap XLA
    ops on the tiny HBM input (the only host/XLA-side data prep)."""
    N, _, H, W = x_nchw.shape
    Ho, Wo = (H + 1) // 2, (W + 1) // 2
    xp = jnp.pad(x_nchw[:, 0], ((0, 0), (1, 1), (1, 1)))
    taps = [xp[:, dh:dh + 2 * Ho:2, dw:dw + 2 * Wo:2]
            for dh in range(3) for dw in range(3)]
    cols = jnp.stack(taps, axis=-1)            # (N, Ho, Wo, 9), tap order dh*3+dw
    return cols.reshape(N * Ho * Wo, 9)


@jax.jit
def discriminator_forward(x_nchw, params):
    cols1 = _im2col_conv1(x_nchw.astype(jnp.float32))
    args = (
        cols1, params["w1"], params["b1"],
        params["G2"], params["w2"], params["b2"], params["g2"], params["bb2"],
        params["G3"], params["w3"], params["b3"], params["g3"], params["bb3"],
        params["pool"], params["fw"], params["fb"],
    )
    out_shape = (x_nchw.shape[0], 1)
    return pl.pallas_call(
        discriminator_kernel,
        out_shape=jax.ShapeDtypeStruct(out_shape, jnp.float32),
        grid=(1,),
        in_specs=[_full_spec(a.shape) for a in args],
        out_specs=_full_spec(out_shape),
        compiler_params=pltpu.CompilerParams(dimension_semantics=("arbitrary",)),
    )(*args)


# ---------------------------------------------------------------------------
# Constant gather / pooling matrices (built once with numpy)
# ---------------------------------------------------------------------------
def _gather_mats(batch, h_in, w_in):
    """9 stacked 0/1 matrices G[t] of shape (N*Ho*Wo, N*Hi*Wi) implementing the
    im2col row-gather for a 3x3 / stride-2 / pad-1 conv (zero rows where the tap
    falls in the padding)."""
    h_out, w_out = (h_in + 1) // 2, (w_in + 1) // 2
    m_in, m_out = batch * h_in * w_in, batch * h_out * w_out
    G = np.zeros((9, m_out, m_in), dtype=np.float32)
    for n in range(batch):
        for ho in range(h_out):
            for wo in range(w_out):
                q = n * h_out * w_out + ho * w_out + wo
                for dh in range(3):
                    for dw in range(3):
                        hi, wi = 2 * ho + dh - 1, 2 * wo + dw - 1
                        if 0 <= hi < h_in and 0 <= wi < w_in:
                            G[dh * 3 + dw, q, n * h_in * w_in + hi * w_in + wi] = 1.0
    return jnp.asarray(G)


# ---------------------------------------------------------------------------
# Deterministic synthetic parameters (pre-reshaped once; matches module shapes).
# Note: real PyTorch weights are OIHW and Linear weight is (out,in); loading a
# checkpoint requires transposes to HWIO / (in,out).
# ---------------------------------------------------------------------------
def make_params(key, batch, image_size):
    H, W = image_size
    H1, W1 = (H + 1) // 2, (W + 1) // 2    # after conv1
    H2, W2 = (H1 + 1) // 2, (W1 + 1) // 2  # after conv2
    H3, W3 = (H2 + 1) // 2, (W2 + 1) // 2  # after conv3
    ks = jax.random.split(key, 12)
    f32 = jnp.float32
    p = {}
    # Conv2d(1, 64, 3, 2, 1): HWIO weights flattened tap-major -> (9, 64)
    p["w1"] = (0.1 * jax.random.normal(ks[0], (3, 3, 1, 64), f32)).reshape(9, 64)
    p["b1"] = 0.1 * jax.random.normal(ks[1], (1, 64), f32)
    # Conv2d(64, 128, 3, 2, 1): (9, 64, 128) tap-major + BatchNorm2d(128)
    p["w2"] = (0.05 * jax.random.normal(ks[2], (3, 3, 64, 128), f32)).reshape(9, 64, 128)
    p["b2"] = 0.1 * jax.random.normal(ks[3], (1, 128), f32)
    p["g2"] = 1.0 + 0.1 * jax.random.normal(ks[4], (1, 128), f32)
    p["bb2"] = 0.1 * jax.random.normal(ks[5], (1, 128), f32)
    # Conv2d(128, 256, 3, 2, 1): (9, 128, 256) tap-major + BatchNorm2d(256)
    p["w3"] = (0.05 * jax.random.normal(ks[6], (3, 3, 128, 256), f32)).reshape(9, 128, 256)
    p["b3"] = 0.1 * jax.random.normal(ks[7], (1, 256), f32)
    p["g3"] = 1.0 + 0.1 * jax.random.normal(ks[8], (1, 256), f32)
    p["bb3"] = 0.1 * jax.random.normal(ks[9], (1, 256), f32)
    # Linear(256, 1) stored as (in, out) = W.T; bias (1, 1)
    p["fw"] = 0.1 * jax.random.normal(ks[10], (256, 1), f32)
    p["fb"] = 0.1 * jax.random.normal(ks[11], (1, 1), f32)
    # Constant im2col row-gather matrices + average-pool matrix (built once)
    p["G2"] = _gather_mats(batch, H1, W1)   # (9, N*H2*W2, N*H1*W1)
    p["G3"] = _gather_mats(batch, H2, W2)   # (9, N*H3*W3, N*H2*W2)
    pool = np.zeros((batch, batch * H3 * W3), np.float32)
    for n in range(batch):
        pool[n, n * H3 * W3:(n + 1) * H3 * W3] = 1.0 / (H3 * W3)
    p["pool"] = jnp.asarray(pool)
    return p


# ---------------------------------------------------------------------------
# Pure-JAX reference (for correctness check)
# ---------------------------------------------------------------------------
def _reference_forward(x_nchw, p, eps=1e-5):
    x = jnp.transpose(x_nchw, (0, 2, 3, 1)).astype(jnp.float32)  # NHWC

    def conv(h, w_tap, b):
        w = w_tap.reshape(3, 3, w_tap.shape[-2], w_tap.shape[-1])
        y = jax.lax.conv_general_dilated(
            h, w, window_strides=(2, 2), padding=((1, 1), (1, 1)),
            dimension_numbers=("NHWC", "HWIO", "NHWC"),
            precision=jax.lax.Precision.HIGHEST)
        return y + b.reshape(1, 1, 1, -1)

    def bn_lrelu(h, g, bta):
        m = jnp.mean(h, axis=(0, 1, 2), keepdims=True)
        v = jnp.mean((h - m) ** 2, axis=(0, 1, 2), keepdims=True)
        y = (h - m) * jax.lax.rsqrt(v + eps) * g.reshape(1, 1, 1, -1) + bta.reshape(1, 1, 1, -1)
        return jnp.maximum(y, 0.2 * y)

    h = conv(x, p["w1"].reshape(3, 3, 1, 64), p["b1"])
    h = jnp.maximum(h, 0.2 * h)
    h = bn_lrelu(conv(h, p["w2"], p["b2"]), p["g2"], p["bb2"])
    h = bn_lrelu(conv(h, p["w3"], p["b3"]), p["g3"], p["bb3"])
    pooled = jnp.mean(h, axis=(1, 2))
    return jax.nn.sigmoid(
        jnp.dot(pooled, p["fw"], precision=jax.lax.Precision.HIGHEST) + p["fb"])


if __name__ == "__main__":
    key = jax.random.PRNGKey(0)
    k_x, k_p = jax.random.split(key)

    batch = 2
    image_size = (16, 16)                       # (N, M) passed to Discriminator.__init__
    x = jax.random.normal(k_x, (batch, 1, *image_size), jnp.float32)  # PyTorch NCHW input
    params = make_params(k_p, batch, image_size)

    out = discriminator_forward(x, params)
    out = jax.block_until_ready(out)

    assert out.shape == (batch, 1) and out.dtype == jnp.float32
    assert bool(jnp.all((out >= 0.0) & (out <= 1.0)))  # sigmoid range sanity check

    ref = _reference_forward(x, params)
    assert bool(jnp.allclose(out, ref, atol=1e-2, rtol=1e-2)), (out, ref)

    print("KERNEL_OK")
</pallas_src>

<mosaic_0001>
module attributes {stable_mosaic.version = 11 : i64} {
  func.func @discriminator_kernel(%arg0: i32, %arg1: memref<128x9xf32, #tpu.memory_space<vmem>>, %arg2: memref<9x64xf32, #tpu.memory_space<vmem>>, %arg3: memref<1x64xf32, #tpu.memory_space<vmem>>, %arg4: memref<9x32x128xf32, #tpu.memory_space<vmem>>, %arg5: memref<9x64x128xf32, #tpu.memory_space<vmem>>, %arg6: memref<1x128xf32, #tpu.memory_space<vmem>>, %arg7: memref<1x128xf32, #tpu.memory_space<vmem>>, %arg8: memref<1x128xf32, #tpu.memory_space<vmem>>, %arg9: memref<9x8x32xf32, #tpu.memory_space<vmem>>, %arg10: memref<9x128x256xf32, #tpu.memory_space<vmem>>, %arg11: memref<1x256xf32, #tpu.memory_space<vmem>>, %arg12: memref<1x256xf32, #tpu.memory_space<vmem>>, %arg13: memref<1x256xf32, #tpu.memory_space<vmem>>, %arg14: memref<2x8xf32, #tpu.memory_space<vmem>>, %arg15: memref<256x1xf32, #tpu.memory_space<vmem>>, %arg16: memref<1x1xf32, #tpu.memory_space<vmem>>, %arg17: memref<2x1xf32, #tpu.memory_space<vmem>>) attributes {dimension_semantics = [#tpu.dimension_semantics<arbitrary>], iteration_bounds = array<i64: 1>, scalar_prefetch = 0 : i64, scratch_operands = 0 : i64, tpu.core_type = #tpu.core_type<tc>, window_params = [{pipeline_mode = #tpu.pipeline_mode<synchronous>, transform_indices = @transform_0, window_bounds = array<i64: 128, 9>}, {pipeline_mode = #tpu.pipeline_mode<synchronous>, transform_indices = @transform_1, window_bounds = array<i64: 9, 64>}, {pipeline_mode = #tpu.pipeline_mode<synchronous>, transform_indices = @transform_2, window_bounds = array<i64: 1, 64>}, {pipeline_mode = #tpu.pipeline_mode<synchronous>, transform_indices = @transform_3, window_bounds = array<i64: 9, 32, 128>}, {pipeline_mode = #tpu.pipeline_mode<synchronous>, transform_indices = @transform_4, window_bounds = array<i64: 9, 64, 128>}, {pipeline_mode = #tpu.pipeline_mode<synchronous>, transform_indices = @transform_5, window_bounds = array<i64: 1, 128>}, {pipeline_mode = #tpu.pipeline_mode<synchronous>, transform_indices = @transform_6, window_bounds = array<i64: 1, 128>}, {pipeline_mode = #tpu.pipeline_mode<synchronous>, transform_indices = @transform_7, window_bounds = array<i64: 1, 128>}, {pipeline_mode = #tpu.pipeline_mode<synchronous>, transform_indices = @transform_8, window_bounds = array<i64: 9, 8, 32>}, {pipeline_mode = #tpu.pipeline_mode<synchronous>, transform_indices = @transform_9, window_bounds = array<i64: 9, 128, 256>}, {pipeline_mode = #tpu.pipeline_mode<synchronous>, transform_indices = @transform_10, window_bounds = array<i64: 1, 256>}, {pipeline_mode = #tpu.pipeline_mode<synchronous>, transform_indices = @transform_11, window_bounds = array<i64: 1, 256>}, {pipeline_mode = #tpu.pipeline_mode<synchronous>, transform_indices = @transform_12, window_bounds = array<i64: 1, 256>}, {pipeline_mode = #tpu.pipeline_mode<synchronous>, transform_indices = @transform_13, window_bounds = array<i64: 2, 8>}, {pipeline_mode = #tpu.pipeline_mode<synchronous>, transform_indices = @transform_14, window_bounds = array<i64: 256, 1>}, {pipeline_mode = #tpu.pipeline_mode<synchronous>, transform_indices = @transform_15, window_bounds = array<i64: 1, 1>}, {pipeline_mode = #tpu.pipeline_mode<synchronous>, transform_indices = @transform_16, window_bounds = array<i64: 2, 1>}]} {
    %c0 = arith.constant 0 : index
    %c0_0 = arith.constant 0 : index
    %0 = vector.load %arg1[%c0, %c0_0] : memref<128x9xf32, #tpu.memory_space<vmem>>, vector<128x9xf32>
    %c0_1 = arith.constant 0 : index
    %c0_2 = arith.constant 0 : index
    %1 = vector.load %arg2[%c0_1, %c0_2] : memref<9x64xf32, #tpu.memory_space<vmem>>, vector<9x64xf32>
    %cst = arith.constant dense<0.000000e+00> : vector<128x64xf32>
    %2 = tpu.matmul %0, %1, %cst {dimension_numbers = #tpu.dot_dimension_numbers<[1], [0], [0], [1], [0, 0, 1, 1], [], []>} : vector<128x9xf32>, vector<9x64xf32>, vector<128x64xf32> -> vector<128x64xf32>
    %c0_3 = arith.constant 0 : index
    %c0_4 = arith.constant 0 : index
    %3 = vector.load %arg3[%c0_3, %c0_4] : memref<1x64xf32, #tpu.memory_space<vmem>>, vector<1x64xf32>
    %4 = vector.broadcast %3 : vector<1x64xf32> to vector<128x64xf32>
    %5 = arith.addf %2, %4 : vector<128x64xf32>
    %cst_5 = arith.constant 2.000000e-01 : f32
    %6 = vector.broadcast %cst_5 : f32 to vector<128x64xf32>
    %7 = arith.mulf %6, %5 : vector<128x64xf32>
    %8 = arith.maximumf %5, %7 : vector<128x64xf32>
    %cst_6 = arith.constant 0.000000e+00 : f32
    %9 = vector.broadcast %cst_6 : f32 to vector<32x128xf32>
    %c0_7 = arith.constant 0 : index
    %c0_8 = arith.constant 0 : index
    %c0_9 = arith.constant 0 : index
    %10 = vector.load %arg4[%c0_7, %c0_8, %c0_9] : memref<9x32x128xf32, #tpu.memory_space<vmem>>, vector<1x32x128xf32>
    %11 = vector.shape_cast %10 : vector<1x32x128xf32> to vector<32x128xf32>
    %cst_10 = arith.constant dense<0.000000e+00> : vector<32x64xf32>
    %12 = tpu.matmul %11, %8, %cst_10 {dimension_numbers = #tpu.dot_dimension_numbers<[1], [0], [0], [1], [0, 0, 1, 1], [], []>} : vector<32x128xf32>, vector<128x64xf32>, vector<32x64xf32> -> vector<32x64xf32>
    %c0_11 = arith.constant 0 : index
    %c0_12 = arith.constant 0 : index
    %c0_13 = arith.constant 0 : index
    %13 = vector.load %arg5[%c0_11, %c0_12, %c0_13] : memref<9x64x128xf32, #tpu.memory_space<vmem>>, vector<1x64x128xf32>
    %14 = vector.shape_cast %13 : vector<1x64x128xf32> to vector<64x128xf32>
    %cst_14 = arith.constant dense<0.000000e+00> : vector<32x128xf32>
    %15 = tpu.matmul %12, %14, %cst_14 {dimension_numbers = #tpu.dot_dimension_numbers<[1], [0], [0], [1], [0, 0, 1, 1], [], []>} : vector<32x64xf32>, vector<64x128xf32>, vector<32x128xf32> -> vector<32x128xf32>
    %16 = arith.addf %9, %15 : vector<32x128xf32>
    %c1 = arith.constant 1 : index
    %c0_15 = arith.constant 0 : index
    %c0_16 = arith.constant 0 : index
    %17 = vector.load %arg4[%c1, %c0_15, %c0_16] : memref<9x32x128xf32, #tpu.memory_space<vmem>>, vector<1x32x128xf32>
    %18 = vector.shape_cast %17 : vector<1x32x128xf32> to vector<32x128xf32>
    %cst_17 = arith.constant dense<0.000000e+00> : vector<32x64xf32>
    %19 = tpu.matmul %18, %8, %cst_17 {dimension_numbers = #tpu.dot_dimension_numbers<[1], [0], [0], [1], [0, 0, 1, 1], [], []>} : vector<32x128xf32>, vector<128x64xf32>, vector<32x64xf32> -> vector<32x64xf32>
    %c1_18 = arith.constant 1 : index
    %c0_19 = arith.constant 0 : index
    %c0_20 = arith.constant 0 : index
    %20 = vector.load %arg5[%c1_18, %c0_19, %c0_20] : memref<9x64x128xf32, #tpu.memory_space<vmem>>, vector<1x64x128xf32>
    %21 = vector.shape_cast %20 : vector<1x64x128xf32> to vector<64x128xf32>
    %cst_21 = arith.constant dense<0.000000e+00> : vector<32x128xf32>
    %22 = tpu.matmul %19, %21, %cst_21 {dimension_numbers = #tpu.dot_dimension_numbers<[1], [0], [0], [1], [0, 0, 1, 1], [], []>} : vector<32x64xf32>, vector<64x128xf32>, vector<32x128xf32> -> vector<32x128xf32>
    %23 = arith.addf %16, %22 : vector<32x128xf32>
    %c2 = arith.constant 2 : index
    %c0_22 = arith.constant 0 : index
    %c0_23 = arith.constant 0 : index
    %24 = vector.load %arg4[%c2, %c0_22, %c0_23] : memref<9x32x128xf32, #tpu.memory_space<vmem>>, vector<1x32x128xf32>
    %25 = vector.shape_cast %24 : vector<1x32x128xf32> to vector<32x128xf32>
    %cst_24 = arith.constant dense<0.000000e+00> : vector<32x64xf32>
    %26 = tpu.matmul %25, %8, %cst_24 {dimension_numbers = #tpu.dot_dimension_numbers<[1], [0], [0], [1], [0, 0, 1, 1], [], []>} : vector<32x128xf32>, vector<128x64xf32>, vector<32x64xf32> -> vector<32x64xf32>
    %c2_25 = arith.constant 2 : index
    %c0_26 = arith.constant 0 : index
    %c0_27 = arith.constant 0 : index
    %27 = vector.load %arg5[%c2_25, %c0_26, %c0_27] : memref<9x64x128xf32, #tpu.memory_space<vmem>>, vector<1x64x128xf32>
    %28 = vector.shape_cast %27 : vector<1x64x128xf32> to vector<64x128xf32>
    %cst_28 = arith.constant dense<0.000000e+00> : vector<32x128xf32>
    %29 = tpu.matmul %26, %28, %cst_28 {dimension_numbers = #tpu.dot_dimension_numbers<[1], [0], [0], [1], [0, 0, 1, 1], [], []>} : vector<32x64xf32>, vector<64x128xf32>, vector<32x128xf32> -> vector<32x128xf32>
    %30 = arith.addf %23, %29 : vector<32x128xf32>
    %c3 = arith.constant 3 : index
    %c0_29 = arith.constant 0 : index
    %c0_30 = arith.constant 0 : index
    %31 = vector.load %arg4[%c3, %c0_29, %c0_30] : memref<9x32x128xf32, #tpu.memory_space<vmem>>, vector<1x32x128xf32>
    %32 = vector.shape_cast %31 : vector<1x32x128xf32> to vector<32x128xf32>
    %cst_31 = arith.constant dense<0.000000e+00> : vector<32x64xf32>
    %33 = tpu.matmul %32, %8, %cst_31 {dimension_numbers = #tpu.dot_dimension_numbers<[1], [0], [0], [1], [0, 0, 1, 1], [], []>} : vector<32x128xf32>, vector<128x64xf32>, vector<32x64xf32> -> vector<32x64xf32>
    %c3_32 = arith.constant 3 : index
    %c0_33 = arith.constant 0 : index
    %c0_34 = arith.constant 0 : index
    %34 = vector.load %arg5[%c3_32, %c0_33, %c0_34] : memref<9x64x128xf32, #tpu.memory_space<vmem>>, vector<1x64x128xf32>
    %35 = vector.shape_cast %34 : vector<1x64x128xf32> to vector<64x128xf32>
    %cst_35 = arith.constant dense<0.000000e+00> : vector<32x128xf32>
    %36 = tpu.matmul %33, %35, %cst_35 {dimension_numbers = #tpu.dot_dimension_numbers<[1], [0], [0], [1], [0, 0, 1, 1], [], []>} : vector<32x64xf32>, vector<64x128xf32>, vector<32x128xf32> -> vector<32x128xf32>
    %37 = arith.addf %30, %36 : vector<32x128xf32>
    %c4 = arith.constant 4 : index
    %c0_36 = arith.constant 0 : index
    %c0_37 = arith.constant 0 : index
    %38 = vector.load %arg4[%c4, %c0_36, %c0_37] : memref<9x32x128xf32, #tpu.memory_space<vmem>>, vector<1x32x128xf32>
    %39 = vector.shape_cast %38 : vector<1x32x128xf32> to vector<32x128xf32>
    %cst_38 = arith.constant dense<0.000000e+00> : vector<32x64xf32>
    %40 = tpu.matmul %39, %8, %cst_38 {dimension_numbers = #tpu.dot_dimension_numbers<[1], [0], [0], [1], [0, 0, 1, 1], [], []>} : vector<32x128xf32>, vector<128x64xf32>, vector<32x64xf32> -> vector<32x64xf32>
    %c4_39 = arith.constant 4 : index
    %c0_40 = arith.constant 0 : index
    %c0_41 = arith.constant 0 : index
    %41 = vector.load %arg5[%c4_39, %c0_40, %c0_41] : memref<9x64x128xf32, #tpu.memory_space<vmem>>, vector<1x64x128xf32>
    %42 = vector.shape_cast %41 : vector<1x64x128xf32> to vector<64x128xf32>
    %cst_42 = arith.constant dense<0.000000e+00> : vector<32x128xf32>
    %43 = tpu.matmul %40, %42, %cst_42 {dimension_numbers = #tpu.dot_dimension_numbers<[1], [0], [0], [1], [0, 0, 1, 1], [], []>} : vector<32x64xf32>, vector<64x128xf32>, vector<32x128xf32> -> vector<32x128xf32>
    %44 = arith.addf %37, %43 : vector<32x128xf32>
    %c5 = arith.constant 5 : index
    %c0_43 = arith.constant 0 : index
    %c0_44 = arith.constant 0 : index
    %45 = vector.load %arg4[%c5, %c0_43, %c0_44] : memref<9x32x128xf32, #tpu.memory_space<vmem>>, vector<1x32x128xf32>
    %46 = vector.shape_cast %45 : vector<1x32x128xf32> to vector<32x128xf32>
    %cst_45 = arith.constant dense<0.000000e+00> : vector<32x64xf32>
    %47 = tpu.matmul %46, %8, %cst_45 {dimension_numbers = #tpu.dot_dimension_numbers<[1], [0], [0], [1], [0, 0, 1, 1], [], []>} : vector<32x128xf32>, vector<128x64xf32>, vector<32x64xf32> -> vector<32x64xf32>
    %c5_46 = arith.constant 5 : index
    %c0_47 = arith.constant 0 : index
    %c0_48 = arith.constant 0 : index
    %48 = vector.load %arg5[%c5_46, %c0_47, %c0_48] : memref<9x64x128xf32, #tpu.memory_space<vmem>>, vector<1x64x128xf32>
    %49 = vector.shape_cast %48 : vector<1x64x128xf32> to vector<64x128xf32>
    %cst_49 = arith.constant dense<0.000000e+00> : vector<32x128xf32>
    %50 = tpu.matmul %47, %49, %cst_49 {dimension_numbers = #tpu.dot_dimension_numbers<[1], [0], [0], [1], [0, 0, 1, 1], [], []>} : vector<32x64xf32>, vector<64x128xf32>, vector<32x128xf32> -> vector<32x128xf32>
    %51 = arith.addf %44, %50 : vector<32x128xf32>
    %c6 = arith.constant 6 : index
    %c0_50 = arith.constant 0 : index
    %c0_51 = arith.constant 0 : index
    %52 = vector.load %arg4[%c6, %c0_50, %c0_51] : memref<9x32x128xf32, #tpu.memory_space<vmem>>, vector<1x32x128xf32>
    %53 = vector.shape_cast %52 : vector<1x32x128xf32> to vector<32x128xf32>
    %cst_52 = arith.constant dense<0.000000e+00> : vector<32x64xf32>
    %54 = tpu.matmul %53, %8, %cst_52 {dimension_numbers = #tpu.dot_dimension_numbers<[1], [0], [0], [1], [0, 0, 1, 1], [], []>} : vector<32x128xf32>, vector<128x64xf32>, vector<32x64xf32> -> vector<32x64xf32>
    %c6_53 = arith.constant 6 : index
    %c0_54 = arith.constant 0 : index
    %c0_55 = arith.constant 0 : index
    %55 = vector.load %arg5[%c6_53, %c0_54, %c0_55] : memref<9x64x128xf32, #tpu.memory_space<vmem>>, vector<1x64x128xf32>
    %56 = vector.shape_cast %55 : vector<1x64x128xf32> to vector<64x128xf32>
    %cst_56 = arith.constant dense<0.000000e+00> : vector<32x128xf32>
    %57 = tpu.matmul %54, %56, %cst_56 {dimension_numbers = #tpu.dot_dimension_numbers<[1], [0], [0], [1], [0, 0, 1, 1], [], []>} : vector<32x64xf32>, vector<64x128xf32>, vector<32x128xf32> -> vector<32x128xf32>
    %58 = arith.addf %51, %57 : vector<32x128xf32>
    %c7 = arith.constant 7 : index
    %c0_57 = arith.constant 0 : index
    %c0_58 = arith.constant 0 : index
    %59 = vector.load %arg4[%c7, %c0_57, %c0_58] : memref<9x32x128xf32, #tpu.memory_space<vmem>>, vector<1x32x128xf32>
    %60 = vector.shape_cast %59 : vector<1x32x128xf32> to vector<32x128xf32>
    %cst_59 = arith.constant dense<0.000000e+00> : vector<32x64xf32>
    %61 = tpu.matmul %60, %8, %cst_59 {dimension_numbers = #tpu.dot_dimension_numbers<[1], [0], [0], [1], [0, 0, 1, 1], [], []>} : vector<32x128xf32>, vector<128x64xf32>, vector<32x64xf32> -> vector<32x64xf32>
    %c7_60 = arith.constant 7 : index
    %c0_61 = arith.constant 0 : index
    %c0_62 = arith.constant 0 : index
    %62 = vector.load %arg5[%c7_60, %c0_61, %c0_62] : memref<9x64x128xf32, #tpu.memory_space<vmem>>, vector<1x64x128xf32>
    %63 = vector.shape_cast %62 : vector<1x64x128xf32> to vector<64x128xf32>
    %cst_63 = arith.constant dense<0.000000e+00> : vector<32x128xf32>
    %64 = tpu.matmul %61, %63, %cst_63 {dimension_numbers = #tpu.dot_dimension_numbers<[1], [0], [0], [1], [0, 0, 1, 1], [], []>} : vector<32x64xf32>, vector<64x128xf32>, vector<32x128xf32> -> vector<32x128xf32>
    %65 = arith.addf %58, %64 : vector<32x128xf32>
    %c8 = arith.constant 8 : index
    %c0_64 = arith.constant 0 : index
    %c0_65 = arith.constant 0 : index
    %66 = vector.load %arg4[%c8, %c0_64, %c0_65] : memref<9x32x128xf32, #tpu.memory_space<vmem>>, vector<1x32x128xf32>
    %67 = vector.shape_cast %66 : vector<1x32x128xf32> to vector<32x128xf32>
    %cst_66 = arith.constant dense<0.000000e+00> : vector<32x64xf32>
    %68 = tpu.matmul %67, %8, %cst_66 {dimension_numbers = #tpu.dot_dimension_numbers<[1], [0], [0], [1], [0, 0, 1, 1], [], []>} : vector<32x128xf32>, vector<128x64xf32>, vector<32x64xf32> -> vector<32x64xf32>
    %c8_67 = arith.constant 8 : index
    %c0_68 = arith.constant 0 : index
    %c0_69 = arith.constant 0 : index
    %69 = vector.load %arg5[%c8_67, %c0_68, %c0_69] : memref<9x64x128xf32, #tpu.memory_space<vmem>>, vector<1x64x128xf32>
    %70 = vector.shape_cast %69 : vector<1x64x128xf32> to vector<64x128xf32>
    %cst_70 = arith.constant dense<0.000000e+00> : vector<32x128xf32>
    %71 = tpu.matmul %68, %70, %cst_70 {dimension_numbers = #tpu.dot_dimension_numbers<[1], [0], [0], [1], [0, 0, 1, 1], [], []>} : vector<32x64xf32>, vector<64x128xf32>, vector<32x128xf32> -> vector<32x128xf32>
    %72 = arith.addf %65, %71 : vector<32x128xf32>
    %c0_71 = arith.constant 0 : index
    %c0_72 = arith.constant 0 : index
    %73 = vector.load %arg6[%c0_71, %c0_72] : memref<1x128xf32, #tpu.memory_space<vmem>>, vector<1x128xf32>
    %74 = vector.broadcast %73 : vector<1x128xf32> to vector<32x128xf32>
    %75 = arith.addf %72, %74 : vector<32x128xf32>
    %cst_73 = arith.constant dense<0.000000e+00> : vector<128xf32>
    %76 = vector.multi_reduction <add>, %75, %cst_73 [0] : vector<32x128xf32> to vector<128xf32>
    %77 = vector.shape_cast %76 : vector<128xf32> to vector<1x128xf32>
    %cst_74 = arith.constant 3.200000e+01 : f32
    %78 = vector.broadcast %cst_74 : f32 to vector<1x128xf32>
    %79 = arith.divf %77, %78 : vector<1x128xf32>
    %80 = arith.mulf %75, %75 : vector<32x128xf32>
    %cst_75 = arith.constant dense<0.000000e+00> : vector<128xf32>
    %81 = vector.multi_reduction <add>, %80, %cst_75 [0] : vector<32x128xf32> to vector<128xf32>
    %82 = vector.shape_cast %81 : vector<128xf32> to vector<1x128xf32>
    %cst_76 = arith.constant 3.200000e+01 : f32
    %83 = vector.broadcast %cst_76 : f32 to vector<1x128xf32>
    %84 = arith.divf %82, %83 : vector<1x128xf32>
    %85 = arith.mulf %79, %79 : vector<1x128xf32>
    %86 = arith.subf %84, %85 : vector<1x128xf32>
    %c0_77 = arith.constant 0 : index
    %c0_78 = arith.constant 0 : index
    %87 = vector.load %arg7[%c0_77, %c0_78] : memref<1x128xf32, #tpu.memory_space<vmem>>, vector<1x128xf32>
    %cst_79 = arith.constant 9.99999974E-6 : f32
    %88 = vector.broadcast %cst_79 : f32 to vector<1x128xf32>
    %89 = arith.addf %86, %88 : vector<1x128xf32>
    %90 = math.rsqrt %89 : vector<1x128xf32>
    %91 = arith.mulf %87, %90 : vector<1x128xf32>
    %c0_80 = arith.constant 0 : index
    %c0_81 = arith.constant 0 : index
    %92 = vector.load %arg8[%c0_80, %c0_81] : memref<1x128xf32, #tpu.memory_space<vmem>>, vector<1x128xf32>
    %93 = arith.mulf %79, %91 : vector<1x128xf32>
    %94 = arith.subf %92, %93 : vector<1x128xf32>
    %95 = vector.broadcast %91 : vector<1x128xf32> to vector<32x128xf32>
    %96 = arith.mulf %75, %95 : vector<32x128xf32>
    %97 = vector.broadcast %94 : vector<1x128xf32> to vector<32x128xf32>
    %98 = arith.addf %96, %97 : vector<32x128xf32>
    %cst_82 = arith.constant 2.000000e-01 : f32
    %99 = vector.broadcast %cst_82 : f32 to vector<32x128xf32>
    %100 = arith.mulf %99, %98 : vector<32x128xf32>
    %101 = arith.maximumf %98, %100 : vector<32x128xf32>
    %cst_83 = arith.constant 0.000000e+00 : f32
    %102 = vector.broadcast %cst_83 : f32 to vector<8x256xf32>
    %c0_84 = arith.constant 0 : index
    %c0_85 = arith.constant 0 : index
    %c0_86 = arith.constant 0 : index
    %103 = vector.load %arg9[%c0_84, %c0_85, %c0_86] : memref<9x8x32xf32, #tpu.memory_space<vmem>>, vector<1x8x32xf32>
    %104 = vector.shape_cast %103 : vector<1x8x32xf32> to vector<8x32xf32>
    %cst_87 = arith.constant dense<0.000000e+00> : vector<8x128xf32>
    %105 = tpu.matmul %104, %101, %cst_87 {dimension_numbers = #tpu.dot_dimension_numbers<[1], [0], [0], [1], [0, 0, 1, 1], [], []>} : vector<8x32xf32>, vector<32x128xf32>, vector<8x128xf32> -> vector<8x128xf32>
    %c0_88 = arith.constant 0 : index
    %c0_89 = arith.constant 0 : index
    %c0_90 = arith.constant 0 : index
    %106 = vector.load %arg10[%c0_88, %c0_89, %c0_90] : memref<9x128x256xf32, #tpu.memory_space<vmem>>, vector<1x128x256xf32>
    %107 = vector.shape_cast %106 : vector<1x128x256xf32> to vector<128x256xf32>
    %cst_91 = arith.constant dense<0.000000e+00> : vector<8x256xf32>
    %108 = tpu.matmul %105, %107, %cst_91 {dimension_numbers = #tpu.dot_dimension_numbers<[1], [0], [0], [1], [0, 0, 1, 1], [], []>} : vector<8x128xf32>, vector<128x256xf32>, vector<8x256xf32> -> vector<8x256xf32>
    %109 = arith.addf %102, %108 : vector<8x256xf32>
    %c1_92 = arith.constant 1 : index
    %c0_93 = arith.constant 0 : index
    %c0_94 = arith.constant 0 : index
    %110 = vector.load %arg9[%c1_92, %c0_93, %c0_94] : memref<9x8x32xf32, #tpu.memory_space<vmem>>, vector<1x8x32xf32>
    %111 = vector.shape_cast %110 : vector<1x8x32xf32> to vector<8x32xf32>
    %cst_95 = arith.constant dense<0.000000e+00> : vector<8x128xf32>
    %112 = tpu.matmul %111, %101, %cst_95 {dimension_numbers = #tpu.dot_dimension_numbers<[1], [0], [0], [1], [0, 0, 1, 1], [], []>} : vector<8x32xf32>, vector<32x128xf32>, vector<8x128xf32> -> vector<8x128xf32>
    %c1_96 = arith.constant 1 : index
    %c0_97 = arith.constant 0 : index
    %c0_98 = arith.constant 0 : index
    %113 = vector.load %arg10[%c1_96, %c0_97, %c0_98] : memref<9x128x256xf32, #tpu.memory_space<vmem>>, vector<1x128x256xf32>
    %114 = vector.shape_cast %113 : vector<1x128x256xf32> to vector<128x256xf32>
    %cst_99 = arith.constant dense<0.000000e+00> : vector<8x256xf32>
    %115 = tpu.matmul %112, %114, %cst_99 {dimension_numbers = #tpu.dot_dimension_numbers<[1], [0], [0], [1], [0, 0, 1, 1], [], []>} : vector<8x128xf32>, vector<128x256xf32>, vector<8x256xf32> -> vector<8x256xf32>
    %116 = arith.addf %109, %115 : vector<8x256xf32>
    %c2_100 = arith.constant 2 : index
    %c0_101 = arith.constant 0 : index
    %c0_102 = arith.constant 0 : index
    %117 = vector.load %arg9[%c2_100, %c0_101, %c0_102] : memref<9x8x32xf32, #tpu.memory_space<vmem>>, vector<1x8x32xf32>
    %118 = vector.shape_cast %117 : vector<1x8x32xf32> to vector<8x32xf32>
    %cst_103 = arith.constant dense<0.000000e+00> : vector<8x128xf32>
    %119 = tpu.matmul %118, %101, %cst_103 {dimension_numbers = #tpu.dot_dimension_numbers<[1], [0], [0], [1], [0, 0, 1, 1], [], []>} : vector<8x32xf32>, vector<32x128xf32>, vector<8x128xf32> -> vector<8x128xf32>
    %c2_104 = arith.constant 2 : index
    %c0_105 = arith.constant 0 : index
    %c0_106 = arith.constant 0 : index
    %120 = vector.load %arg10[%c2_104, %c0_105, %c0_106] : memref<9x128x256xf32, #tpu.memory_space<vmem>>, vector<1x128x256xf32>
    %121 = vector.shape_cast %120 : vector<1x128x256xf32> to vector<128x256xf32>
    %cst_107 = arith.constant dense<0.000000e+00> : vector<8x256xf32>
    %122 = tpu.matmul %119, %121, %cst_107 {dimension_numbers = #tpu.dot_dimension_numbers<[1], [0], [0], [1], [0, 0, 1, 1], [], []>} : vector<8x128xf32>, vector<128x256xf32>, vector<8x256xf32> -> vector<8x256xf32>
    %123 = arith.addf %116, %122 : vector<8x256xf32>
    %c3_108 = arith.constant 3 : index
    %c0_109 = arith.constant 0 : index
    %c0_110 = arith.constant 0 : index
    %124 = vector.load %arg9[%c3_108, %c0_109, %c0_110] : memref<9x8x32xf32, #tpu.memory_space<vmem>>, vector<1x8x32xf32>
    %125 = vector.shape_cast %124 : vector<1x8x32xf32> to vector<8x32xf32>
    %cst_111 = arith.constant dense<0.000000e+00> : vector<8x128xf32>
    %126 = tpu.matmul %125, %101, %cst_111 {dimension_numbers = #tpu.dot_dimension_numbers<[1], [0], [0], [1], [0, 0, 1, 1], [], []>} : vector<8x32xf32>, vector<32x128xf32>, vector<8x128xf32> -> vector<8x128xf32>
    %c3_112 = arith.constant 3 : index
    %c0_113 = arith.constant 0 : index
    %c0_114 = arith.constant 0 : index
    %127 = vector.load %arg10[%c3_112, %c0_113, %c0_114] : memref<9x128x256xf32, #tpu.memory_space<vmem>>, vector<1x128x256xf32>
    %128 = vector.shape_cast %127 : vector<1x128x256xf32> to vector<128x256xf32>
    %cst_115 = arith.constant dense<0.000000e+00> : vector<8x256xf32>
    %129 = tpu.matmul %126, %128, %cst_115 {dimension_numbers = #tpu.dot_dimension_numbers<[1], [0], [0], [1], [0, 0, 1, 1], [], []>} : vector<8x128xf32>, vector<128x256xf32>, vector<8x256xf32> -> vector<8x256xf32>
    %130 = arith.addf %123, %129 : vector<8x256xf32>
    %c4_116 = arith.constant 4 : index
    %c0_117 = arith.constant 0 : index
    %c0_118 = arith.constant 0 : index
    %131 = vector.load %arg9[%c4_116, %c0_117, %c0_118] : memref<9x8x32xf32, #tpu.memory_space<vmem>>, vector<1x8x32xf32>
    %132 = vector.shape_cast %131 : vector<1x8x32xf32> to vector<8x32xf32>
    %cst_119 = arith.constant dense<0.000000e+00> : vector<8x128xf32>
    %133 = tpu.matmul %132, %101, %cst_119 {dimension_numbers = #tpu.dot_dimension_numbers<[1], [0], [0], [1], [0, 0, 1, 1], [], []>} : vector<8x32xf32>, vector<32x128xf32>, vector<8x128xf32> -> vector<8x128xf32>
    %c4_120 = arith.constant 4 : index
    %c0_121 = arith.constant 0 : index
    %c0_122 = arith.constant 0 : index
    %134 = vector.load %arg10[%c4_120, %c0_121, %c0_122] : memref<9x128x256xf32, #tpu.memory_space<vmem>>, vector<1x128x256xf32>
    %135 = vector.shape_cast %134 : vector<1x128x256xf32> to vector<128x256xf32>
    %cst_123 = arith.constant dense<0.000000e+00> : vector<8x256xf32>
    %136 = tpu.matmul %133, %135, %cst_123 {dimension_numbers = #tpu.dot_dimension_numbers<[1], [0], [0], [1], [0, 0, 1, 1], [], []>} : vector<8x128xf32>, vector<128x256xf32>, vector<8x256xf32> -> vector<8x256xf32>
    %137 = arith.addf %130, %136 : vector<8x256xf32>
    %c5_124 = arith.constant 5 : index
    %c0_125 = arith.constant 0 : index
    %c0_126 = arith.constant 0 : index
    %138 = vector.load %arg9[%c5_124, %c0_125, %c0_126] : memref<9x8x32xf32, #tpu.memory_space<vmem>>, vector<1x8x32xf32>
    %139 = vector.shape_cast %138 : vector<1x8x32xf32> to vector<8x32xf32>
    %cst_127 = arith.constant dense<0.000000e+00> : vector<8x128xf32>
    %140 = tpu.matmul %139, %101, %cst_127 {dimension_numbers = #tpu.dot_dimension_numbers<[1], [0], [0], [1], [0, 0, 1, 1], [], []>} : vector<8x32xf32>, vector<32x128xf32>, vector<8x128xf32> -> vector<8x128xf32>
    %c5_128 = arith.constant 5 : index
    %c0_129 = arith.constant 0 : index
    %c0_130 = arith.constant 0 : index
    %141 = vector.load %arg10[%c5_128, %c0_129, %c0_130] : memref<9x128x256xf32, #tpu.memory_space<vmem>>, vector<1x128x256xf32>
    %142 = vector.shape_cast %141 : vector<1x128x256xf32> to vector<128x256xf32>
    %cst_131 = arith.constant dense<0.000000e+00> : vector<8x256xf32>
    %143 = tpu.matmul %140, %142, %cst_131 {dimension_numbers = #tpu.dot_dimension_numbers<[1], [0], [0], [1], [0, 0, 1, 1], [], []>} : vector<8x128xf32>, vector<128x256xf32>, vector<8x256xf32> -> vector<8x256xf32>
    %144 = arith.addf %137, %143 : vector<8x256xf32>
    %c6_132 = arith.constant 6 : index
    %c0_133 = arith.constant 0 : index
    %c0_134 = arith.constant 0 : index
    %145 = vector.load %arg9[%c6_132, %c0_133, %c0_134] : memref<9x8x32xf32, #tpu.memory_space<vmem>>, vector<1x8x32xf32>
    %146 = vector.shape_cast %145 : vector<1x8x32xf32> to vector<8x32xf32>
    %cst_135 = arith.constant dense<0.000000e+00> : vector<8x128xf32>
    %147 = tpu.matmul %146, %101, %cst_135 {dimension_numbers = #tpu.dot_dimension_numbers<[1], [0], [0], [1], [0, 0, 1, 1], [], []>} : vector<8x32xf32>, vector<32x128xf32>, vector<8x128xf32> -> vector<8x128xf32>
    %c6_136 = arith.constant 6 : index
    %c0_137 = arith.constant 0 : index
    %c0_138 = arith.constant 0 : index
    %148 = vector.load %arg10[%c6_136, %c0_137, %c0_138] : memref<9x128x256xf32, #tpu.memory_space<vmem>>, vector<1x128x256xf32>
    %149 = vector.shape_cast %148 : vector<1x128x256xf32> to vector<128x256xf32>
    %cst_139 = arith.constant dense<0.000000e+00> : vector<8x256xf32>
    %150 = tpu.matmul %147, %149, %cst_139 {dimension_numbers = #tpu.dot_dimension_numbers<[1], [0], [0], [1], [0, 0, 1, 1], [], []>} : vector<8x128xf32>, vector<128x256xf32>, vector<8x256xf32> -> vector<8x256xf32>
    %151 = arith.addf %144, %150 : vector<8x256xf32>
    %c7_140 = arith.constant 7 : index
    %c0_141 = arith.constant 0 : index
    %c0_142 = arith.constant 0 : index
    %152 = vector.load %arg9[%c7_140, %c0_141, %c0_142] : memref<9x8x32xf32, #tpu.memory_space<vmem>>, vector<1x8x32xf32>
    %153 = vector.shape_cast %152 : vector<1x8x32xf32> to vector<8x32xf32>
    %cst_143 = arith.constant dense<0.000000e+00> : vector<8x128xf32>
    %154 = tpu.matmul %153, %101, %cst_143 {dimension_numbers = #tpu.dot_dimension_numbers<[1], [0], [0], [1], [0, 0, 1, 1], [], []>} : vector<8x32xf32>, vector<32x128xf32>, vector<8x128xf32> -> vector<8x128xf32>
    %c7_144 = arith.constant 7 : index
    %c0_145 = arith.constant 0 : index
    %c0_146 = arith.constant 0 : index
    %155 = vector.load %arg10[%c7_144, %c0_145, %c0_146] : memref<9x128x256xf32, #tpu.memory_space<vmem>>, vector<1x128x256xf32>
    %156 = vector.shape_cast %155 : vector<1x128x256xf32> to vector<128x256xf32>
    %cst_147 = arith.constant dense<0.000000e+00> : vector<8x256xf32>
    %157 = tpu.matmul %154, %156, %cst_147 {dimension_numbers = #tpu.dot_dimension_numbers<[1], [0], [0], [1], [0, 0, 1, 1], [], []>} : vector<8x128xf32>, vector<128x256xf32>, vector<8x256xf32> -> vector<8x256xf32>
    %158 = arith.addf %151, %157 : vector<8x256xf32>
    %c8_148 = arith.constant 8 : index
    %c0_149 = arith.constant 0 : index
    %c0_150 = arith.constant 0 : index
    %159 = vector.load %arg9[%c8_148, %c0_149, %c0_150] : memref<9x8x32xf32, #tpu.memory_space<vmem>>, vector<1x8x32xf32>
    %160 = vector.shape_cast %159 : vector<1x8x32xf32> to vector<8x32xf32>
    %cst_151 = arith.constant dense<0.000000e+00> : vector<8x128xf32>
    %161 = tpu.matmul %160, %101, %cst_151 {dimension_numbers = #tpu.dot_dimension_numbers<[1], [0], [0], [1], [0, 0, 1, 1], [], []>} : vector<8x32xf32>, vector<32x128xf32>, vector<8x128xf32> -> vector<8x128xf32>
    %c8_152 = arith.constant 8 : index
    %c0_153 = arith.constant 0 : index
    %c0_154 = arith.constant 0 : index
    %162 = vector.load %arg10[%c8_152, %c0_153, %c0_154] : memref<9x128x256xf32, #tpu.memory_space<vmem>>, vector<1x128x256xf32>
    %163 = vector.shape_cast %162 : vector<1x128x256xf32> to vector<128x256xf32>
    %cst_155 = arith.constant dense<0.000000e+00> : vector<8x256xf32>
    %164 = tpu.matmul %161, %163, %cst_155 {dimension_numbers = #tpu.dot_dimension_numbers<[1], [0], [0], [1], [0, 0, 1, 1], [], []>} : vector<8x128xf32>, vector<128x256xf32>, vector<8x256xf32> -> vector<8x256xf32>
    %165 = arith.addf %158, %164 : vector<8x256xf32>
    %c0_156 = arith.constant 0 : index
    %c0_157 = arith.constant 0 : index
    %166 = vector.load %arg11[%c0_156, %c0_157] : memref<1x256xf32, #tpu.memory_space<vmem>>, vector<1x256xf32>
    %167 = vector.broadcast %166 : vector<1x256xf32> to vector<8x256xf32>
    %168 = arith.addf %165, %167 : vector<8x256xf32>
    %cst_158 = arith.constant dense<0.000000e+00> : vector<256xf32>
    %169 = vector.multi_reduction <add>, %168, %cst_158 [0] : vector<8x256xf32> to vector<256xf32>
    %170 = vector.shape_cast %169 : vector<256xf32> to vector<1x256xf32>
    %cst_159 = arith.constant 8.000000e+00 : f32
    %171 = vector.broadcast %cst_159 : f32 to vector<1x256xf32>
    %172 = arith.divf %170, %171 : vector<1x256xf32>
    %173 = arith.mulf %168, %168 : vector<8x256xf32>
    %cst_160 = arith.constant dense<0.000000e+00> : vector<256xf32>
    %174 = vector.multi_reduction <add>, %173, %cst_160 [0] : vector<8x256xf32> to vector<256xf32>
    %175 = vector.shape_cast %174 : vector<256xf32> to vector<1x256xf32>
    %cst_161 = arith.constant 8.000000e+00 : f32
    %176 = vector.broadcast %cst_161 : f32 to vector<1x256xf32>
    %177 = arith.divf %175, %176 : vector<1x256xf32>
    %178 = arith.mulf %172, %172 : vector<1x256xf32>
    %179 = arith.subf %177, %178 : vector<1x256xf32>
    %c0_162 = arith.constant 0 : index
    %c0_163 = arith.constant 0 : index
    %180 = vector.load %arg12[%c0_162, %c0_163] : memref<1x256xf32, #tpu.memory_space<vmem>>, vector<1x256xf32>
    %cst_164 = arith.constant 9.99999974E-6 : f32
    %181 = vector.broadcast %cst_164 : f32 to vector<1x256xf32>
    %182 = arith.addf %179, %181 : vector<1x256xf32>
    %183 = math.rsqrt %182 : vector<1x256xf32>
    %184 = arith.mulf %180, %183 : vector<1x256xf32>
    %c0_165 = arith.constant 0 : index
    %c0_166 = arith.constant 0 : index
    %185 = vector.load %arg13[%c0_165, %c0_166] : memref<1x256xf32, #tpu.memory_space<vmem>>, vector<1x256xf32>
    %186 = arith.mulf %172, %184 : vector<1x256xf32>
    %187 = arith.subf %185, %186 : vector<1x256xf32>
    %188 = vector.broadcast %184 : vector<1x256xf32> to vector<8x256xf32>
    %189 = arith.mulf %168, %188 : vector<8x256xf32>
    %190 = vector.broadcast %187 : vector<1x256xf32> to vector<8x256xf32>
    %191 = arith.addf %189, %190 : vector<8x256xf32>
    %cst_167 = arith.constant 2.000000e-01 : f32
    %192 = vector.broadcast %cst_167 : f32 to vector<8x256xf32>
    %193 = arith.mulf %192, %191 : vector<8x256xf32>
    %194 = arith.maximumf %191, %193 : vector<8x256xf32>
    %c0_168 = arith.constant 0 : index
    %c0_169 = arith.constant 0 : index
    %195 = vector.load %arg14[%c0_168, %c0_169] : memref<2x8xf32, #tpu.memory_space<vmem>>, vector<2x8xf32>
    %cst_170 = arith.constant dense<0.000000e+00> : vector<2x256xf32>
    %196 = tpu.matmul %195, %194, %cst_170 {dimension_numbers = #tpu.dot_dimension_numbers<[1], [0], [0], [1], [0, 0, 1, 1], [], []>} : vector<2x8xf32>, vector<8x256xf32>, vector<2x256xf32> -> vector<2x256xf32>
    %c0_171 = arith.constant 0 : index
    %c0_172 = arith.constant 0 : index
    %197 = vector.load %arg15[%c0_171, %c0_172] : memref<256x1xf32, #tpu.memory_space<vmem>>, vector<256x1xf32>
    %cst_173 = arith.constant dense<0.000000e+00> : vector<2x1xf32>
    %198 = tpu.matmul %196, %197, %cst_173 {dimension_numbers = #tpu.dot_dimension_numbers<[1], [0], [0], [1], [0, 0, 1, 1], [], []>} : vector<2x256xf32>, vector<256x1xf32>, vector<2x1xf32> -> vector<2x1xf32>
    %c0_174 = arith.constant 0 : index
    %c0_175 = arith.constant 0 : index
    %199 = vector.load %arg16[%c0_174, %c0_175] : memref<1x1xf32, #tpu.memory_space<vmem>>, vector<1x1xf32>
    %200 = vector.broadcast %199 : vector<1x1xf32> to vector<2x1xf32>
    %201 = arith.addf %198, %200 : vector<2x1xf32>
    %202 = arith.negf %201 : vector<2x1xf32>
    %203 = math.exp %202 : vector<2x1xf32>
    %cst_176 = arith.constant 1.000000e+00 : f32
    %204 = vector.broadcast %cst_176 : f32 to vector<2x1xf32>
    %205 = arith.addf %204, %203 : vector<2x1xf32>
    %206 = arith.divf %204, %205 : vector<2x1xf32>
    %c0_177 = arith.constant 0 : index
    %c0_178 = arith.constant 0 : index
    %207 = vector.load %arg17[%c0_177, %c0_178] : memref<2x1xf32, #tpu.memory_space<vmem>>, vector<2x1xf32>
    tpu.vector_store %arg17[%c0_177, %c0_178], %206 {strides = array<i32>} : memref<2x1xf32, #tpu.memory_space<vmem>>, vector<2x1xf32>,
    return
  }
  func.func @transform_0(%arg0: i32) -> (i32, i32) {
    %c0_i32 = arith.constant 0 : i32
    %c0_i32_0 = arith.constant 0 : i32
    %c0_i32_1 = arith.constant 0 : i32
    return %c0_i32, %c0_i32_0 : i32, i32
  }
  func.func @transform_1(%arg0: i32) -> (i32, i32) {
    %c0_i32 = arith.constant 0 : i32
    %c0_i32_0 = arith.constant 0 : i32
    %c0_i32_1 = arith.constant 0 : i32
    return %c0_i32, %c0_i32_0 : i32, i32
  }
  func.func @transform_2(%arg0: i32) -> (i32, i32) {
    %c0_i32 = arith.constant 0 : i32
    %c0_i32_0 = arith.constant 0 : i32
    %c0_i32_1 = arith.constant 0 : i32
    return %c0_i32, %c0_i32_0 : i32, i32
  }
  func.func @transform_3(%arg0: i32) -> (i32, i32, i32) {
    %c0_i32 = arith.constant 0 : i32
    %c0_i32_0 = arith.constant 0 : i32
    %c0_i32_1 = arith.constant 0 : i32
    %c0_i32_2 = arith.constant 0 : i32
    return %c0_i32, %c0_i32_0, %c0_i32_1 : i32, i32, i32
  }
  func.func @transform_4(%arg0: i32) -> (i32, i32, i32) {
    %c0_i32 = arith.constant 0 : i32
    %c0_i32_0 = arith.constant 0 : i32
    %c0_i32_1 = arith.constant 0 : i32
    %c0_i32_2 = arith.constant 0 : i32
    return %c0_i32, %c0_i32_0, %c0_i32_1 : i32, i32, i32
  }
  func.func @transform_5(%arg0: i32) -> (i32, i32) {
    %c0_i32 = arith.constant 0 : i32
    %c0_i32_0 = arith.constant 0 : i32
    %c0_i32_1 = arith.constant 0 : i32
    return %c0_i32, %c0_i32_0 : i32, i32
  }
  func.func @transform_6(%arg0: i32) -> (i32, i32) {
    %c0_i32 = arith.constant 0 : i32
    %c0_i32_0 = arith.constant 0 : i32
    %c0_i32_1 = arith.constant 0 : i32
    return %c0_i32, %c0_i32_0 : i32, i32
  }
  func.func @transform_7(%arg0: i32) -> (i32, i32) {
    %c0_i32 = arith.constant 0 : i32
    %c0_i32_0 = arith.constant 0 : i32
    %c0_i32_1 = arith.constant 0 : i32
    return %c0_i32, %c0_i32_0 : i32, i32
  }
  func.func @transform_8(%arg0: i32) -> (i32, i32, i32) {
    %c0_i32 = arith.constant 0 : i32
    %c0_i32_0 = arith.constant 0 : i32
    %c0_i32_1 = arith.constant 0 : i32
    %c0_i32_2 = arith.constant 0 : i32
    return %c0_i32, %c0_i32_0, %c0_i32_1 : i32, i32, i32
  }
  func.func @transform_9(%arg0: i32) -> (i32, i32, i32) {
    %c0_i32 = arith.constant 0 : i32
    %c0_i32_0 = arith.constant 0 : i32
    %c0_i32_1 = arith.constant 0 : i32
    %c0_i32_2 = arith.constant 0 : i32
    return %c0_i32, %c0_i32_0, %c0_i32_1 : i32, i32, i32
  }
  func.func @transform_10(%arg0: i32) -> (i32, i32) {
    %c0_i32 = arith.constant 0 : i32
    %c0_i32_0 = arith.constant 0 : i32
    %c0_i32_1 = arith.constant 0 : i32
    return %c0_i32, %c0_i32_0 : i32, i32
  }
  func.func @transform_11(%arg0: i32) -> (i32, i32) {
    %c0_i32 = arith.constant 0 : i32
    %c0_i32_0 = arith.constant 0 : i32
    %c0_i32_1 = arith.constant 0 : i32
    return %c0_i32, %c0_i32_0 : i32, i32
  }
  func.func @transform_12(%arg0: i32) -> (i32, i32) {
    %c0_i32 = arith.constant 0 : i32
    %c0_i32_0 = arith.constant 0 : i32
    %c0_i32_1 = arith.constant 0 : i32
    return %c0_i32, %c0_i32_0 : i32, i32
  }
  func.func @transform_13(%arg0: i32) -> (i32, i32) {
    %c0_i32 = arith.constant 0 : i32
    %c0_i32_0 = arith.constant 0 : i32
    %c0_i32_1 = arith.constant 0 : i32
    return %c0_i32, %c0_i32_0 : i32, i32
  }
  func.func @transform_14(%arg0: i32) -> (i32, i32) {
    %c0_i32 = arith.constant 0 : i32
    %c0_i32_0 = arith.constant 0 : i32
    %c0_i32_1 = arith.constant 0 : i32
    return %c0_i32, %c0_i32_0 : i32, i32
  }
  func.func @transform_15(%arg0: i32) -> (i32, i32) {
    %c0_i32 = arith.constant 0 : i32
    %c0_i32_0 = arith.constant 0 : i32
    %c0_i32_1 = arith.constant 0 : i32
    return %c0_i32, %c0_i32_0 : i32, i32
  }
  func.func @transform_16(%arg0: i32) -> (i32, i32) {
    %c0_i32 = arith.constant 0 : i32
    %c0_i32_0 = arith.constant 0 : i32
    %c0_i32_1 = arith.constant 0 : i32
    return %c0_i32, %c0_i32_0 : i32, i32
  }
}

</mosaic_0001>

<bundles_post_ra>
// kernel: discriminator_forward.1
= control target key start
LH: loop header
LB: loop body
LE: loop exit
PB: predicated region body
PF: predicated region fallthrough
CT: control target
= control target key end

     0   :  { %s6652_s0 = inlined_call_operand.vmem [shape: f32[128,9], index: 0, kind: input, shape index: {}]   ;;  %s6653_s1 = inlined_call_operand.hbm [shape: f32[9,64], index: 1, kind: input, shape index: {}]   ;;  %s6654_s2 = inlined_call_operand.hbm [shape: f32[1,64], index: 2, kind: input, shape index: {}]   ;;  %s6655_s3 = inlined_call_operand.hbm [shape: f32[9,32,128], index: 3, kind: input, shape index: {}]   ;;  %s6656_s4 = inlined_call_operand.hbm [shape: f32[9,64,128], index: 4, kind: input, shape index: {}]   ;;  %s6657_s5 = inlined_call_operand.hbm [shape: f32[1,128], index: 5, kind: input, shape index: {}]   ;;  %s6658_s6 = inlined_call_operand.hbm [shape: f32[1,128], index: 6, kind: input, shape index: {}]   ;;  %s6659_s7 = inlined_call_operand.hbm [shape: f32[1,128], index: 7, kind: input, shape index: {}]   ;;  %s6660_s8 = inlined_call_operand.hbm [shape: f32[9,8,32], index: 8, kind: input, shape index: {}]   ;;  %s6661_s9 = inlined_call_operand.hbm [shape: f32[9,128,256], index: 9, kind: input, shape index: {}]   ;;  %s6662_s10 = inlined_call_operand.hbm [shape: f32[1,256], index: 10, kind: input, shape index: {}]   ;;  %s6663_s11 = inlined_call_operand.hbm [shape: f32[1,256], index: 11, kind: input, shape index: {}]   ;;  %s6664_s12 = inlined_call_operand.hbm [shape: f32[1,256], index: 12, kind: input, shape index: {}]   ;;  %s6665_s13 = inlined_call_operand.hbm [shape: f32[2,8], index: 13, kind: input, shape index: {}]   ;;  %s6666_s14 = inlined_call_operand.vmem [shape: f32[256,1], index: 14, kind: input, shape index: {}]   ;;  %s6667_s15 = inlined_call_operand.<no memory space> [shape: f32[1,1], index: 15, kind: input, shape index: {}]   ;;  %s6668_s16 = inlined_call_operand.vmem [shape: f32[2,1], index: 16, kind: output, shape index: {}]  }
   0x1   :  { %6670 = sst [smem:[#allocation30_spill]] %s6652_s0  ;;  %v21_v0 = vstv %s6667_s15 }
   0x2   :  { %22 = vst [vmem:[#allocation2] sm:$0x1] %v21_v0 }
   0x3   :  { %23 = vsyncpa [#allocation4], 0 }
   0x4   :  { %24 = vsyncpa [#allocation6], 0 }
   0x5   :  { %25 = vsyncpa [#allocation9], 0 }
   0x6   :  { %26 = vsyncpa [#allocation12], 0 }
   0x7   :  { %27 = vsyncpa [#allocation15], 0 }
   0x8   :  { %28 = vsyncpa [#allocation18], 0 }
   0x9   :  { %29 = vsyncpa [#allocation21], 0  ;;  %s5711_s23 = smov [#allocation5]  }
   0xa   :  { %s50_s24 = sshll.u32 %s5711_s23, 4  ;;  %s51_s24 = int_to_ptr.vmem [resolvable:$true] %s50_s24 }
   0xb   :  { %s5445_s25 = scalar_lea.vmem %s51_s24, 16  ;;  %s5449_s26 = scalar_lea.vmem %s51_s24, 32 }
   0xc   :  { %p5446_p0 = scmp.ne.s32.totalorder %s51_s24, %s5445_s25  ;;  %p5450_p1 = scmp.lt.s32.totalorder %s51_s24, %s51_s24 }
   0xd   :  { %p5451_p2 = scmp.lt.s32.totalorder %s5449_s26, %s5445_s25 }
   0xf   :  { %p5452_p3 = por %p5451_p2, %p5450_p1 }
  0x11   :  { %p5453_p4 = pnand %p5452_p3, %p5446_p0 }
  0x13   :  { %5456 = shalt.err (!%p5453_p4)
}
  0x14   :  { %53 = dma.hbm_to_vmem [thread:$0]  %s6654_s2, 16, %s51_s24, [#allocation6]  }
  0x15   :  { %s5712_s28 = smov [#allocation8]   ;;  %s5713_s30 = smov [#allocation11]  }
  0x16   :  { %s71_s29 = sshll.u32 %s5712_s28, 4  ;;  %s94_s0 = sshll.u32 %s5713_s30, 4  ;;  %s72_s29 = int_to_ptr.vmem [resolvable:$true] %s71_s29  ;;  %s95_s0 = int_to_ptr.vmem [resolvable:$true] %s94_s0 }
  0x17   :  { %s5465_s17 = scalar_lea.vmem %s72_s29, 9216  ;;  %p5470_p6 = scmp.lt.s32.totalorder %s72_s29, %s72_s29 }
  0x18   :  { %p5466_p5 = scmp.ne.s32.totalorder %s72_s29, %s5465_s17  ;;  %p5471_p7 = scmp.lt.s32.totalorder %s5465_s17, %s5465_s17 }
  0x1a   :  { %p5472_p8 = por %p5471_p7, %p5470_p6 }
  0x1c   :  { %p5473_p9 = pnand %p5472_p8, %p5466_p5 }
  0x1e   :  { %5476 = shalt.err (!%p5473_p9)
}
  0x1f   :  { %s5714_s18 = smov 128   ;;  %s5715_s19 = smov 8  }
  0x20   :  { %77 = dma.hbm_to_vmem [thread:$0]  %s6656_s4, 9216, %s72_s29, [#allocation9], %s5714_s18, %s5714_s18, %s5715_s19  }
  0x21   :  { %s5485_s2 = scalar_lea.vmem %s95_s0, 16  ;;  %s5489_s22 = scalar_lea.vmem %s95_s0, 32 }
  0x22   :  { %p5486_p10 = scmp.ne.s32.totalorder %s95_s0, %s5485_s2  ;;  %p5490_p11 = scmp.lt.s32.totalorder %s95_s0, %s95_s0 }
  0x23   :  { %p5491_p12 = scmp.lt.s32.totalorder %s5489_s22, %s5485_s2 }
  0x25   :  { %p5492_p13 = por %p5491_p12, %p5490_p11 }
  0x27   :  { %p5493_p0 = pnand %p5492_p13, %p5486_p10 }
  0x29   :  { %5496 = shalt.err (!%p5493_p0)
}
  0x2a   :  { %97 = dma.hbm_to_vmem [thread:$0]  %s6658_s6, 16, %s95_s0, [#allocation12]  }
  0x2b   :  { %s5716_s25 = smov [#allocation14]   ;;  %s5717_s15 = smov [#allocation17]  }
  0x2c   :  { %s113_s26 = sshll.u32 %s5716_s25, 4  ;;  %s138_s27 = sshll.u32 %s5717_s15, 4  ;;  %s114_s26 = int_to_ptr.vmem [resolvable:$true] %s113_s26  ;;  %s139_s27 = int_to_ptr.vmem [resolvable:$true] %s138_s27 }
  0x2d   :  { %s5505_s28 = scalar_lea.vmem %s114_s26, 1152  ;;  %p5510_p2 = scmp.lt.s32.totalorder %s114_s26, %s114_s26 }
  0x2e   :  { %p5506_p1 = scmp.ne.s32.totalorder %s114_s26, %s5505_s28  ;;  %p5511_p3 = scmp.lt.s32.totalorder %s5505_s28, %s5505_s28 }
  0x30   :  { %p5512_p4 = por %p5511_p3, %p5510_p2 }
  0x32   :  { %p5513_p5 = pnand %p5512_p4, %p5506_p1 }
  0x34   :  { %5516 = shalt.err (!%p5513_p5)
}
  0x35   :  { %119 = dma.hbm_to_vmem [thread:$0]  %s6660_s8, 1152, %s114_s26, [#allocation15], %s5714_s18, %s5714_s18, %s5715_s19  }
  0x36   :  { %s5525_s6 = scalar_lea.vmem %s139_s27, 32  ;;  %p5530_p7 = scmp.lt.s32.totalorder %s139_s27, %s139_s27 }
  0x37   :  { %p5526_p6 = scmp.ne.s32.totalorder %s139_s27, %s5525_s6  ;;  %p5531_p8 = scmp.lt.s32.totalorder %s5525_s6, %s5525_s6 }
  0x39   :  { %p5532_p9 = por %p5531_p8, %p5530_p7 }
  0x3b   :  { %p5533_p10 = pnand %p5532_p9, %p5526_p6 }
  0x3d   :  { %5536 = shalt.err (!%p5533_p10)
}
  0x3e   :  { %141 = dma.hbm_to_vmem [thread:$0]  %s6662_s10, 32, %s139_s27, [#allocation18]  }
  0x3f   :  { %s5718_s17 = smov [#allocation20]   ;;  %s5719_s21 = smov [#allocation3]  }
  0x40   :  { %s158_s20 = sshll.u32 %s5718_s17, 4  ;;  %s37_s2 = sshll.u32 %s5719_s21, 4  ;;  %s159_s20 = int_to_ptr.vmem [resolvable:$true] %s158_s20  ;;  %s38_s2 = int_to_ptr.vmem [resolvable:$true] %s37_s2 }
  0x41   :  { %s5545_s22 = scalar_lea.vmem %s159_s20, 32  ;;  %p5550_p12 = scmp.lt.s32.totalorder %s159_s20, %s159_s20 }
  0x42   :  { %p5546_p11 = scmp.ne.s32.totalorder %s159_s20, %s5545_s22  ;;  %p5551_p13 = scmp.lt.s32.totalorder %s5545_s22, %s5545_s22 }
  0x44   :  { %p5552_p0 = por %p5551_p13, %p5550_p12 }
  0x46   :  { %p5553_p1 = pnand %p5552_p0, %p5546_p11 }
  0x48   :  { %5556 = shalt.err (!%p5553_p1)
}
  0x49   :  { %161 = dma.hbm_to_vmem [thread:$0]  %s6664_s12, 32, %s159_s20, [#allocation21]  }
  0x4a   :  { %s5565_s24 = scalar_lea.vmem %s38_s2, 256  ;;  %p5570_p3 = scmp.lt.s32.totalorder %s38_s2, %s38_s2 }
  0x4b   :  { %p5566_p2 = scmp.ne.s32.totalorder %s38_s2, %s5565_s24  ;;  %p5571_p4 = scmp.lt.s32.totalorder %s5565_s24, %s5565_s24 }
  0x4d   :  { %p5572_p5 = por %p5571_p4, %p5570_p3 }
  0x4f   :  { %p5573_p6 = pnand %p5572_p5, %p5566_p2 }
  0x51   :  { %5576 = shalt.err (!%p5573_p6)
}
  0x52   :  { %43 = dma.hbm_to_vmem [thread:$0]  %s6653_s1, 256, %s38_s2, [#allocation4], %s5714_s18, %s5714_s18, %s5715_s19  }
  0x53   :  { %s5720_s26 = smov [#allocation7]   ;;  %s5721_s27 = smov [#allocation10]  }
  0x54   :  { %s59_s15 = sshll.u32 %s5720_s26, 4  ;;  %s84_s12 = sshll.u32 %s5721_s27, 4  ;;  %s60_s15 = int_to_ptr.vmem [resolvable:$true] %s59_s15  ;;  %s85_s12 = int_to_ptr.vmem [resolvable:$true] %s84_s12 }
  0x55   :  { %s5585_s28 = scalar_lea.vmem %s60_s15, 4608  ;;  %p5590_p8 = scmp.lt.s32.totalorder %s60_s15, %s60_s15 }
  0x56   :  { %p5586_p7 = scmp.ne.s32.totalorder %s60_s15, %s5585_s28  ;;  %p5591_p9 = scmp.lt.s32.totalorder %s5585_s28, %s5585_s28 }
  0x58   :  { %p5592_p10 = por %p5591_p9, %p5590_p8 }
  0x5a   :  { %p5593_p11 = pnand %p5592_p10, %p5586_p7 }
  0x5c   :  { %5596 = shalt.err (!%p5593_p11)
}
  0x5d   :  { %65 = dma.hbm_to_vmem [thread:$0]  %s6655_s3, 4608, %s60_s15, [#allocation6], %s5714_s18, %s5714_s18, %s5715_s19  }
  0x5e   :  { %s5605_s1 = scalar_lea.vmem %s85_s12, 16  ;;  %s5609_s6 = scalar_lea.vmem %s85_s12, 32 }
  0x5f   :  { %p5606_p12 = scmp.ne.s32.totalorder %s85_s12, %s5605_s1  ;;  %p5610_p13 = scmp.lt.s32.totalorder %s85_s12, %s85_s12 }
  0x60   :  { %p5611_p0 = scmp.lt.s32.totalorder %s5609_s6, %s5605_s1 }
  0x62   :  { %p5612_p1 = por %p5611_p0, %p5610_p13 }
  0x64   :  { %p5613_p2 = pnand %p5612_p1, %p5606_p12 }
  0x66   :  { %5616 = shalt.err (!%p5613_p2)
}
  0x67   :  { %87 = dma.hbm_to_vmem [thread:$0]  %s6657_s5, 16, %s85_s12, [#allocation9]  }
  0x68   :  { %s5722_s17 = smov [#allocation13]   ;;  %s5723_s21 = smov [#allocation16]  }
  0x69   :  { %s104_s20 = sshll.u32 %s5722_s17, 4  ;;  %s125_s2 = sshll.u32 %s5723_s21, 4  ;;  %s105_s20 = int_to_ptr.vmem [resolvable:$true] %s104_s20  ;;  %s126_s2 = int_to_ptr.vmem [resolvable:$true] %s125_s2 }
  0x6a   :  { %s5625_s22 = scalar_lea.vmem %s105_s20, 16  ;;  %s5629_s3 = scalar_lea.vmem %s105_s20, 32 }
  0x6b   :  { %p5626_p3 = scmp.ne.s32.totalorder %s105_s20, %s5625_s22  ;;  %p5630_p4 = scmp.lt.s32.totalorder %s105_s20, %s105_s20 }
  0x6c   :  { %p5631_p5 = scmp.lt.s32.totalorder %s5629_s3, %s5625_s22 }
  0x6e   :  { %p5632_p6 = por %p5631_p5, %p5630_p4 }
  0x70   :  { %p5633_p7 = pnand %p5632_p6, %p5626_p3 }
  0x72   :  { %5636 = shalt.err (!%p5633_p7)
}
  0x73   :  { %107 = dma.hbm_to_vmem [thread:$0]  %s6659_s7, 16, %s105_s20, [#allocation12]  }
  0x74   :  { %s5645_s8 = scalar_lea.vmem %s126_s2, 36864  ;;  %p5650_p9 = scmp.lt.s32.totalorder %s126_s2, %s126_s2 }
  0x75   :  { %p5646_p8 = scmp.ne.s32.totalorder %s126_s2, %s5645_s8  ;;  %p5651_p10 = scmp.lt.s32.totalorder %s5645_s8, %s5645_s8 }
  0x77   :  { %p5652_p11 = por %p5651_p10, %p5650_p9 }
  0x79   :  { %p5653_p12 = pnand %p5652_p11, %p5646_p8 }
  0x7b   :  { %5656 = shalt.err (!%p5653_p12)
}
  0x7c   :  { %s5724_s5 = smov 256   ;;  %s5725_s23 = smov 16  }
  0x7d   :  { %131 = dma.hbm_to_vmem [thread:$0]  %s6661_s9, 36864, %s126_s2, [#allocation15], %s5724_s5, %s5724_s5, %s5725_s23  }
  0x7e   :  { %s5726_s25 = smov [#allocation19]   ;;  %s5727_s15 = smov [#allocation22]  }
  0x7f   :  { %s148_s26 = sshll.u32 %s5726_s25, 4  ;;  %s168_s27 = sshll.u32 %s5727_s15, 4  ;;  %s149_s26 = int_to_ptr.vmem [resolvable:$true] %s148_s26  ;;  %s169_s27 = int_to_ptr.vmem [resolvable:$true] %s168_s27 }
  0x80   :  { %s5665_s7 = scalar_lea.vmem %s149_s26, 32  ;;  %p5670_p0 = scmp.lt.s32.totalorder %s149_s26, %s149_s26 }
  0x81   :  { %p5666_p13 = scmp.ne.s32.totalorder %s149_s26, %s5665_s7  ;;  %p5671_p1 = scmp.lt.s32.totalorder %s5665_s7, %s5665_s7 }
  0x83   :  { %p5672_p2 = por %p5671_p1, %p5670_p0 }
  0x85   :  { %p5673_p3 = pnand %p5672_p2, %p5666_p13 }
  0x87   :  { %5676 = shalt.err (!%p5673_p3)
}
  0x88   :  { %151 = dma.hbm_to_vmem [thread:$0]  %s6663_s11, 32, %s149_s26, [#allocation18]  }
  0x89   :  { %s5685_s4 = scalar_lea.vmem %s169_s27, 32  ;;  %p5690_p5 = scmp.lt.s32.totalorder %s169_s27, %s169_s27 }
  0x8a   :  { %p5686_p4 = scmp.ne.s32.totalorder %s169_s27, %s5685_s4  ;;  %p5691_p6 = scmp.lt.s32.totalorder %s5685_s4, %s5685_s4 }
  0x8c   :  { %p5692_p7 = por %p5691_p6, %p5690_p5 }
  0x8e   :  { %p5693_p8 = pnand %p5692_p7, %p5686_p4 }
  0x90   :  { %5696 = shalt.err (!%p5693_p8)
}
  0x91   :  { %171 = dma.hbm_to_vmem [thread:$0]  %s6665_s13, 32, %s169_s27, [#allocation21]  }
  0x92   :  { %5697 = dma.done.wait [#allocation4], 256  }
  0x93   :  { %5698 = vsyncadd [#allocation4], 4294967040 }
  0x94   :  { %5699 = dma.done.wait [#allocation6], 4624  }
  0x95   :  { %5700 = vsyncadd [#allocation6], 4294962672 }
  0x96   :  { %5701 = dma.done.wait [#allocation9], 9232  }
  0x97   :  { %5702 = vsyncadd [#allocation9], 4294958064 }
  0x98   :  { %5703 = dma.done.wait [#allocation12], 32  }
  0x99   :  { %5704 = vsyncadd [#allocation12], 4294967264 }
  0x9a   :  { %5705 = dma.done.wait [#allocation15], 38016  }
  0x9b   :  { %5706 = vsyncadd [#allocation15], 4294929280 }
  0x9c   :  { %5707 = dma.done.wait [#allocation18], 64  }
  0x9d   :  { %5708 = vsyncadd [#allocation18], 4294967232 }
  0x9e   :  { %5709 = dma.done.wait [#allocation21], 64  }
  0x9f   :  { %5710 = vsyncadd [#allocation21], 4294967232  ;;  %vm289_vm0 = vcmask 1040384   ;;  %vm240_vm1 = vcmask 72704   ;;  %v232_v1 = vld [vmem:[#allocation3 + $0x8] sm:$0x1] }
  0xa0   :  { %v231_v2 = vld [vmem:[#allocation3] sm:$0xff]  ;;  %s6671_s1 = sld [smem:[#allocation30_spill]]  ;;  %4740 = vmatprep.subr.msk.mxu0 %vm289_vm0, %v232_v1  ;;  %v470_v19 = vld [vmem:[#allocation7] sm:$0xff]  ;;  %v5944_v35 = vld [vmem:[#allocation5] ss:$0 sm:$0xff]  ;;  %vm666_vm2 = vcmask 523264  }
  0xa1   :  { %4741 = vmatpush3.msk.msra.mxu0 %vm289_vm0, %v232_v1  ;;  %v568_v20 = vld [vmem:[#allocation7 + $0x20] sm:$0xff]  ;;  %4800 = vmatprep.mubr.f32.mxu1 %v470_v19  ;;  %vm5729_vm3 = vmmov 0   ;;  %vm2335_vm4 = vcmask 261120   ;;  %vm4084_vm5 = vcmask 64512   ;;  %vm4274_vm6 = vcmask 1024  }
  0xa2   :  { %4742 = vmatprep.subr.mxu0 %v231_v2 }
  0xa3   :  { %4743 = vmatpush3.msra.mxu0 %v231_v2 }
  0xa6   :  { %v215_v3 = vld [vmem:[%s6671_s1] sm:$0xff]  ;;  %v216_v4 = vld [vmem:[%s6671_s1 + $0x8] sm:$0xff]  ;;  %v217_v5 = vld [vmem:[%s6671_s1 + $0x10] sm:$0xff] }
  0xa7   :  { %4744 = vmatprep.mubr.msk.f32.mxu0 %vm240_vm1, %v215_v3  ;;  %v218_v6 = vld [vmem:[%s6671_s1 + $0x18] sm:$0xff]  ;;  %v219_v7 = vld [vmem:[%s6671_s1 + $0x20] sm:$0xff]  ;;  %v220_v8 = vld [vmem:[%s6671_s1 + $0x28] sm:$0xff] }
  0xa8   :  { %4745 = vmatmul.mubr.msk.f32.vlgmr.msra.gmra.mxu0 %vm240_vm1, %v216_v4  ;;  %v221_v9 = vld [vmem:[%s6671_s1 + $0x30] sm:$0xff]  ;;  %v222_v10 = vld [vmem:[%s6671_s1 + $0x38] sm:$0xff]  ;;  %v223_v11 = vld [vmem:[%s6671_s1 + $0x40] sm:$0xff] }
  0xa9   :  { %4747 = vmatprep.mubr.msk.f32.mxu0 %vm240_vm1, %v217_v5  ;;  %v224_v12 = vld [vmem:[%s6671_s1 + $0x48] sm:$0xff]  ;;  %v225_v13 = vld [vmem:[%s6671_s1 + $0x50] sm:$0xff]  ;;  %v226_v14 = vld [vmem:[%s6671_s1 + $0x58] sm:$0xff] }
  0xaa   :  { %v227_v15 = vld [vmem:[%s6671_s1 + $0x60] sm:$0xff]  ;;  %v228_v16 = vld [vmem:[%s6671_s1 + $0x68] sm:$0xff]  ;;  %v229_v17 = vld [vmem:[%s6671_s1 + $0x70] sm:$0xff] }
  0xab   :  { %v230_v18 = vld [vmem:[%s6671_s1 + $0x78] sm:$0xff] }
  0xac   :  { %4748 = vmatmul.mubr.msk.f32.gmra.mxu0 %vm240_vm1, %v218_v6 }
  0xad   :  { %4750 = vmatprep.mubr.msk.f32.mxu0 %vm240_vm1, %v219_v7 }
  0xb0   :  { %4751 = vmatmul.mubr.msk.f32.gmra.mxu0 %vm240_vm1, %v220_v8 }
  0xb1   :  { %4753 = vmatprep.mubr.msk.f32.mxu0 %vm240_vm1, %v221_v9 }
  0xb4   :  { %4754 = vmatmul.mubr.msk.f32.gmra.mxu0 %vm240_vm1, %v222_v10 }
  0xb5   :  { %4756 = vmatprep.mubr.msk.f32.mxu0 %vm240_vm1, %v223_v11 }
  0xb8   :  { %4757 = vmatmul.mubr.msk.f32.gmra.mxu0 %vm240_vm1, %v224_v12 }
  0xb9   :  { %4759 = vmatprep.mubr.msk.f32.mxu0 %vm240_vm1, %v225_v13 }
  0xbc   :  { %4760 = vmatmul.mubr.msk.f32.gmra.mxu0 %vm240_vm1, %v226_v14 }
  0xbd   :  { %4762 = vmatprep.mubr.msk.f32.mxu0 %vm240_vm1, %v227_v15 }
  0xc0   :  { %4763 = vmatmul.mubr.msk.f32.gmra.mxu0 %vm240_vm1, %v228_v16 }
  0xc1   :  { %4765 = vmatprep.mubr.msk.f32.mxu0 %vm240_vm1, %v229_v17 }
  0xc4   :  { %4766 = vmatmul.mubr.msk.f32.gmra.mxu0 %vm240_vm1, %v230_v18 }
  0xc5   :  { %4838 = vmatprep.mubr.f32.mxu0 %v568_v20 }
 0x168   :  { %v5934_v21 = vpop.f32.mrf.mxu0 }
 0x169   :  { %v365_v10 = vadd.f32 %v5934_v21, %v5944_v35 }
 0x16a   :  { %v5936_v22 = vpop.f32.mrf.mxu0 }
 0x16b   :  { %v360_v13 = vadd.f32 %v5944_v35, %v5936_v22  ;;  %v439_v16 = vmul.f32 0.2, %v365_v10  ;;  %v471_v22 = vld [vmem:[#allocation7 + $0x8] sm:$0xff] }
 0x16c   :  { %v5938_v23 = vpop.f32.mrf.mxu0 }
 0x16d   :  { %v375_v4 = vadd.f32 %v5938_v23, %v5944_v35  ;;  %v438_v18 = vmul.f32 0.2, %v360_v13  ;;  %v6047_v20 = vmax.f32 %v365_v10, %v439_v16  ;;  %v569_v23 = vld [vmem:[#allocation7 + $0x28] sm:$0xff]  ;;  %v1158_v10 = vld [vmem:[#allocation8 + $0xf0] sm:$0xff]  ;;  %v1155_v16 = vld [vmem:[#allocation8 + $0xd8] sm:$0xff] }
 0x16e   :  { %v5940_v24 = vpop.f32.mrf.mxu0 }
 0x16f   :  { %v370_v7 = vadd.f32 %v5944_v35, %v5940_v24  ;;  %v441_v11 = vmul.f32 0.2, %v375_v4  ;;  %v6053_v21 = vmax.f32 %v360_v13, %v438_v18  ;;  %v665_v24 = vld [vmem:[#allocation8 + $0x78] sm:$0xff]  ;;  %v1157_v13 = vld [vmem:[#allocation8 + $0xe8] sm:$0xff]  ;;  %v1154_v18 = vld [vmem:[#allocation8 + $0xd0] sm:$0xff] }
 0x170   :  { %v4752_v25 = vpop.f32.mrf.mxu0 }
 0x171   :  { %v385_v62 = vadd.f32 %v4752_v25, %v5944_v35  ;;  %v440_v14 = vmul.f32 0.2, %v370_v7  ;;  %v6035_v17 = vmax.f32 %v375_v4, %v441_v11  ;;  %v472_v25 = vld [vmem:[#allocation7 + $0x10] sm:$0xff]  ;;  %v862_v4 = vld [vmem:[#allocation7 + $0x40] sm:$0xff]  ;;  %v865_v11 = vld [vmem:[#allocation7 + $0x58] sm:$0xff] }
 0x172   :  { %v5942_v26 = vpop.f32.mrf.mxu0 }
 0x173   :  { %v380_v1 = vadd.f32 %v5944_v35, %v5942_v26  ;;  %v443_v5 = vmul.f32 0.2, %v385_v62  ;;  %v6041_v19 = vmax.f32 %v370_v7, %v440_v14  ;;  %v570_v26 = vld [vmem:[#allocation7 + $0x30] sm:$0xff]  ;;  %v1159_v7 = vld [vmem:[#allocation8 + $0xf8] sm:$0xff]  ;;  %v1156_v14 = vld [vmem:[#allocation8 + $0xe0] sm:$0xff] }
 0x174   :  { %v4755_v27 = vpop.f32.mrf.mxu0 }
 0x175   :  { %v395_v56 = vadd.f32 %v4755_v27, %v5944_v35  ;;  %v442_v8 = vmul.f32 0.2, %v380_v1  ;;  %v6021_v12 = vmax.f32 %v385_v62, %v443_v5  ;;  %v664_v27 = vld [vmem:[#allocation8 + $0x70] sm:$0xff]  ;;  %v952_v62 = vld [vmem:[#allocation8 + $0x80] sm:$0xff]  ;;  %v863_v5 = vld [vmem:[#allocation7 + $0x48] sm:$0xff] }
 0x176   :  { %v389_v28 = vpop.f32.mrf.mxu0 }
 0x177   :  { %v390_v59 = vadd.f32 %v5944_v35, %v389_v28  ;;  %v445_v63 = vmul.f32 0.2, %v395_v56  ;;  %v6029_v15 = vmax.f32 %v380_v1, %v442_v8  ;;  %v566_v28 = vld [vmem:[#allocation8 + $0x38] sm:$0xff]  ;;  %v864_v8 = vld [vmem:[#allocation7 + $0x50] sm:$0xff] }
 0x178   :  { %v4758_v29 = vpop.f32.mrf.mxu0 }
 0x179   :  { %v405_v50 = vadd.f32 %v4758_v29, %v5944_v35  ;;  %v444_v2 = vmul.f32 0.2, %v390_v59  ;;  %v6005_v6 = vmax.f32 %v395_v56, %v445_v63  ;;  %v571_v29 = vld [vmem:[#allocation7 + $0x38] sm:$0xff] }
 0x17a   :  { %v399_v30 = vpop.f32.mrf.mxu0  ;;  %v955_v56 = vld [vmem:[#allocation8 + $0x98] sm:$0xff] }
 0x17b   :  { %v400_v53 = vadd.f32 %v5944_v35, %v399_v30  ;;  %v447_v57 = vmul.f32 0.2, %v405_v50  ;;  %v6013_v9 = vmax.f32 %v390_v59, %v444_v2  ;;  %v663_v30 = vld [vmem:[#allocation8 + $0x68] sm:$0xff] }
 0x17c   :  { %v4761_v31 = vpop.f32.mrf.mxu0  ;;  %v953_v59 = vld [vmem:[#allocation8 + $0x88] sm:$0xff] }
 0x17d   :  { %v415_v43 = vadd.f32 %v4761_v31, %v5944_v35  ;;  %v446_v60 = vmul.f32 0.2, %v400_v53  ;;  %v5989_v0 = vmax.f32 %v405_v50, %v447_v57  ;;  %v473_v31 = vld [vmem:[#allocation7 + $0x18] sm:$0xff]  ;;  %v954_v57 = vld [vmem:[#allocation8 + $0x90] sm:$0xff] }
 0x17e   :  { %v409_v32 = vpop.f32.mrf.mxu0 }
 0x17f   :  { %v410_v47 = vadd.f32 %v5944_v35, %v409_v32  ;;  %v449_v51 = vmul.f32 0.2, %v415_v43  ;;  %v5997_v3 = vmax.f32 %v400_v53, %v446_v60  ;;  %v662_v32 = vld [vmem:[#allocation8 + $0x60] sm:$0xff]  ;;  %v957_v53 = vld [vmem:[#allocation8 + $0xa8] sm:$0xff] }
 0x180   :  { %v4764_v33 = vpop.f32.mrf.mxu0 }
 0x181   :  { %v425_v37 = vadd.f32 %v4764_v33, %v5944_v35  ;;  %v448_v54 = vmul.f32 0.2, %v410_v47  ;;  %v5975_v58 = vmax.f32 %v415_v43, %v449_v51  ;;  %v565_v33 = vld [vmem:[#allocation8 + $0x30] sm:$0xff]  ;;  %v559_v43 = vld [vmem:[#allocation8] sm:$0xff] }
 0x182   :  { %v419_v34 = vpop.f32.mrf.mxu0  ;;  %v958_v51 = vld [vmem:[#allocation8 + $0xb0] sm:$0xff] }
 0x183   :  { %v420_v40 = vadd.f32 %v5944_v35, %v419_v34  ;;  %v451_v44 = vmul.f32 0.2, %v425_v37  ;;  %v5982_v61 = vmax.f32 %v410_v47, %v448_v54  ;;  %v661_v34 = vld [vmem:[#allocation8 + $0x58] sm:$0xff]  ;;  %v956_v54 = vld [vmem:[#allocation8 + $0xa0] sm:$0xff] }
 0x184   :  { %v4767_v36 = vpop.f32.mrf.mxu0 }
 0x185   :  { %v435_v38 = vadd.f32 %v4767_v36, %v5944_v35  ;;  %v450_v48 = vmul.f32 0.2, %v420_v40  ;;  %v5961_v52 = vmax.f32 %v425_v37, %v451_v44  ;;  %v660_v36 = vld [vmem:[#allocation8 + $0x50] sm:$0xff]  ;;  %v563_v37 = vld [vmem:[#allocation8 + $0x20] sm:$0xff]  ;;  %v959_v44 = vld [vmem:[#allocation8 + $0xb8] sm:$0xff] }
 0x186   :  { %v429_v39 = vpop.f32.mrf.mxu0 }
 0x187   :  { %v453_v41 = vmul.f32 0.2, %v435_v38  ;;  %v430_v42 = vadd.f32 %v5944_v35, %v429_v39  ;;  %v5968_v55 = vmax.f32 %v420_v40, %v450_v48  ;;  %v564_v35 = vld [vmem:[#allocation8 + $0x28] sm:$0xff]  ;;  %v562_v39 = vld [vmem:[#allocation8 + $0x18] sm:$0xff]  ;;  %v658_v40 = vld [vmem:[#allocation8 + $0x40] sm:$0xff] }
 0x189   :  { %v5951_v45 = vmax.f32 %v435_v38, %v453_v41  ;;  %v452_v46 = vmul.f32 0.2, %v430_v42  ;;  %v659_v38 = vld [vmem:[#allocation8 + $0x48] sm:$0xff]  ;;  %v561_v41 = vld [vmem:[#allocation8 + $0x10] sm:$0xff] }
 0x18b   :  { %v5954_v49 = vmax.f32 %v430_v42, %v452_v46  ;;  %4768 = vmatprep.subr.mxu1 %v5951_v45  ;;  %4806 = vmatprep.subr.mxu0 %v5951_v45  ;;  %v560_v42 = vld [vmem:[#allocation8 + $0x8] sm:$0xff] }
 0x18c   :  { %4769 = vmatpush3.msra.mxu1 %v5951_v45  ;;  %4807 = vmatpush3.msra.mxu0 %v5951_v45 }
 0x18d   :  { %4770 = vmatprep.subr.mxu1 %v5954_v49  ;;  %4808 = vmatprep.subr.mxu0 %v5954_v49 }
 0x18e   :  { %4771 = vmatpush3.msra.mxu1 %v5954_v49  ;;  %4809 = vmatpush3.msra.mxu0 %v5954_v49 }
 0x18f   :  { %4772 = vmatprep.subr.mxu1 %v5961_v52  ;;  %4810 = vmatprep.subr.mxu0 %v5961_v52 }
 0x190   :  { %4773 = vmatpush3.msra.mxu1 %v5961_v52  ;;  %4811 = vmatpush3.msra.mxu0 %v5961_v52 }
 0x191   :  { %4774 = vmatprep.subr.mxu1 %v5968_v55  ;;  %4812 = vmatprep.subr.mxu0 %v5968_v55 }
 0x192   :  { %4775 = vmatpush3.msra.mxu1 %v5968_v55  ;;  %4813 = vmatpush3.msra.mxu0 %v5968_v55 }
 0x193   :  { %4776 = vmatprep.subr.mxu1 %v5975_v58  ;;  %4814 = vmatprep.subr.mxu0 %v5975_v58 }
 0x194   :  { %4777 = vmatpush3.msra.mxu1 %v5975_v58  ;;  %4815 = vmatpush3.msra.mxu0 %v5975_v58 }
 0x195   :  { %4778 = vmatprep.subr.mxu1 %v5982_v61  ;;  %4816 = vmatprep.subr.mxu0 %v5982_v61 }
 0x196   :  { %4779 = vmatpush3.msra.mxu1 %v5982_v61  ;;  %4817 = vmatpush3.msra.mxu0 %v5982_v61 }
 0x197   :  { %4780 = vmatprep.subr.mxu1 %v5989_v0  ;;  %4818 = vmatprep.subr.mxu0 %v5989_v0 }
 0x198   :  { %4781 = vmatpush3.msra.mxu1 %v5989_v0  ;;  %4819 = vmatpush3.msra.mxu0 %v5989_v0 }
 0x199   :  { %4782 = vmatprep.subr.mxu1 %v5997_v3  ;;  %4820 = vmatprep.subr.mxu0 %v5997_v3 }
 0x19a   :  { %4783 = vmatpush3.msra.mxu1 %v5997_v3  ;;  %4821 = vmatpush3.msra.mxu0 %v5997_v3 }
 0x19b   :  { %4784 = vmatprep.subr.mxu1 %v6005_v6  ;;  %4822 = vmatprep.subr.mxu0 %v6005_v6 }
 0x19c   :  { %4785 = vmatpush3.msra.mxu1 %v6005_v6  ;;  %4823 = vmatpush3.msra.mxu0 %v6005_v6 }
 0x19d   :  { %4786 = vmatprep.subr.mxu1 %v6013_v9  ;;  %4824 = vmatprep.subr.mxu0 %v6013_v9 }
 0x19e   :  { %4787 = vmatpush3.msra.mxu1 %v6013_v9  ;;  %4825 = vmatpush3.msra.mxu0 %v6013_v9 }
 0x19f   :  { %4788 = vmatprep.subr.mxu1 %v6021_v12  ;;  %4826 = vmatprep.subr.mxu0 %v6021_v12 }
 0x1a0   :  { %4789 = vmatpush3.msra.mxu1 %v6021_v12  ;;  %4827 = vmatpush3.msra.mxu0 %v6021_v12 }
 0x1a1   :  { %4790 = vmatprep.subr.mxu1 %v6029_v15  ;;  %4828 = vmatprep.subr.mxu0 %v6029_v15 }
 0x1a2   :  { %4791 = vmatpush3.msra.mxu1 %v6029_v15  ;;  %4829 = vmatpush3.msra.mxu0 %v6029_v15 }
 0x1a3   :  { %4792 = vmatprep.subr.mxu1 %v6035_v17  ;;  %4830 = vmatprep.subr.mxu0 %v6035_v17 }
 0x1a4   :  { %4793 = vmatpush3.msra.mxu1 %v6035_v17  ;;  %4831 = vmatpush3.msra.mxu0 %v6035_v17 }
 0x1a5   :  { %4794 = vmatprep.subr.mxu1 %v6041_v19  ;;  %4832 = vmatprep.subr.mxu0 %v6041_v19 }
 0x1a6   :  { %4795 = vmatpush3.msra.mxu1 %v6041_v19  ;;  %4833 = vmatpush3.msra.mxu0 %v6041_v19 }
 0x1a7   :  { %4796 = vmatprep.subr.mxu1 %v6047_v20  ;;  %4834 = vmatprep.subr.mxu0 %v6047_v20 }
 0x1a8   :  { %4797 = vmatpush3.msra.mxu1 %v6047_v20  ;;  %4835 = vmatpush3.msra.mxu0 %v6047_v20 }
 0x1a9   :  { %4798 = vmatprep.subr.mxu1 %v6053_v21  ;;  %4836 = vmatprep.subr.mxu0 %v6053_v21 }
 0x1aa   :  { %4799 = vmatpush3.msra.mxu1 %v6053_v21  ;;  %4837 = vmatpush3.msra.mxu0 %v6053_v21 }
 0x1ab   :  { %4801 = vmatmul.mubr.f32.vlgmr.msra.gmra.mxu1 %v471_v22  ;;  %4839 = vmatmul.mubr.f32.vlgmr.msra.gmra.mxu0 %v569_v23  ;;  %v1153_v22 = vld [vmem:[#allocation8 + $0xc8] sm:$0xff]  ;;  %v1152_v23 = vld [vmem:[#allocation8 + $0xc0] sm:$0xff] }
 0x1ac   :  { %4844 = vmatprep.subr.mxu1 %v665_v24  ;;  %4803 = vmatprep.mubr.f32.mxu1 %v472_v25 }
 0x1ad   :  { %4845 = vmatpush3.msra.mxu1 %v665_v24  ;;  %4841 = vmatprep.mubr.f32.mxu0 %v570_v26 }
 0x1ae   :  { %4846 = vmatprep.subr.mxu1 %v664_v27  ;;  %4866 = vmatprep.subr.mxu0 %v566_v28 }
 0x1af   :  { %4847 = vmatpush3.msra.mxu1 %v664_v27  ;;  %4842 = vmatmul.mubr.f32.gmra.mxu0 %v571_v29 }
 0x1b0   :  { %4848 = vmatprep.subr.mxu1 %v663_v30  ;;  %4804 = vmatmul.mubr.f32.gmra.mxu1 %v473_v31 }
 0x1b1   :  { %4849 = vmatpush3.msra.mxu1 %v663_v30  ;;  %4867 = vmatpush3.msra.mxu0 %v566_v28 }
 0x1b2   :  { %4850 = vmatprep.subr.mxu1 %v662_v32  ;;  %4868 = vmatprep.subr.mxu0 %v565_v33 }
 0x1b3   :  { %4851 = vmatpush3.msra.mxu1 %v662_v32  ;;  %4869 = vmatpush3.msra.mxu0 %v565_v33 }
 0x1b4   :  { %4852 = vmatprep.subr.mxu1 %v661_v34  ;;  %4870 = vmatprep.subr.mxu0 %v564_v35 }
 0x1b5   :  { %4853 = vmatpush3.msra.mxu1 %v661_v34  ;;  %4871 = vmatpush3.msra.mxu0 %v564_v35 }
 0x1b6   :  { %4854 = vmatprep.subr.mxu1 %v660_v36  ;;  %4872 = vmatprep.subr.mxu0 %v563_v37 }
 0x1b7   :  { %4855 = vmatpush3.msra.mxu1 %v660_v36  ;;  %4873 = vmatpush3.msra.mxu0 %v563_v37 }
 0x1b8   :  { %4856 = vmatprep.subr.mxu1 %v659_v38  ;;  %4874 = vmatprep.subr.mxu0 %v562_v39 }
 0x1b9   :  { %4857 = vmatpush3.msra.mxu1 %v659_v38  ;;  %4875 = vmatpush3.msra.mxu0 %v562_v39  ;;  %v1062_v38 = vld [vmem:[#allocation7 + $0x60] sm:$0xff]  ;;  %v1063_v39 = vld [vmem:[#allocation7 + $0x68] sm:$0xff] }
 0x1ba   :  { %4858 = vmatprep.subr.mxu1 %v658_v40  ;;  %4876 = vmatprep.subr.mxu0 %v561_v41 }
 0x1bb   :  { %4859 = vmatpush3.msra.mxu1 %v658_v40  ;;  %4877 = vmatpush3.msra.mxu0 %v561_v41  ;;  %v1359_v40 = vld [vmem:[#allocation8 + $0x138] sm:$0xff]  ;;  %v1064_v41 = vld [vmem:[#allocation7 + $0x70] sm:$0xff] }
 0x1bc   :  { %4888 = vmatprep.subr.mxu1 %v5951_v45  ;;  %4878 = vmatprep.subr.mxu0 %v560_v42 }
 0x1bd   :  { %4879 = vmatpush3.msra.mxu0 %v560_v42  ;;  %v1358_v42 = vld [vmem:[#allocation8 + $0x130] sm:$0xff] }
 0x1be   :  { %4880 = vmatprep.subr.mxu0 %v559_v43 }
 0x1bf   :  { %4881 = vmatpush3.msra.mxu0 %v559_v43  ;;  %v1065_v43 = vld [vmem:[#allocation7 + $0x78] sm:$0xff] }
 0x1c0   :  { %4926 = vmatprep.subr.mxu0 %v959_v44 }
 0x26b   :  { %v4802_v46 = vpop.f32.mrf.mxu1  ;;  %v4840_v47 = vpop.f32.mrf.mxu0 }
 0x26d   :  { %v540_v48 = vpop.f32.mrf.mxu1  ;;  %v638_v50 = vpop.f32.mrf.mxu0 }
 0x26e   :  { %4860 = vmatprep.mubr.msk.f32.mxu1 %vm666_vm2, %v638_v50  ;;  %4882 = vmatprep.mubr.msk.f32.mxu0 %vm666_vm2, %v540_v48  ;;  %v1354_v48 = vld [vmem:[#allocation8 + $0x110] sm:$0xff]  ;;  %v1353_v50 = vld [vmem:[#allocation8 + $0x108] sm:$0xff] }
 0x26f   :  { %4861 = vmatmul.mubr.msk.f32.vlgmr.msra.gmra.mxu1 %vm666_vm2, %v4840_v47  ;;  %4883 = vmatmul.mubr.msk.f32.vlgmr.msra.gmra.mxu0 %vm666_vm2, %v4802_v46  ;;  %v4843_v60 = vpop.f32.mrf.mxu0  ;;  %v1356_v46 = vld [vmem:[#allocation8 + $0x120] sm:$0xff]  ;;  %v1355_v47 = vld [vmem:[#allocation8 + $0x118] sm:$0xff] }
 0x270   :  { %4889 = vmatpush3.msra.mxu1 %v5951_v45  ;;  %4927 = vmatpush3.msra.mxu0 %v959_v44  ;;  %v4805_v63 = vpop.f32.mrf.mxu1  ;;  %v1357_v44 = vld [vmem:[#allocation8 + $0x128] sm:$0xff] }
 0x271   :  { %4890 = vmatprep.subr.mxu1 %v5954_v49  ;;  %4928 = vmatprep.subr.mxu0 %v958_v51  ;;  %v648_v1 = vpop.f32.mrf.mxu0 }
 0x272   :  { %4891 = vmatpush3.msra.mxu1 %v5954_v49  ;;  %4929 = vmatpush3.msra.mxu0 %v958_v51  ;;  %v550_v2 = vpop.f32.mrf.mxu1  ;;  %v1352_v51 = vld [vmem:[#allocation8 + $0x100] sm:$0xff] }
 0x273   :  { %4892 = vmatprep.subr.mxu1 %v5961_v52  ;;  %4930 = vmatprep.subr.mxu0 %v957_v53 }
 0x274   :  { %4893 = vmatpush3.msra.mxu1 %v5961_v52  ;;  %4931 = vmatpush3.msra.mxu0 %v957_v53 }
 0x275   :  { %4894 = vmatprep.subr.mxu1 %v5968_v55  ;;  %4932 = vmatprep.subr.mxu0 %v956_v54 }
 0x276   :  { %4895 = vmatpush3.msra.mxu1 %v5968_v55  ;;  %4933 = vmatpush3.msra.mxu0 %v956_v54 }
 0x277   :  { %4896 = vmatprep.subr.mxu1 %v5975_v58  ;;  %4934 = vmatprep.subr.mxu0 %v955_v56 }
 0x278   :  { %4897 = vmatpush3.msra.mxu1 %v5975_v58  ;;  %4935 = vmatpush3.msra.mxu0 %v955_v56 }
 0x279   :  { %4898 = vmatprep.subr.mxu1 %v5982_v61  ;;  %4936 = vmatprep.subr.mxu0 %v954_v57 }
 0x27a   :  { %4899 = vmatpush3.msra.mxu1 %v5982_v61  ;;  %4937 = vmatpush3.msra.mxu0 %v954_v57 }
 0x27b   :  { %4900 = vmatprep.subr.mxu1 %v5989_v0  ;;  %4938 = vmatprep.subr.mxu0 %v953_v59 }
 0x27c   :  { %4901 = vmatpush3.msra.mxu1 %v5989_v0  ;;  %4939 = vmatpush3.msra.mxu0 %v953_v59 }
 0x27d   :  { %4902 = vmatprep.subr.mxu1 %v5997_v3  ;;  %4940 = vmatprep.subr.mxu0 %v952_v62 }
 0x27e   :  { %4903 = vmatpush3.msra.mxu1 %v5997_v3  ;;  %4941 = vmatpush3.msra.mxu0 %v952_v62 }
 0x27f   :  { %4904 = vmatprep.subr.mxu1 %v6005_v6  ;;  %4948 = vmatprep.subr.mxu0 %v5951_v45 }
 0x280   :  { %4905 = vmatpush3.msra.mxu1 %v6005_v6  ;;  %4863 = vmatprep.mubr.msk.f32.mxu1 %vm666_vm2, %v648_v1 }
 0x281   :  { %4906 = vmatprep.subr.mxu1 %v6013_v9  ;;  %4885 = vmatprep.mubr.msk.f32.mxu0 %vm666_vm2, %v550_v2 }
 0x282   :  { %4907 = vmatpush3.msra.mxu1 %v6013_v9  ;;  %4886 = vmatmul.mubr.msk.f32.gmra.mxu0 %vm666_vm2, %v4805_v63 }
 0x283   :  { %4908 = vmatprep.subr.mxu1 %v6021_v12  ;;  %4864 = vmatmul.mubr.msk.f32.gmra.mxu1 %vm666_vm2, %v4843_v60 }
 0x284   :  { %4909 = vmatpush3.msra.mxu1 %v6021_v12  ;;  %4920 = vmatprep.mubr.f32.mxu1 %v862_v4 }
 0x285   :  { %4910 = vmatprep.subr.mxu1 %v6029_v15 }
 0x286   :  { %4911 = vmatpush3.msra.mxu1 %v6029_v15 }
 0x287   :  { %4912 = vmatprep.subr.mxu1 %v6035_v17 }
 0x288   :  { %4913 = vmatpush3.msra.mxu1 %v6035_v17 }
 0x289   :  { %4914 = vmatprep.subr.mxu1 %v6041_v19 }
 0x28a   :  { %4915 = vmatpush3.msra.mxu1 %v6041_v19 }
 0x28b   :  { %4916 = vmatprep.subr.mxu1 %v6047_v20 }
 0x28c   :  { %4917 = vmatpush3.msra.mxu1 %v6047_v20 }
 0x28d   :  { %4918 = vmatprep.subr.mxu1 %v6053_v21 }
 0x28e   :  { %4919 = vmatpush3.msra.mxu1 %v6053_v21 }
 0x28f   :  { %4921 = vmatmul.mubr.f32.vlgmr.msra.gmra.mxu1 %v863_v5  ;;  %4986 = vmatprep.subr.mxu1 %v1159_v7 }
 0x290   :  { %4987 = vmatpush3.msra.mxu1 %v1159_v7  ;;  %4923 = vmatprep.mubr.f32.mxu1 %v864_v8 }
 0x291   :  { %4988 = vmatprep.subr.mxu1 %v1158_v10 }
 0x292   :  { %4989 = vmatpush3.msra.mxu1 %v1158_v10  ;;  %v1262_v10 = vld [vmem:[#allocation7 + $0x80] sm:$0xff] }
 0x293   :  { %4924 = vmatmul.mubr.f32.gmra.mxu1 %v865_v11  ;;  %4990 = vmatprep.subr.mxu1 %v1157_v13  ;;  %v1263_v11 = vld [vmem:[#allocation7 + $0x88] sm:$0xff] }
 0x294   :  { %4991 = vmatpush3.msra.mxu1 %v1157_v13  ;;  %v1559_v13 = vld [vmem:[#allocation8 + $0x178] sm:$0xff] }
 0x295   :  { %4992 = vmatprep.subr.mxu1 %v1156_v14 }
 0x296   :  { %4993 = vmatpush3.msra.mxu1 %v1156_v14  ;;  %v1264_v14 = vld [vmem:[#allocation7 + $0x90] sm:$0xff] }
 0x297   :  { %4994 = vmatprep.subr.mxu1 %v1155_v16 }
 0x298   :  { %4995 = vmatpush3.msra.mxu1 %v1155_v16  ;;  %v1558_v16 = vld [vmem:[#allocation8 + $0x170] sm:$0xff] }
 0x299   :  { %4996 = vmatprep.subr.mxu1 %v1154_v18 }
 0x29a   :  { %4997 = vmatpush3.msra.mxu1 %v1154_v18  ;;  %v1265_v18 = vld [vmem:[#allocation7 + $0x98] sm:$0xff] }
 0x29b   :  { %4998 = vmatprep.subr.mxu1 %v1153_v22 }
 0x29c   :  { %4999 = vmatpush3.msra.mxu1 %v1153_v22  ;;  %v1557_v22 = vld [vmem:[#allocation8 + $0x168] sm:$0xff] }
 0x29d   :  { %5000 = vmatprep.subr.mxu1 %v1152_v23 }
 0x29e   :  { %5001 = vmatpush3.msra.mxu1 %v1152_v23  ;;  %v1556_v23 = vld [vmem:[#allocation8 + $0x160] sm:$0xff] }
 0x29f   :  { %5008 = vmatprep.subr.mxu1 %v5951_v45 }
 0x32f   :  { %v4862_v24 = vpop.f32.mrf.mxu1  ;;  %v4884_v25 = vpop.f32.mrf.mxu0 }
 0x330   :  { %v6105_v26 = vadd.f32 %v4884_v25, %v4862_v24  ;;  %v1555_v24 = vld [vmem:[#allocation8 + $0x158] sm:$0xff]  ;;  %v1554_v25 = vld [vmem:[#allocation8 + $0x150] sm:$0xff] }
 0x331   :  { %v745_v27 = vpop.f32.mrf.mxu1  ;;  %v842_v28 = vpop.f32.mrf.mxu0 }
 0x332   :  { %v6107_v29 = vadd.f32 %v842_v28, %v745_v27  ;;  %v1552_v27 = vld [vmem:[#allocation8 + $0x140] sm:$0xff] }
 0x342   :  { %v4887_v31 = vpop.f32.mrf.mxu0 }
 0x343   :  { %v4865_v30 = vpop.f32.mrf.mxu1 }
 0x344   :  { %v6109_v32 = vadd.f32 %v4887_v31, %v4865_v30  ;;  %v852_v53 = vpop.f32.mrf.mxu0 }
 0x345   :  { %v6111_v33 = vpop.f32.mrf.mxu1 }
 0x346   :  { %v853_v62 = vadd.f32 %v852_v53, %v6111_v33  ;;  %v1753_v53 = vld [vmem:[#allocation8 + $0x188] sm:$0xff] }
 0x34f   :  { %v4922_v34 = vpop.f32.mrf.mxu1 }
 0x351   :  { %v932_v35 = vpop.f32.mrf.mxu1 }
 0x352   :  { %4942 = vmatprep.mubr.msk.f32.mxu0 %vm666_vm2, %v932_v35 }
 0x353   :  { %v4925_v36 = vpop.f32.mrf.mxu1  ;;  %4943 = vmatmul.mubr.msk.f32.vlgmr.msra.gmra.mxu0 %vm666_vm2, %v4922_v34 }
 0x354   :  { %4949 = vmatpush3.msra.mxu0 %v5951_v45 }
 0x355   :  { %4950 = vmatprep.subr.mxu0 %v5954_v49  ;;  %v942_v37 = vpop.f32.mrf.mxu1 }
 0x356   :  { %4951 = vmatpush3.msra.mxu0 %v5954_v49  ;;  %4945 = vmatprep.mubr.msk.f32.mxu0 %vm666_vm2, %v942_v37 }
 0x357   :  { %4952 = vmatprep.subr.mxu0 %v5961_v52  ;;  %4946 = vmatmul.mubr.msk.f32.gmra.mxu0 %vm666_vm2, %v4925_v36 }
 0x358   :  { %4953 = vmatpush3.msra.mxu0 %v5961_v52  ;;  %4980 = vmatprep.mubr.f32.mxu0 %v1062_v38 }
 0x359   :  { %4954 = vmatprep.subr.mxu0 %v5968_v55 }
 0x35a   :  { %4955 = vmatpush3.msra.mxu0 %v5968_v55 }
 0x35b   :  { %4956 = vmatprep.subr.mxu0 %v5975_v58 }
 0x35c   :  { %4957 = vmatpush3.msra.mxu0 %v5975_v58 }
 0x35d   :  { %4958 = vmatprep.subr.mxu0 %v5982_v61 }
 0x35e   :  { %4959 = vmatpush3.msra.mxu0 %v5982_v61 }
 0x35f   :  { %4960 = vmatprep.subr.mxu0 %v5989_v0 }
 0x360   :  { %4961 = vmatpush3.msra.mxu0 %v5989_v0 }
 0x361   :  { %4962 = vmatprep.subr.mxu0 %v5997_v3 }
 0x362   :  { %4963 = vmatpush3.msra.mxu0 %v5997_v3 }
 0x363   :  { %4964 = vmatprep.subr.mxu0 %v6005_v6 }
 0x364   :  { %4965 = vmatpush3.msra.mxu0 %v6005_v6 }
 0x365   :  { %4966 = vmatprep.subr.mxu0 %v6013_v9 }
 0x366   :  { %4967 = vmatpush3.msra.mxu0 %v6013_v9 }
 0x367   :  { %4968 = vmatprep.subr.mxu0 %v6021_v12 }
 0x368   :  { %4969 = vmatpush3.msra.mxu0 %v6021_v12 }
 0x369   :  { %4970 = vmatprep.subr.mxu0 %v6029_v15 }
 0x36a   :  { %4971 = vmatpush3.msra.mxu0 %v6029_v15 }
 0x36b   :  { %4972 = vmatprep.subr.mxu0 %v6035_v17 }
 0x36c   :  { %4973 = vmatpush3.msra.mxu0 %v6035_v17 }
 0x36d   :  { %4974 = vmatprep.subr.mxu0 %v6041_v19 }
 0x36e   :  { %4975 = vmatpush3.msra.mxu0 %v6041_v19 }
 0x36f   :  { %4976 = vmatprep.subr.mxu0 %v6047_v20 }
 0x370   :  { %4977 = vmatpush3.msra.mxu0 %v6047_v20 }
 0x371   :  { %4978 = vmatprep.subr.mxu0 %v6053_v21 }
 0x372   :  { %4979 = vmatpush3.msra.mxu0 %v6053_v21 }
 0x373   :  { %4981 = vmatmul.mubr.f32.vlgmr.msra.gmra.mxu0 %v1063_v39  ;;  %5046 = vmatprep.subr.mxu0 %v1359_v40 }
 0x374   :  { %5047 = vmatpush3.msra.mxu0 %v1359_v40  ;;  %4983 = vmatprep.mubr.f32.mxu0 %v1064_v41  ;;  %v1462_v40 = vld [vmem:[#allocation7 + $0xa0] sm:$0xff]  ;;  %v1463_v41 = vld [vmem:[#allocation7 + $0xa8] sm:$0xff] }
 0x375   :  { %5048 = vmatprep.subr.mxu0 %v1358_v42 }
 0x376   :  { %5049 = vmatpush3.msra.mxu0 %v1358_v42  ;;  %v1759_v42 = vld [vmem:[#allocation8 + $0x1b8] sm:$0xff] }
 0x377   :  { %4984 = vmatmul.mubr.f32.gmra.mxu0 %v1065_v43  ;;  %5050 = vmatprep.subr.mxu0 %v1357_v44  ;;  %v1464_v43 = vld [vmem:[#allocation7 + $0xb0] sm:$0xff] }
 0x378   :  { %5051 = vmatpush3.msra.mxu0 %v1357_v44  ;;  %v1758_v44 = vld [vmem:[#allocation8 + $0x1b0] sm:$0xff] }
 0x379   :  { %5052 = vmatprep.subr.mxu0 %v1356_v46 }
 0x37a   :  { %5053 = vmatpush3.msra.mxu0 %v1356_v46  ;;  %v1465_v46 = vld [vmem:[#allocation7 + $0xb8] sm:$0xff] }
 0x37b   :  { %5054 = vmatprep.subr.mxu0 %v1355_v47 }
 0x37c   :  { %5055 = vmatpush3.msra.mxu0 %v1355_v47  ;;  %v1757_v47 = vld [vmem:[#allocation8 + $0x1a8] sm:$0xff] }
 0x37d   :  { %5056 = vmatprep.subr.mxu0 %v1354_v48 }
 0x37e   :  { %5057 = vmatpush3.msra.mxu0 %v1354_v48  ;;  %v1756_v48 = vld [vmem:[#allocation8 + $0x1a0] sm:$0xff] }
 0x37f   :  { %5058 = vmatprep.subr.mxu0 %v1353_v50 }
 0x380   :  { %5059 = vmatpush3.msra.mxu0 %v1353_v50  ;;  %v1755_v50 = vld [vmem:[#allocation8 + $0x198] sm:$0xff] }
 0x381   :  { %5060 = vmatprep.subr.mxu0 %v1352_v51 }
 0x382   :  { %5061 = vmatpush3.msra.mxu0 %v1352_v51  ;;  %v1754_v51 = vld [vmem:[#allocation8 + $0x190] sm:$0xff] }
 0x383   :  { %5068 = vmatprep.subr.mxu0 %v5951_v45 }
 0x413   :  { %v4944_v54 = vpop.f32.mrf.mxu0 }
 0x414   :  { %v6150_v56 = vadd.f32 %v4944_v54, %v6105_v26  ;;  %v1553_v26 = vld [vmem:[#allocation8 + $0x148] sm:$0xff]  ;;  %v1752_v54 = vld [vmem:[#allocation8 + $0x180] sm:$0xff] }
 0x415   :  { %v1038_v57 = vpop.f32.mrf.mxu0 }
 0x416   :  { %v6153_v59 = vadd.f32 %v1038_v57, %v6107_v29 }
 0x417   :  { %v4947_v60 = vpop.f32.mrf.mxu0 }
 0x418   :  { %v6157_v63 = vadd.f32 %v4947_v60, %v6109_v32 }
 0x419   :  { %v1048_v1 = vpop.f32.mrf.mxu0 }
 0x41a   :  { %v6159_v2 = vadd.f32 %v1048_v1, %v853_v62 }
 0x433   :  { %v4982_v4 = vpop.f32.mrf.mxu0 }
 0x435   :  { %v1132_v5 = vpop.f32.mrf.mxu0 }
 0x436   :  { %5002 = vmatprep.mubr.msk.f32.mxu1 %vm666_vm2, %v1132_v5 }
 0x437   :  { %v4985_v7 = vpop.f32.mrf.mxu0  ;;  %5003 = vmatmul.mubr.msk.f32.vlgmr.msra.gmra.mxu1 %vm666_vm2, %v4982_v4 }
 0x438   :  { %5009 = vmatpush3.msra.mxu1 %v5951_v45 }
 0x439   :  { %5010 = vmatprep.subr.mxu1 %v5954_v49  ;;  %v1142_v8 = vpop.f32.mrf.mxu0 }
 0x43a   :  { %5011 = vmatpush3.msra.mxu1 %v5954_v49  ;;  %5005 = vmatprep.mubr.msk.f32.mxu1 %vm666_vm2, %v1142_v8 }
 0x43b   :  { %5012 = vmatprep.subr.mxu1 %v5961_v52  ;;  %5006 = vmatmul.mubr.msk.f32.gmra.mxu1 %vm666_vm2, %v4985_v7 }
 0x43c   :  { %5013 = vmatpush3.msra.mxu1 %v5961_v52  ;;  %5040 = vmatprep.mubr.f32.mxu1 %v1262_v10  ;;  %v1662_v10 = vld [vmem:[#allocation7 + $0xc0] sm:$0xff] }
 0x43d   :  { %5014 = vmatprep.subr.mxu1 %v5968_v55 }
 0x43e   :  { %5015 = vmatpush3.msra.mxu1 %v5968_v55 }
 0x43f   :  { %5016 = vmatprep.subr.mxu1 %v5975_v58 }
 0x440   :  { %5017 = vmatpush3.msra.mxu1 %v5975_v58 }
 0x441   :  { %5018 = vmatprep.subr.mxu1 %v5982_v61 }
 0x442   :  { %5019 = vmatpush3.msra.mxu1 %v5982_v61 }
 0x443   :  { %5020 = vmatprep.subr.mxu1 %v5989_v0 }
 0x444   :  { %5021 = vmatpush3.msra.mxu1 %v5989_v0 }
 0x445   :  { %5022 = vmatprep.subr.mxu1 %v5997_v3 }
 0x446   :  { %5023 = vmatpush3.msra.mxu1 %v5997_v3 }
 0x447   :  { %5024 = vmatprep.subr.mxu1 %v6005_v6 }
 0x448   :  { %5025 = vmatpush3.msra.mxu1 %v6005_v6 }
 0x449   :  { %5026 = vmatprep.subr.mxu1 %v6013_v9 }
 0x44a   :  { %5027 = vmatpush3.msra.mxu1 %v6013_v9 }
 0x44b   :  { %5028 = vmatprep.subr.mxu1 %v6021_v12 }
 0x44c   :  { %5029 = vmatpush3.msra.mxu1 %v6021_v12 }
 0x44d   :  { %5030 = vmatprep.subr.mxu1 %v6029_v15 }
 0x44e   :  { %5031 = vmatpush3.msra.mxu1 %v6029_v15 }
 0x44f   :  { %5032 = vmatprep.subr.mxu1 %v6035_v17 }
 0x450   :  { %5033 = vmatpush3.msra.mxu1 %v6035_v17 }
 0x451   :  { %5034 = vmatprep.subr.mxu1 %v6041_v19 }
 0x452   :  { %5035 = vmatpush3.msra.mxu1 %v6041_v19 }
 0x453   :  { %5036 = vmatprep.subr.mxu1 %v6047_v20 }
 0x454   :  { %5037 = vmatpush3.msra.mxu1 %v6047_v20 }
 0x455   :  { %5038 = vmatprep.subr.mxu1 %v6053_v21 }
 0x456   :  { %5039 = vmatpush3.msra.mxu1 %v6053_v21 }
 0x457   :  { %5041 = vmatmul.mubr.f32.vlgmr.msra.gmra.mxu1 %v1263_v11  ;;  %5106 = vmatprep.subr.mxu1 %v1559_v13  ;;  %v1663_v11 = vld [vmem:[#allocation7 + $0xc8] sm:$0xff] }
 0x458   :  { %5107 = vmatpush3.msra.mxu1 %v1559_v13  ;;  %5043 = vmatprep.mubr.f32.mxu1 %v1264_v14  ;;  %v1959_v13 = vld [vmem:[#allocation8 + $0x1f8] sm:$0xff]  ;;  %v1664_v14 = vld [vmem:[#allocation7 + $0xd0] sm:$0xff] }
 0x459   :  { %5108 = vmatprep.subr.mxu1 %v1558_v16 }
 0x45a   :  { %5109 = vmatpush3.msra.mxu1 %v1558_v16  ;;  %v1958_v16 = vld [vmem:[#allocation8 + $0x1f0] sm:$0xff] }
 0x45b   :  { %5044 = vmatmul.mubr.f32.gmra.mxu1 %v1265_v18  ;;  %5110 = vmatprep.subr.mxu1 %v1557_v22  ;;  %v1665_v18 = vld [vmem:[#allocation7 + $0xd8] sm:$0xff] }
 0x45c   :  { %5111 = vmatpush3.msra.mxu1 %v1557_v22  ;;  %v1957_v22 = vld [vmem:[#allocation8 + $0x1e8] sm:$0xff] }
 0x45d   :  { %5112 = vmatprep.subr.mxu1 %v1556_v23 }
 0x45e   :  { %5113 = vmatpush3.msra.mxu1 %v1556_v23  ;;  %v1956_v23 = vld [vmem:[#allocation8 + $0x1e0] sm:$0xff] }
 0x45f   :  { %5114 = vmatprep.subr.mxu1 %v1555_v24 }
 0x460   :  { %5115 = vmatpush3.msra.mxu1 %v1555_v24  ;;  %v1955_v24 = vld [vmem:[#allocation8 + $0x1d8] sm:$0xff] }
 0x461   :  { %5116 = vmatprep.subr.mxu1 %v1554_v25 }
 0x462   :  { %5117 = vmatpush3.msra.mxu1 %v1554_v25  ;;  %v1954_v25 = vld [vmem:[#allocation8 + $0x1d0] sm:$0xff] }
 0x463   :  { %5118 = vmatprep.subr.mxu1 %v1553_v26 }
 0x464   :  { %5119 = vmatpush3.msra.mxu1 %v1553_v26  ;;  %v1953_v26 = vld [vmem:[#allocation8 + $0x1c8] sm:$0xff] }
 0x465   :  { %5120 = vmatprep.subr.mxu1 %v1552_v27 }
 0x466   :  { %5121 = vmatpush3.msra.mxu1 %v1552_v27  ;;  %v1952_v27 = vld [vmem:[#allocation8 + $0x1c0] sm:$0xff] }
 0x467   :  { %5128 = vmatprep.subr.mxu1 %v5951_v45 }
 0x4f7   :  { %v5004_v28 = vpop.f32.mrf.mxu1 }
 0x4f8   :  { %v6198_v29 = vadd.f32 %v5004_v28, %v6150_v56 }
 0x4f9   :  { %v1238_v30 = vpop.f32.mrf.mxu1 }
 0x4fa   :  { %v6201_v31 = vadd.f32 %v1238_v30, %v6153_v59 }
 0x4fb   :  { %v5007_v32 = vpop.f32.mrf.mxu1 }
 0x4fc   :  { %v6204_v33 = vadd.f32 %v5007_v32, %v6157_v63 }
 0x4fd   :  { %v1248_v34 = vpop.f32.mrf.mxu1 }
 0x4fe   :  { %v6207_v35 = vadd.f32 %v1248_v34, %v6159_v2 }
 0x517   :  { %v5042_v36 = vpop.f32.mrf.mxu1 }
 0x519   :  { %v1332_v37 = vpop.f32.mrf.mxu1 }
 0x51a   :  { %5062 = vmatprep.mubr.msk.f32.mxu0 %vm666_vm2, %v1332_v37 }
 0x51b   :  { %v5045_v38 = vpop.f32.mrf.mxu1  ;;  %5063 = vmatmul.mubr.msk.f32.vlgmr.msra.gmra.mxu0 %vm666_vm2, %v5042_v36 }
 0x51c   :  { %5069 = vmatpush3.msra.mxu0 %v5951_v45 }
 0x51d   :  { %5070 = vmatprep.subr.mxu0 %v5954_v49  ;;  %v1342_v39 = vpop.f32.mrf.mxu1 }
 0x51e   :  { %5071 = vmatpush3.msra.mxu0 %v5954_v49  ;;  %5065 = vmatprep.mubr.msk.f32.mxu0 %vm666_vm2, %v1342_v39 }
 0x51f   :  { %5072 = vmatprep.subr.mxu0 %v5961_v52  ;;  %5066 = vmatmul.mubr.msk.f32.gmra.mxu0 %vm666_vm2, %v5045_v38 }
 0x520   :  { %5073 = vmatpush3.msra.mxu0 %v5961_v52  ;;  %5100 = vmatprep.mubr.f32.mxu0 %v1462_v40  ;;  %v1862_v40 = vld [vmem:[#allocation7 + $0xe0] sm:$0xff] }
 0x521   :  { %5074 = vmatprep.subr.mxu0 %v5968_v55 }
 0x522   :  { %5075 = vmatpush3.msra.mxu0 %v5968_v55 }
 0x523   :  { %5076 = vmatprep.subr.mxu0 %v5975_v58 }
 0x524   :  { %5077 = vmatpush3.msra.mxu0 %v5975_v58 }
 0x525   :  { %5078 = vmatprep.subr.mxu0 %v5982_v61 }
 0x526   :  { %5079 = vmatpush3.msra.mxu0 %v5982_v61 }
 0x527   :  { %5080 = vmatprep.subr.mxu0 %v5989_v0 }
 0x528   :  { %5081 = vmatpush3.msra.mxu0 %v5989_v0 }
 0x529   :  { %5082 = vmatprep.subr.mxu0 %v5997_v3 }
 0x52a   :  { %5083 = vmatpush3.msra.mxu0 %v5997_v3 }
 0x52b   :  { %5084 = vmatprep.subr.mxu0 %v6005_v6 }
 0x52c   :  { %5085 = vmatpush3.msra.mxu0 %v6005_v6 }
 0x52d   :  { %5086 = vmatprep.subr.mxu0 %v6013_v9 }
 0x52e   :  { %5087 = vmatpush3.msra.mxu0 %v6013_v9 }
 0x52f   :  { %5088 = vmatprep.subr.mxu0 %v6021_v12 }
 0x530   :  { %5089 = vmatpush3.msra.mxu0 %v6021_v12 }
 0x531   :  { %5090 = vmatprep.subr.mxu0 %v6029_v15 }
 0x532   :  { %5091 = vmatpush3.msra.mxu0 %v6029_v15 }
 0x533   :  { %5092 = vmatprep.subr.mxu0 %v6035_v17 }
 0x534   :  { %5093 = vmatpush3.msra.mxu0 %v6035_v17 }
 0x535   :  { %5094 = vmatprep.subr.mxu0 %v6041_v19 }
 0x536   :  { %5095 = vmatpush3.msra.mxu0 %v6041_v19 }
 0x537   :  { %5096 = vmatprep.subr.mxu0 %v6047_v20 }
 0x538   :  { %5097 = vmatpush3.msra.mxu0 %v6047_v20 }
 0x539   :  { %5098 = vmatprep.subr.mxu0 %v6053_v21 }
 0x53a   :  { %5099 = vmatpush3.msra.mxu0 %v6053_v21 }
 0x53b   :  { %5101 = vmatmul.mubr.f32.vlgmr.msra.gmra.mxu0 %v1463_v41  ;;  %5166 = vmatprep.subr.mxu0 %v1759_v42  ;;  %v1863_v41 = vld [vmem:[#allocation7 + $0xe8] sm:$0xff] }
 0x53c   :  { %5167 = vmatpush3.msra.mxu0 %v1759_v42  ;;  %5103 = vmatprep.mubr.f32.mxu0 %v1464_v43  ;;  %v1864_v42 = vld [vmem:[#allocation7 + $0xf0] sm:$0xff]  ;;  %v1865_v43 = vld [vmem:[#allocation7 + $0xf8] sm:$0xff] }
 0x53d   :  { %5168 = vmatprep.subr.mxu0 %v1758_v44 }
 0x53e   :  { %5169 = vmatpush3.msra.mxu0 %v1758_v44 }
 0x53f   :  { %5104 = vmatmul.mubr.f32.gmra.mxu0 %v1465_v46  ;;  %5170 = vmatprep.subr.mxu0 %v1757_v47 }
 0x540   :  { %5171 = vmatpush3.msra.mxu0 %v1757_v47 }
 0x541   :  { %5172 = vmatprep.subr.mxu0 %v1756_v48 }
 0x542   :  { %5173 = vmatpush3.msra.mxu0 %v1756_v48 }
 0x543   :  { %5174 = vmatprep.subr.mxu0 %v1755_v50 }
 0x544   :  { %5175 = vmatpush3.msra.mxu0 %v1755_v50 }
 0x545   :  { %5176 = vmatprep.subr.mxu0 %v1754_v51 }
 0x546   :  { %5177 = vmatpush3.msra.mxu0 %v1754_v51 }
 0x547   :  { %5178 = vmatprep.subr.mxu0 %v1753_v53 }
 0x548   :  { %5179 = vmatpush3.msra.mxu0 %v1753_v53 }
 0x549   :  { %5180 = vmatprep.subr.mxu0 %v1752_v54 }
 0x54a   :  { %5181 = vmatpush3.msra.mxu0 %v1752_v54 }
 0x54b   :  { %5188 = vmatprep.subr.mxu0 %v5951_v45 }
 0x5db   :  { %v5064_v56 = vpop.f32.mrf.mxu0 }
 0x5dc   :  { %v6246_v57 = vadd.f32 %v5064_v56, %v6198_v29 }
 0x5dd   :  { %v1438_v59 = vpop.f32.mrf.mxu0 }
 0x5de   :  { %v6249_v60 = vadd.f32 %v1438_v59, %v6201_v31 }
 0x5df   :  { %v5067_v62 = vpop.f32.mrf.mxu0 }
 0x5e0   :  { %v6252_v63 = vadd.f32 %v5067_v62, %v6204_v33  ;;  %v2062_v62 = vld [vmem:[#allocation7 + $0x100] sm:$0xff] }
 0x5e1   :  { %v1448_v1 = vpop.f32.mrf.mxu0 }
 0x5e2   :  { %v6255_v2 = vadd.f32 %v1448_v1, %v6207_v35 }
 0x5fb   :  { %v5102_v4 = vpop.f32.mrf.mxu0 }
 0x5fd   :  { %v1532_v5 = vpop.f32.mrf.mxu0 }
 0x5fe   :  { %5122 = vmatprep.mubr.msk.f32.mxu1 %vm666_vm2, %v1532_v5 }
 0x5ff   :  { %v5105_v7 = vpop.f32.mrf.mxu0  ;;  %5123 = vmatmul.mubr.msk.f32.vlgmr.msra.gmra.mxu1 %vm666_vm2, %v5102_v4 }
 0x600   :  { %5129 = vmatpush3.msra.mxu1 %v5951_v45 }
 0x601   :  { %5130 = vmatprep.subr.mxu1 %v5954_v49  ;;  %v1542_v8 = vpop.f32.mrf.mxu0 }
 0x602   :  { %5131 = vmatpush3.msra.mxu1 %v5954_v49  ;;  %5125 = vmatprep.mubr.msk.f32.mxu1 %vm666_vm2, %v1542_v8 }
 0x603   :  { %5132 = vmatprep.subr.mxu1 %v5961_v52  ;;  %5126 = vmatmul.mubr.msk.f32.gmra.mxu1 %vm666_vm2, %v5105_v7 }
 0x604   :  { %5133 = vmatpush3.msra.mxu1 %v5961_v52  ;;  %5160 = vmatprep.mubr.f32.mxu1 %v1662_v10  ;;  %v5728_v10 = vmov 0.0  }
 0x605   :  { %5134 = vmatprep.subr.mxu1 %v5968_v55 }
 0x606   :  { %5135 = vmatpush3.msra.mxu1 %v5968_v55 }
 0x607   :  { %5136 = vmatprep.subr.mxu1 %v5975_v58 }
 0x608   :  { %5137 = vmatpush3.msra.mxu1 %v5975_v58 }
 0x609   :  { %5138 = vmatprep.subr.mxu1 %v5982_v61 }
 0x60a   :  { %5139 = vmatpush3.msra.mxu1 %v5982_v61 }
 0x60b   :  { %5140 = vmatprep.subr.mxu1 %v5989_v0 }
 0x60c   :  { %5141 = vmatpush3.msra.mxu1 %v5989_v0 }
 0x60d   :  { %5142 = vmatprep.subr.mxu1 %v5997_v3 }
 0x60e   :  { %5143 = vmatpush3.msra.mxu1 %v5997_v3 }
 0x60f   :  { %5144 = vmatprep.subr.mxu1 %v6005_v6 }
 0x610   :  { %5145 = vmatpush3.msra.mxu1 %v6005_v6 }
 0x611   :  { %5146 = vmatprep.subr.mxu1 %v6013_v9 }
 0x612   :  { %5147 = vmatpush3.msra.mxu1 %v6013_v9 }
 0x613   :  { %5148 = vmatprep.subr.mxu1 %v6021_v12 }
 0x614   :  { %5149 = vmatpush3.msra.mxu1 %v6021_v12 }
 0x615   :  { %5150 = vmatprep.subr.mxu1 %v6029_v15 }
 0x616   :  { %5151 = vmatpush3.msra.mxu1 %v6029_v15 }
 0x617   :  { %5152 = vmatprep.subr.mxu1 %v6035_v17 }
 0x618   :  { %5153 = vmatpush3.msra.mxu1 %v6035_v17 }
 0x619   :  { %5154 = vmatprep.subr.mxu1 %v6041_v19 }
 0x61a   :  { %5155 = vmatpush3.msra.mxu1 %v6041_v19 }
 0x61b   :  { %5156 = vmatprep.subr.mxu1 %v6047_v20 }
 0x61c   :  { %5157 = vmatpush3.msra.mxu1 %v6047_v20 }
 0x61d   :  { %5158 = vmatprep.subr.mxu1 %v6053_v21 }
 0x61e   :  { %5159 = vmatpush3.msra.mxu1 %v6053_v21 }
 0x61f   :  { %5161 = vmatmul.mubr.f32.vlgmr.msra.gmra.mxu1 %v1663_v11  ;;  %5226 = vmatprep.subr.mxu1 %v1959_v13  ;;  %v2548_v11 = vld [vmem:[#allocation16 + $0x1f8] sm:$0xff] }
 0x620   :  { %5227 = vmatpush3.msra.mxu1 %v1959_v13  ;;  %5163 = vmatprep.mubr.f32.mxu1 %v1664_v14  ;;  %v2547_v13 = vld [vmem:[#allocation16 + $0x1f0] sm:$0xff]  ;;  %v2546_v14 = vld [vmem:[#allocation16 + $0x1e8] sm:$0xff] }
 0x621   :  { %5228 = vmatprep.subr.mxu1 %v1958_v16 }
 0x622   :  { %5229 = vmatpush3.msra.mxu1 %v1958_v16  ;;  %v2545_v16 = vld [vmem:[#allocation16 + $0x1e0] sm:$0xff] }
 0x623   :  { %5164 = vmatmul.mubr.f32.gmra.mxu1 %v1665_v18  ;;  %5230 = vmatprep.subr.mxu1 %v1957_v22  ;;  %v2544_v18 = vld [vmem:[#allocation16 + $0x1d8] sm:$0xff] }
 0x624   :  { %5231 = vmatpush3.msra.mxu1 %v1957_v22  ;;  %v2543_v22 = vld [vmem:[#allocation16 + $0x1d0] sm:$0xff] }
 0x625   :  { %5232 = vmatprep.subr.mxu1 %v1956_v23 }
 0x626   :  { %5233 = vmatpush3.msra.mxu1 %v1956_v23  ;;  %v2542_v23 = vld [vmem:[#allocation16 + $0x1c8] sm:$0xff] }
 0x627   :  { %5234 = vmatprep.subr.mxu1 %v1955_v24 }
 0x628   :  { %5235 = vmatpush3.msra.mxu1 %v1955_v24  ;;  %v2541_v24 = vld [vmem:[#allocation16 + $0x1c0] sm:$0xff] }
 0x629   :  { %5236 = vmatprep.subr.mxu1 %v1954_v25 }
 0x62a   :  { %5237 = vmatpush3.msra.mxu1 %v1954_v25  ;;  %v2540_v25 = vld [vmem:[#allocation16 + $0x1b8] sm:$0xff] }
 0x62b   :  { %5238 = vmatprep.subr.mxu1 %v1953_v26 }
 0x62c   :  { %5239 = vmatpush3.msra.mxu1 %v1953_v26  ;;  %v2539_v26 = vld [vmem:[#allocation16 + $0x1b0] sm:$0xff] }
 0x62d   :  { %5240 = vmatprep.subr.mxu1 %v1952_v27 }
 0x62e   :  { %5241 = vmatpush3.msra.mxu1 %v1952_v27  ;;  %v2538_v27 = vld [vmem:[#allocation16 + $0x1a8] sm:$0xff] }
 0x62f   :  { %5248 = vmatprep.subr.mxu1 %v5951_v45 }
 0x6bf   :  { %v5124_v28 = vpop.f32.mrf.mxu1 }
 0x6c0   :  { %v1658_v29 = vadd.f32 %v5124_v28, %v6246_v57  ;;  %v2537_v28 = vld [vmem:[#allocation16 + $0x1a0] sm:$0xff] }
 0x6c1   :  { %v1638_v30 = vpop.f32.mrf.mxu1 }
 0x6c2   :  { %v1657_v31 = vadd.f32 %v1638_v30, %v6249_v60  ;;  %v2535_v30 = vld [vmem:[#allocation16 + $0x190] sm:$0xff] }
 0x6c3   :  { %v5127_v32 = vpop.f32.mrf.mxu1 }
 0x6c4   :  { %v1660_v33 = vadd.f32 %v5127_v32, %v6252_v63  ;;  %v2533_v32 = vld [vmem:[#allocation16 + $0x180] sm:$0xff] }
 0x6c5   :  { %v1648_v34 = vpop.f32.mrf.mxu1 }
 0x6c6   :  { %v1659_v35 = vadd.f32 %v1648_v34, %v6255_v2  ;;  %v2531_v34 = vld [vmem:[#allocation16 + $0x170] sm:$0xff] }
 0x6df   :  { %v5162_v36 = vpop.f32.mrf.mxu1 }
 0x6e1   :  { %v1732_v37 = vpop.f32.mrf.mxu1 }
 0x6e2   :  { %5182 = vmatprep.mubr.msk.f32.mxu0 %vm666_vm2, %v1732_v37  ;;  %v2528_v37 = vld [vmem:[#allocation16 + $0x158] sm:$0xff] }
 0x6e3   :  { %v5165_v38 = vpop.f32.mrf.mxu1  ;;  %5183 = vmatmul.mubr.msk.f32.vlgmr.msra.gmra.mxu0 %vm666_vm2, %v5162_v36  ;;  %v2529_v36 = vld [vmem:[#allocation16 + $0x160] sm:$0xff] }
 0x6e4   :  { %5189 = vmatpush3.msra.mxu0 %v5951_v45 }
 0x6e5   :  { %5190 = vmatprep.subr.mxu0 %v5954_v49  ;;  %v1742_v39 = vpop.f32.mrf.mxu1 }
 0x6e6   :  { %5191 = vmatpush3.msra.mxu0 %v5954_v49  ;;  %5185 = vmatprep.mubr.msk.f32.mxu0 %vm666_vm2, %v1742_v39  ;;  %v2526_v39 = vld [vmem:[#allocation16 + $0x148] sm:$0xff] }
 0x6e7   :  { %5192 = vmatprep.subr.mxu0 %v5961_v52  ;;  %5186 = vmatmul.mubr.msk.f32.gmra.mxu0 %vm666_vm2, %v5165_v38  ;;  %v2527_v38 = vld [vmem:[#allocation16 + $0x150] sm:$0xff] }
 0x6e8   :  { %5193 = vmatpush3.msra.mxu0 %v5961_v52  ;;  %5220 = vmatprep.mubr.f32.mxu0 %v1862_v40  ;;  %v2525_v40 = vld [vmem:[#allocation16 + $0x140] sm:$0xff] }
 0x6e9   :  { %5194 = vmatprep.subr.mxu0 %v5968_v55 }
 0x6ea   :  { %5195 = vmatpush3.msra.mxu0 %v5968_v55 }
 0x6eb   :  { %5196 = vmatprep.subr.mxu0 %v5975_v58 }
 0x6ec   :  { %5197 = vmatpush3.msra.mxu0 %v5975_v58 }
 0x6ed   :  { %5198 = vmatprep.subr.mxu0 %v5982_v61 }
 0x6ee   :  { %5199 = vmatpush3.msra.mxu0 %v5982_v61 }
 0x6ef   :  { %5200 = vmatprep.subr.mxu0 %v5989_v0 }
 0x6f0   :  { %5201 = vmatpush3.msra.mxu0 %v5989_v0 }
 0x6f1   :  { %5202 = vmatprep.subr.mxu0 %v5997_v3 }
 0x6f2   :  { %5203 = vmatpush3.msra.mxu0 %v5997_v3 }
 0x6f3   :  { %5204 = vmatprep.subr.mxu0 %v6005_v6 }
 0x6f4   :  { %5205 = vmatpush3.msra.mxu0 %v6005_v6 }
 0x6f5   :  { %5206 = vmatprep.subr.mxu0 %v6013_v9 }
 0x6f6   :  { %5207 = vmatpush3.msra.mxu0 %v6013_v9 }
 0x6f7   :  { %5208 = vmatprep.subr.mxu0 %v6021_v12 }
 0x6f8   :  { %5209 = vmatpush3.msra.mxu0 %v6021_v12 }
 0x6f9   :  { %5210 = vmatprep.subr.mxu0 %v6029_v15 }
 0x6fa   :  { %5211 = vmatpush3.msra.mxu0 %v6029_v15 }
 0x6fb   :  { %5212 = vmatprep.subr.mxu0 %v6035_v17 }
 0x6fc   :  { %5213 = vmatpush3.msra.mxu0 %v6035_v17 }
 0x6fd   :  { %5214 = vmatprep.subr.mxu0 %v6041_v19 }
 0x6fe   :  { %5215 = vmatpush3.msra.mxu0 %v6041_v19 }
 0x6ff   :  { %5216 = vmatprep.subr.mxu0 %v6047_v20 }
 0x700   :  { %5217 = vmatpush3.msra.mxu0 %v6047_v20 }
 0x701   :  { %5218 = vmatprep.subr.mxu0 %v6053_v21 }
 0x702   :  { %5219 = vmatpush3.msra.mxu0 %v6053_v21 }
 0x703   :  { %5221 = vmatmul.mubr.f32.vlgmr.msra.gmra.mxu0 %v1863_v41 }
 0x704   :  { %5223 = vmatprep.mubr.f32.mxu0 %v1864_v42  ;;  %v4341_v42 = vld [vmem:[#allocation10] ss:$0 sm:$0xff] }
 0x707   :  { %5224 = vmatmul.mubr.f32.gmra.mxu0 %v1865_v43 }
 0x7a3   :  { %v5184_v44 = vpop.f32.mrf.mxu0 }
 0x7a4   :  { %v6332_v46 = vadd.f32 %v5184_v44, %v1658_v29  ;;  %v2536_v29 = vld [vmem:[#allocation16 + $0x198] sm:$0xff] }
 0x7a5   :  { %v1838_v47 = vpop.f32.mrf.mxu0 }
 0x7a6   :  { %v6334_v48 = vadd.f32 %v1838_v47, %v1657_v31  ;;  %v2534_v31 = vld [vmem:[#allocation16 + $0x188] sm:$0xff] }
 0x7a7   :  { %v5187_v50 = vpop.f32.mrf.mxu0 }
 0x7a8   :  { %v6336_v51 = vadd.f32 %v5187_v50, %v1660_v33  ;;  %v2532_v33 = vld [vmem:[#allocation16 + $0x178] sm:$0xff] }
 0x7a9   :  { %v1848_v53 = vpop.f32.mrf.mxu0 }
 0x7aa   :  { %v6338_v54 = vadd.f32 %v1848_v53, %v1659_v35  ;;  %v2530_v35 = vld [vmem:[#allocation16 + $0x168] sm:$0xff] }
 0x7c3   :  { %v5222_v56 = vpop.f32.mrf.mxu0 }
 0x7c5   :  { %v1932_v57 = vpop.f32.mrf.mxu0 }
 0x7c6   :  { %5242 = vmatprep.mubr.msk.f32.mxu1 %vm666_vm2, %v1932_v57 }
 0x7c7   :  { %v5225_v59 = vpop.f32.mrf.mxu0  ;;  %5243 = vmatmul.mubr.msk.f32.vlgmr.msra.gmra.mxu1 %vm666_vm2, %v5222_v56 }
 0x7c8   :  { %5249 = vmatpush3.msra.mxu1 %v5951_v45  ;;  %v2063_v45 = vld [vmem:[#allocation7 + $0x108] sm:$0xff] }
 0x7c9   :  { %5250 = vmatprep.subr.mxu1 %v5954_v49  ;;  %v1942_v60 = vpop.f32.mrf.mxu0 }
 0x7ca   :  { %5251 = vmatpush3.msra.mxu1 %v5954_v49  ;;  %5245 = vmatprep.mubr.msk.f32.mxu1 %vm666_vm2, %v1942_v60  ;;  %v2064_v49 = vld [vmem:[#allocation7 + $0x110] sm:$0xff] }
 0x7cb   :  { %5252 = vmatprep.subr.mxu1 %v5961_v52  ;;  %5246 = vmatmul.mubr.msk.f32.gmra.mxu1 %vm666_vm2, %v5225_v59 }
 0x7cc   :  { %5253 = vmatpush3.msra.mxu1 %v5961_v52  ;;  %5280 = vmatprep.mubr.f32.mxu1 %v2062_v62  ;;  %v2065_v52 = vld [vmem:[#allocation7 + $0x118] sm:$0xff] }
 0x7cd   :  { %5254 = vmatprep.subr.mxu1 %v5968_v55 }
 0x7ce   :  { %5255 = vmatpush3.msra.mxu1 %v5968_v55  ;;  %v2159_v55 = vld [vmem:[#allocation8 + $0x238] sm:$0xff] }
 0x7cf   :  { %5256 = vmatprep.subr.mxu1 %v5975_v58  ;;  %5286 = vmatprep.subr.mxu0 %v2159_v55 }
 0x7d0   :  { %5257 = vmatpush3.msra.mxu1 %v5975_v58  ;;  %v2158_v58 = vld [vmem:[#allocation8 + $0x230] sm:$0xff]  ;;  %5287 = vmatpush3.msra.mxu0 %v2159_v55 }
 0x7d1   :  { %5258 = vmatprep.subr.mxu1 %v5982_v61  ;;  %5288 = vmatprep.subr.mxu0 %v2158_v58 }
 0x7d2   :  { %5259 = vmatpush3.msra.mxu1 %v5982_v61  ;;  %v2157_v61 = vld [vmem:[#allocation8 + $0x228] sm:$0xff]  ;;  %5289 = vmatpush3.msra.mxu0 %v2158_v58 }
 0x7d3   :  { %5260 = vmatprep.subr.mxu1 %v5989_v0  ;;  %5290 = vmatprep.subr.mxu0 %v2157_v61 }
 0x7d4   :  { %5261 = vmatpush3.msra.mxu1 %v5989_v0  ;;  %v2156_v0 = vld [vmem:[#allocation8 + $0x220] sm:$0xff]  ;;  %5291 = vmatpush3.msra.mxu0 %v2157_v61 }
 0x7d5   :  { %5262 = vmatprep.subr.mxu1 %v5997_v3  ;;  %5292 = vmatprep.subr.mxu0 %v2156_v0 }
 0x7d6   :  { %5263 = vmatpush3.msra.mxu1 %v5997_v3  ;;  %v2155_v3 = vld [vmem:[#allocation8 + $0x218] sm:$0xff]  ;;  %5293 = vmatpush3.msra.mxu0 %v2156_v0 }
 0x7d7   :  { %5264 = vmatprep.subr.mxu1 %v6005_v6  ;;  %5294 = vmatprep.subr.mxu0 %v2155_v3 }
 0x7d8   :  { %5265 = vmatpush3.msra.mxu1 %v6005_v6  ;;  %v2154_v6 = vld [vmem:[#allocation8 + $0x210] sm:$0xff]  ;;  %5295 = vmatpush3.msra.mxu0 %v2155_v3 }
 0x7d9   :  { %5266 = vmatprep.subr.mxu1 %v6013_v9  ;;  %5296 = vmatprep.subr.mxu0 %v2154_v6 }
 0x7da   :  { %5267 = vmatpush3.msra.mxu1 %v6013_v9  ;;  %5297 = vmatpush3.msra.mxu0 %v2154_v6  ;;  %v2153_v9 = vld [vmem:[#allocation8 + $0x208] sm:$0xff] }
 0x7db   :  { %5268 = vmatprep.subr.mxu1 %v6021_v12  ;;  %5298 = vmatprep.subr.mxu0 %v2153_v9 }
 0x7dc   :  { %5269 = vmatpush3.msra.mxu1 %v6021_v12  ;;  %5299 = vmatpush3.msra.mxu0 %v2153_v9  ;;  %v2152_v12 = vld [vmem:[#allocation8 + $0x200] sm:$0xff] }
 0x7dd   :  { %5270 = vmatprep.subr.mxu1 %v6029_v15  ;;  %5300 = vmatprep.subr.mxu0 %v2152_v12 }
 0x7de   :  { %5271 = vmatpush3.msra.mxu1 %v6029_v15  ;;  %5301 = vmatpush3.msra.mxu0 %v2152_v12 }
 0x7df   :  { %5272 = vmatprep.subr.mxu1 %v6035_v17  ;;  %5308 = vmatprep.subr.mxu0 %v5728_v10 }
 0x7e0   :  { %5273 = vmatpush3.msra.mxu1 %v6035_v17 }
 0x7e1   :  { %5274 = vmatprep.subr.mxu1 %v6041_v19 }
 0x7e2   :  { %5275 = vmatpush3.msra.mxu1 %v6041_v19 }
 0x7e3   :  { %5276 = vmatprep.subr.mxu1 %v6047_v20 }
 0x7e4   :  { %5277 = vmatpush3.msra.mxu1 %v6047_v20 }
 0x7e5   :  { %5278 = vmatprep.subr.mxu1 %v6053_v21 }
 0x7e6   :  { %5279 = vmatpush3.msra.mxu1 %v6053_v21 }
 0x7e7   :  { %5281 = vmatmul.mubr.f32.vlgmr.msra.gmra.mxu1 %v2063_v45  ;;  %2549 = vmatprep.subr.mxu1 %v2548_v11 }
 0x7e8   :  { %5283 = vmatprep.mubr.f32.mxu1 %v2064_v49  ;;  %2550 = vmatpush1.msra.mxu1 %v2547_v13  ;;  %v2307_v13 = vlaneseq }
 0x7e9   :  { %2551 = vmatprep.subr.mxu1 %v2546_v14 }
 0x7ea   :  { %2552 = vmatpush1.msra.mxu1 %v2545_v16  ;;  %v6399_v14 = vshrl.u32 %v2307_v13, 7  ;;  %v2299_v16 = vld [vmem:[#allocation11] sm:$0x1]  ;;  %v2522_v13 = vld [vmem:[#allocation16 + $0x128] sm:$0xff] }
 0x7eb   :  { %5284 = vmatmul.mubr.f32.gmra.mxu1 %v2065_v52  ;;  %2553 = vmatprep.subr.mxu1 %v2544_v18 }
 0x7ec   :  { %2613 = vmatprep.mubr.f32.mxu1 %v5728_v10  ;;  %2554 = vmatpush1.msra.mxu1 %v2543_v22  ;;  %v6402_v18 = vsub.s32 0, %v6399_v14 }
 0x7ed   :  { %2555 = vmatprep.subr.mxu1 %v2542_v23 }
 0x7ee   :  { %2556 = vmatpush1.msra.mxu1 %v2541_v24  ;;  %v2303_v24 = vld [vmem:[#allocation13] sm:$0x1] }
 0x7ef   :  { %2557 = vmatprep.subr.mxu1 %v2540_v25 }
 0x7f0   :  { %2558 = vmatpush1.msra.mxu1 %v2539_v26 }
 0x7f1   :  { %2559 = vmatprep.subr.mxu1 %v2538_v27 }
 0x7f2   :  { %2560 = vmatpush1.msra.mxu1 %v2537_v28 }
 0x7f3   :  { %2561 = vmatprep.subr.mxu1 %v2536_v29 }
 0x7f4   :  { %2562 = vmatpush1.msra.mxu1 %v2535_v30 }
 0x7f5   :  { %2563 = vmatprep.subr.mxu1 %v2534_v31 }
 0x7f6   :  { %2564 = vmatpush1.msra.mxu1 %v2533_v32 }
 0x7f7   :  { %2565 = vmatprep.subr.mxu1 %v2532_v33 }
 0x7f8   :  { %2566 = vmatpush1.msra.mxu1 %v2531_v34 }
 0x7f9   :  { %2567 = vmatprep.subr.mxu1 %v2530_v35 }
 0x7fa   :  { %2568 = vmatpush1.msra.mxu1 %v2529_v36 }
 0x7fb   :  { %2569 = vmatprep.subr.mxu1 %v2528_v37 }
 0x7fc   :  { %2570 = vmatpush1.msra.mxu1 %v2527_v38 }
 0x7fd   :  { %2571 = vmatprep.subr.mxu1 %v2526_v39 }
 0x7fe   :  { %2572 = vmatpush1.msra.mxu1 %v2525_v40 }
 0x887   :  { %v5244_v15 = vpop.f32.mrf.mxu1 }
 0x888   :  { %v6376_v17 = vadd.f32 %v5244_v15, %v6332_v46 }
 0x889   :  { %v2038_v19 = vpop.f32.mrf.mxu1 }
 0x88a   :  { %v6379_v20 = vadd.f32 %v2038_v19, %v6334_v48 }
 0x88b   :  { %v5247_v21 = vpop.f32.mrf.mxu1 }
 0x88c   :  { %v6382_v63 = vadd.f32 %v5247_v21, %v6336_v51 }
 0x88d   :  { %v2048_v1 = vpop.f32.mrf.mxu1 }
 0x88e   :  { %v6385_v2 = vadd.f32 %v2048_v1, %v6338_v54 }
 0x8a7   :  { %v5282_v4 = vpop.f32.mrf.mxu1 }
 0x8a9   :  { %v2132_v5 = vpop.f32.mrf.mxu1 }
 0x8aa   :  { %5302 = vmatprep.mubr.msk.f32.mxu0 %vm666_vm2, %v2132_v5 }
 0x8ab   :  { %v5285_v7 = vpop.f32.mrf.mxu1  ;;  %5303 = vmatmul.mubr.msk.f32.vlgmr.msra.gmra.mxu0 %vm666_vm2, %v5282_v4 }
 0x8ad   :  { %v2142_v8 = vpop.f32.mrf.mxu1 }
 0x8ae   :  { %5305 = vmatprep.mubr.msk.f32.mxu0 %vm666_vm2, %v2142_v8 }
 0x8af   :  { %5306 = vmatmul.mubr.msk.f32.gmra.mxu0 %vm666_vm2, %v5285_v7 }
 0x8b0   :  { %5316 = vmatprep.mubr.msk.f32.mxu0 %vm5729_vm3, %v5728_v10 }
 0x96b   :  { %v5304_v41 = vpop.f32.mrf.mxu0 }
 0x96c   :  { %v2258_v43 = vadd.f32 %v5304_v41, %v6376_v17 }
 0x96d   :  { %v2238_v44 = vpop.f32.mrf.mxu0 }
 0x96e   :  { %v2269_v46 = vadd.f32 %v4341_v42, %v2258_v43  ;;  %v2257_v47 = vadd.f32 %v2238_v44, %v6379_v20 }
 0x96f   :  { %v5307_v48 = vpop.f32.mrf.mxu0 }
 0x970   :  { %v2268_v50 = vadd.f32 %v4341_v42, %v2257_v47  ;;  %v2260_v51 = vadd.f32 %v5307_v48, %v6382_v63  ;;  %v2284_v54 = vmul.f32 %v2269_v46, %v2269_v46  ;;  %v2442_v47 = vld [vmem:[#allocation14 + $0x8] sm:$0xff]  ;;  %v2440_v48 = vld [vmem:[#allocation16 + $0xf8] sm:$0xff] }
 0x971   :  { %v2248_v53 = vpop.f32.mrf.mxu0 }
 0x972   :  { %v2272_v56 = vadd.f32 %v2269_v46, %v2268_v50  ;;  %v2283_v57 = vmul.f32 %v2268_v50, %v2268_v50  ;;  %v2259_v59 = vadd.f32 %v2248_v53, %v6385_v2  ;;  %v2271_v62 = vadd.f32 %v4341_v42, %v2260_v51  ;;  %v2438_v51 = vld [vmem:[#allocation16 + $0xe8] sm:$0xff]  ;;  %v2437_v53 = vld [vmem:[#allocation16 + $0xe0] sm:$0xff] }
 0x974   :  { %v2287_v60 = vadd.f32 %v2284_v54, %v2283_v57  ;;  %v2270_v45 = vadd.f32 %v4341_v42, %v2259_v59  ;;  %v2286_v55 = vmul.f32 %v2271_v62, %v2271_v62  ;;  %v2436_v54 = vld [vmem:[#allocation16 + $0xd8] sm:$0xff]  ;;  %v2434_v57 = vld [vmem:[#allocation16 + $0xc8] sm:$0xff]  ;;  %v2433_v59 = vld [vmem:[#allocation16 + $0xc0] sm:$0xff] }
 0x976   :  { %v2273_v49 = vadd.f32 %v2272_v56, %v2270_v45  ;;  %v2285_v52 = vmul.f32 %v2270_v45, %v2270_v45  ;;  %v2435_v56 = vld [vmem:[#allocation16 + $0xd0] sm:$0xff] }
 0x978   :  { %v2274_v58 = vadd.f32 %v2273_v49, %v2271_v62  ;;  %v2288_v61 = vadd.f32 %v2287_v60, %v2285_v52  ;;  %v2432_v60 = vld [vmem:[#allocation16 + $0xb8] sm:$0xff]  ;;  %v2429_v49 = vld [vmem:[#allocation16 + $0xa0] sm:$0xff] }
 0x979   :  { %v2428_v52 = vld [vmem:[#allocation16 + $0x98] sm:$0xff] }
 0x97a   :  { %v2275_v0 = vrot.slane %v2274_v58, 4  ;;  %v2289_v3 = vadd.f32 %v2288_v61, %v2286_v55  ;;  %v2427_v55 = vld [vmem:[#allocation16 + $0x90] sm:$0xff]  ;;  %v2425_v61 = vld [vmem:[#allocation16 + $0x80] sm:$0xff] }
 0x97c   :  { %v2276_v6 = vadd.f32 %v2275_v0, %v2274_v58  ;;  %v2290_v9 = vrot.slane %v2289_v3, 4  ;;  %v2426_v58 = vld [vmem:[#allocation16 + $0x88] sm:$0xff]  ;;  %v2424_v0 = vld [vmem:[#allocation16 + $0x78] sm:$0xff] }
 0x97e   :  { %v2277_v12 = vrot.slane %v2276_v6, 2  ;;  %v2291_v15 = vadd.f32 %v2290_v9, %v2289_v3  ;;  %v2423_v3 = vld [vmem:[#allocation16 + $0x70] sm:$0xff]  ;;  %v2421_v9 = vld [vmem:[#allocation16 + $0x60] sm:$0xff] }
 0x980   :  { %v2278_v17 = vadd.f32 %v2277_v12, %v2276_v6  ;;  %v2292_v19 = vrot.slane %v2291_v15, 2  ;;  %v2422_v6 = vld [vmem:[#allocation16 + $0x68] sm:$0xff]  ;;  %v2420_v12 = vld [vmem:[#allocation16 + $0x58] sm:$0xff] }
 0x982   :  { %v2279_v20 = vrot.slane %v2278_v17, 1  ;;  %v2293_v21 = vadd.f32 %v2292_v19, %v2291_v15  ;;  %v2419_v15 = vld [vmem:[#allocation16 + $0x50] sm:$0xff]  ;;  %v2417_v19 = vld [vmem:[#allocation16 + $0x40] sm:$0xff] }
 0x984   :  { %v2280_v63 = vadd.f32 %v2279_v20, %v2278_v17  ;;  %v2294_v1 = vrot.slane %v2293_v21, 1  ;;  %v2418_v17 = vld [vmem:[#allocation16 + $0x48] sm:$0xff]  ;;  %v2416_v20 = vld [vmem:[#allocation16 + $0x38] sm:$0xff] }
 0x986   :  { %v2282_v2 = vmul.f32 0.03125, %v2280_v63  ;;  %v2295_v4 = vadd.f32 %v2294_v1, %v2293_v21  ;;  %v2415_v21 = vld [vmem:[#allocation16 + $0x30] sm:$0xff]  ;;  %v2414_v63 = vld [vmem:[#allocation16 + $0x28] sm:$0xff]  ;;  %v2413_v1 = vld [vmem:[#allocation16 + $0x20] sm:$0xff] }
 0x988   :  { %v2296_v5 = vmul.f32 0.03125, %v2295_v4  ;;  %v2297_v7 = vmul.f32 %v2282_v2, %v2282_v2  ;;  %v2411_v4 = vld [vmem:[#allocation16 + $0x10] sm:$0xff] }
 0x98a   :  { %v2298_v8 = vsub.f32 %v2296_v5, %v2297_v7  ;;  %v2410_v5 = vld [vmem:[#allocation16 + $0x8] sm:$0xff]  ;;  %v2524_v7 = vld [vmem:[#allocation16 + $0x138] sm:$0xff] }
 0x98b   :  { %2573 = vmatprep.subr.mxu1 %v2524_v7  ;;  %v2773_v7 = vld [vmem:[#allocation16 + $0x230] sm:$0xff] }
 0x98c   :  { %v2300_v11 = vadd.f32 1e-05, %v2298_v8  ;;  %v2409_v8 = vld [vmem:[#allocation16] sm:$0xff] }
 0x98e   :  { %5427 = vrsqrt.f32 %v2300_v11  ;;  %v2523_v11 = vld [vmem:[#allocation16 + $0x130] sm:$0xff] }
 0x98f   :  { %2574 = vmatpush1.msra.mxu1 %v2523_v11  ;;  %v2772_v11 = vld [vmem:[#allocation16 + $0x228] sm:$0xff] }
 0x990   :  { %2575 = vmatprep.subr.mxu1 %v2522_v13  ;;  %v2961_v13 = vld [vmem:[#allocation16 + $0x368] sm:$0xff] }
 0x99b   :  { %v5428_v22 = vpop.eup %5427 }
 0x99c   :  { %v2302_v23 = vmul.f32 %v5428_v22, %v2299_v16  ;;  %v2521_v16 = vld [vmem:[#allocation16 + $0x120] sm:$0xff]  ;;  %v2520_v22 = vld [vmem:[#allocation16 + $0x118] sm:$0xff] }
 0x99d   :  { %2576 = vmatpush1.msra.mxu1 %v2521_v16  ;;  %v2771_v16 = vld [vmem:[#allocation16 + $0x220] sm:$0xff] }
 0x99e   :  { %v2304_v25 = vmul.f32 %v2302_v23, %v2282_v2  ;;  %v2310_v26 = vrot.slane %v2302_v23, %v6402_v18  ;;  %v2412_v2 = vld [vmem:[#allocation16 + $0x18] sm:$0xff]  ;;  %v2519_v23 = vld [vmem:[#allocation16 + $0x110] sm:$0xff]  ;;  %2577 = vmatprep.subr.mxu1 %v2520_v22  ;;  %v2960_v22 = vld [vmem:[#allocation16 + $0x360] sm:$0xff] }
 0x99f   :  { %2578 = vmatpush1.msra.mxu1 %v2519_v23  ;;  %v2770_v23 = vld [vmem:[#allocation16 + $0x218] sm:$0xff] }
 0x9a0   :  { %v2305_v27 = vsub.f32 %v2303_v24, %v2304_v25  ;;  %v2312_v28 = vmul.f32 %v2310_v26, %v2268_v50  ;;  %v2313_v29 = vmul.f32 %v2310_v26, %v2269_v46  ;;  %v2314_v30 = vmul.f32 %v2310_v26, %v2270_v45  ;;  %v2334_v46 = vld [vmem:[#allocation14] sm:$0xff]  ;;  %v2439_v50 = vld [vmem:[#allocation16 + $0xf0] sm:$0xff]  ;;  %v2430_v45 = vld [vmem:[#allocation16 + $0xa8] sm:$0xff] }
 0x9a1   :  { %v2315_v31 = vmul.f32 %v2310_v26, %v2271_v62  ;;  %v2431_v62 = vld [vmem:[#allocation16 + $0xb0] sm:$0xff]  ;;  %v2518_v24 = vld [vmem:[#allocation16 + $0x108] sm:$0xff]  ;;  %v2517_v25 = vld [vmem:[#allocation16 + $0x100] sm:$0xff] }
 0x9a2   :  { %v2320_v32 = vrot.slane %v2305_v27, %v6402_v18  ;;  %2579 = vmatprep.subr.mxu1 %v2518_v24  ;;  %v2798_v26 = vld [vmem:[#allocation16 + $0x2f8] sm:$0xff]  ;;  %v2797_v27 = vld [vmem:[#allocation16 + $0x2f0] sm:$0xff] }
 0x9a3   :  { %2580 = vmatpush1.msra.mxu1 %v2517_v25  ;;  %v2959_v24 = vld [vmem:[#allocation16 + $0x358] sm:$0xff]  ;;  %v2769_v25 = vld [vmem:[#allocation16 + $0x210] sm:$0xff] }
 0x9a4   :  { %v2322_v33 = vadd.f32 %v2320_v32, %v2312_v28  ;;  %v2323_v34 = vadd.f32 %v2320_v32, %v2313_v29  ;;  %v2324_v35 = vadd.f32 %v2320_v32, %v2314_v30  ;;  %v2325_v36 = vadd.f32 %v2320_v32, %v2315_v31  ;;  %5330 = vmatprep.subr.mxu1 %v5728_v10  ;;  %v2796_v29 = vld [vmem:[#allocation16 + $0x2e8] sm:$0xff]  ;;  %v2795_v30 = vld [vmem:[#allocation16 + $0x2e0] sm:$0xff]  ;;  %v2794_v32 = vld [vmem:[#allocation16 + $0x2d8] sm:$0xff] }
 0x9a6   :  { %v2328_v37 = vmul.f32 0.2, %v2324_v35  ;;  %v2329_v38 = vmul.f32 0.2, %v2325_v36  ;;  %v2327_v39 = vmul.f32 0.2, %v2323_v34 }
 0x9a7   :  { %v2326_v41 = vmul.f32 0.2, %v2322_v33 }
 0x9a8   :  { %v6406_v40 = vmax.f32 %v2325_v36, %v2329_v38  ;;  %v6408_v42 = vmax.f32 %v2324_v35, %v2328_v37  ;;  %v6412_v43 = vmax.f32 %v2323_v34, %v2327_v39  ;;  %v2792_v34 = vld [vmem:[#allocation16 + $0x2c8] sm:$0xff]  ;;  %v2791_v35 = vld [vmem:[#allocation16 + $0x2c0] sm:$0xff]  ;;  %v2790_v36 = vld [vmem:[#allocation16 + $0x2b8] sm:$0xff] }
 0x9a9   :  { %v6416_v44 = vmax.f32 %v2322_v33, %v2326_v41  ;;  %v2793_v33 = vld [vmem:[#allocation16 + $0x2d0] sm:$0xff]  ;;  %v2788_v39 = vld [vmem:[#allocation16 + $0x2a8] sm:$0xff] }
 0x9aa   :  { %5309 = vmatpush3.msra.mxu0 %v6406_v40  ;;  %v2789_v38 = vld [vmem:[#allocation16 + $0x2b0] sm:$0xff] }
 0x9ab   :  { %5310 = vmatprep.subr.mxu0 %v5728_v10 }
 0x9ac   :  { %5311 = vmatpush3.msra.mxu0 %v6408_v42 }
 0x9ad   :  { %5312 = vmatprep.subr.mxu0 %v5728_v10 }
 0x9ae   :  { %5313 = vmatpush3.msra.mxu0 %v6412_v43 }
 0x9af   :  { %5314 = vmatprep.subr.mxu0 %v5728_v10 }
 0x9b0   :  { %5315 = vmatpush3.msra.mxu0 %v6416_v44 }
 0x9b1   :  { %5317 = vmatmul.mubr.msk.f32.vlgmr.msra.gmra.mxu0 %vm2335_vm4, %v2334_v46  ;;  %5319 = vmatprep.subr.mxu0 %v5728_v10  ;;  %v2787_v46 = vld [vmem:[#allocation16 + $0x2a0] sm:$0xff] }
 0x9b2   :  { %5320 = vmatpush3.msra.mxu0 %v6406_v40  ;;  %5327 = vmatprep.mubr.msk.f32.mxu0 %vm5729_vm3, %v5728_v10 }
 0x9b3   :  { %5321 = vmatprep.subr.mxu0 %v5728_v10 }
 0x9b4   :  { %5322 = vmatpush3.msra.mxu0 %v6408_v42 }
 0x9b5   :  { %5323 = vmatprep.subr.mxu0 %v5728_v10 }
 0x9b6   :  { %5324 = vmatpush3.msra.mxu0 %v6412_v43 }
 0x9b7   :  { %5325 = vmatprep.subr.mxu0 %v5728_v10 }
 0x9b8   :  { %5326 = vmatpush3.msra.mxu0 %v6416_v44 }
 0x9b9   :  { %5328 = vmatmul.mubr.msk.f32.vlgmr.msra.gmra.mxu0 %vm2335_vm4, %v2442_v47  ;;  %2620 = vmatprep.subr.mxu0 %v2440_v48  ;;  %v2786_v47 = vld [vmem:[#allocation16 + $0x298] sm:$0xff]  ;;  %v2785_v48 = vld [vmem:[#allocation16 + $0x290] sm:$0xff] }
 0x9ba   :  { %2621 = vmatpush1.msra.mxu0 %v2439_v50  ;;  %2684 = vmatprep.mubr.f32.mxu0 %v5728_v10  ;;  %v2784_v50 = vld [vmem:[#allocation16 + $0x288] sm:$0xff] }
 0x9bb   :  { %2622 = vmatprep.subr.mxu0 %v2438_v51  ;;  %v2692_v51 = vld [vmem:[#allocation14 + $0x10] sm:$0xff] }
 0x9bc   :  { %2623 = vmatpush1.msra.mxu0 %v2437_v53  ;;  %v2783_v53 = vld [vmem:[#allocation16 + $0x280] sm:$0xff] }
 0x9bd   :  { %2624 = vmatprep.subr.mxu0 %v2436_v54  ;;  %v2782_v54 = vld [vmem:[#allocation16 + $0x278] sm:$0xff] }
 0x9be   :  { %2625 = vmatpush1.msra.mxu0 %v2435_v56  ;;  %v2873_v56 = vld [vmem:[#allocation14 + $0x18] sm:$0xff] }
 0x9bf   :  { %2626 = vmatprep.subr.mxu0 %v2434_v57  ;;  %v2979_v57 = vld [vmem:[#allocation16 + $0x3f8] sm:$0xff] }
 0x9c0   :  { %2627 = vmatpush1.msra.mxu0 %v2433_v59  ;;  %v2978_v59 = vld [vmem:[#allocation16 + $0x3f0] sm:$0xff] }
 0x9c1   :  { %2628 = vmatprep.subr.mxu0 %v2432_v60  ;;  %v2977_v60 = vld [vmem:[#allocation16 + $0x3e8] sm:$0xff] }
 0x9c2   :  { %2629 = vmatpush1.msra.mxu0 %v2431_v62  ;;  %v2976_v62 = vld [vmem:[#allocation16 + $0x3e0] sm:$0xff] }
 0x9c3   :  { %2630 = vmatprep.subr.mxu0 %v2430_v45  ;;  %v2975_v45 = vld [vmem:[#allocation16 + $0x3d8] sm:$0xff] }
 0x9c4   :  { %2631 = vmatpush1.msra.mxu0 %v2429_v49  ;;  %v2974_v49 = vld [vmem:[#allocation16 + $0x3d0] sm:$0xff] }
 0x9c5   :  { %2632 = vmatprep.subr.mxu0 %v2428_v52  ;;  %v2973_v52 = vld [vmem:[#allocation16 + $0x3c8] sm:$0xff] }
 0x9c6   :  { %2633 = vmatpush1.msra.mxu0 %v2427_v55  ;;  %v2972_v55 = vld [vmem:[#allocation16 + $0x3c0] sm:$0xff] }
 0x9c7   :  { %2634 = vmatprep.subr.mxu0 %v2426_v58  ;;  %v2971_v58 = vld [vmem:[#allocation16 + $0x3b8] sm:$0xff] }
 0x9c8   :  { %2635 = vmatpush1.msra.mxu0 %v2425_v61  ;;  %v2781_v61 = vld [vmem:[#allocation16 + $0x270] sm:$0xff] }
 0x9c9   :  { %2636 = vmatprep.subr.mxu0 %v2424_v0  ;;  %v2970_v0 = vld [vmem:[#allocation16 + $0x3b0] sm:$0xff] }
 0x9ca   :  { %2637 = vmatpush1.msra.mxu0 %v2423_v3  ;;  %v2780_v3 = vld [vmem:[#allocation16 + $0x268] sm:$0xff] }
 0x9cb   :  { %2638 = vmatprep.subr.mxu0 %v2422_v6  ;;  %v2969_v6 = vld [vmem:[#allocation16 + $0x3a8] sm:$0xff] }
 0x9cc   :  { %2639 = vmatpush1.msra.mxu0 %v2421_v9  ;;  %v2779_v9 = vld [vmem:[#allocation16 + $0x260] sm:$0xff] }
 0x9cd   :  { %2640 = vmatprep.subr.mxu0 %v2420_v12  ;;  %v2968_v12 = vld [vmem:[#allocation16 + $0x3a0] sm:$0xff] }
 0x9ce   :  { %2641 = vmatpush1.msra.mxu0 %v2419_v15  ;;  %v2778_v15 = vld [vmem:[#allocation16 + $0x258] sm:$0xff] }
 0x9cf   :  { %2642 = vmatprep.subr.mxu0 %v2418_v17  ;;  %v2967_v17 = vld [vmem:[#allocation16 + $0x398] sm:$0xff] }
 0x9d0   :  { %2643 = vmatpush1.msra.mxu0 %v2417_v19  ;;  %v2777_v19 = vld [vmem:[#allocation16 + $0x250] sm:$0xff] }
 0x9d1   :  { %2644 = vmatprep.subr.mxu0 %v2416_v20  ;;  %v2966_v20 = vld [vmem:[#allocation16 + $0x390] sm:$0xff] }
 0x9d2   :  { %2645 = vmatpush1.msra.mxu0 %v2415_v21  ;;  %v2776_v21 = vld [vmem:[#allocation16 + $0x248] sm:$0xff] }
 0x9d3   :  { %2646 = vmatprep.subr.mxu0 %v2414_v63  ;;  %v2965_v63 = vld [vmem:[#allocation16 + $0x388] sm:$0xff] }
 0x9d4   :  { %2647 = vmatpush1.msra.mxu0 %v2413_v1  ;;  %v2775_v1 = vld [vmem:[#allocation16 + $0x240] sm:$0xff] }
 0x9d5   :  { %2648 = vmatprep.subr.mxu0 %v2412_v2  ;;  %v2964_v2 = vld [vmem:[#allocation16 + $0x380] sm:$0xff] }
 0x9d6   :  { %2649 = vmatpush1.msra.mxu0 %v2411_v4  ;;  %v2774_v4 = vld [vmem:[#allocation16 + $0x238] sm:$0xff] }
 0x9d7   :  { %2650 = vmatprep.subr.mxu0 %v2410_v5  ;;  %v2963_v5 = vld [vmem:[#allocation16 + $0x378] sm:$0xff] }
 0x9d8   :  { %2651 = vmatpush1.msra.mxu0 %v2409_v8  ;;  %v2962_v8 = vld [vmem:[#allocation16 + $0x370] sm:$0xff] }
 0x9d9   :  { %2799 = vmatprep.subr.mxu0 %v2798_v26  ;;  %v2958_v26 = vld [vmem:[#allocation16 + $0x350] sm:$0xff] }
 0xa71   :  { %v2405_v28 = vpop.f32.mrf.mxu0 }
 0xa72   :  { %2685 = vmatmul.mubr.f32.vlgmr.msra.gmra.mxu0 %v2405_v28  ;;  %v2957_v28 = vld [vmem:[#allocation16 + $0x348] sm:$0xff] }
 0xa73   :  { %v5318_v31 = vpop.f32.mrf.mxu0  ;;  %2800 = vmatpush1.msra.mxu0 %v2797_v27  ;;  %2863 = vmatprep.mubr.f32.mxu0 %v5728_v10  ;;  %v2768_v27 = vld [vmem:[#allocation16 + $0x208] sm:$0xff] }
 0xa74   :  { %2801 = vmatprep.subr.mxu0 %v2796_v29  ;;  %v2767_v29 = vld [vmem:[#allocation16 + $0x200] sm:$0xff]  ;;  %v2955_v31 = vld [vmem:[#allocation16 + $0x338] sm:$0xff] }
 0xa75   :  { %2802 = vmatpush1.msra.mxu0 %v2795_v30  ;;  %v2956_v30 = vld [vmem:[#allocation16 + $0x340] sm:$0xff] }
 0xa76   :  { %2803 = vmatprep.subr.mxu0 %v2794_v32  ;;  %v2954_v32 = vld [vmem:[#allocation16 + $0x330] sm:$0xff] }
 0xa77   :  { %2804 = vmatpush1.msra.mxu0 %v2793_v33  ;;  %v2953_v33 = vld [vmem:[#allocation16 + $0x328] sm:$0xff] }
 0xa78   :  { %2805 = vmatprep.subr.mxu0 %v2792_v34  ;;  %v2952_v34 = vld [vmem:[#allocation16 + $0x320] sm:$0xff] }
 0xa79   :  { %v2512_v37 = vpop.f32.mrf.mxu0  ;;  %2806 = vmatpush1.msra.mxu0 %v2791_v35  ;;  %v2951_v35 = vld [vmem:[#allocation16 + $0x318] sm:$0xff] }
 0xa7a   :  { %2614 = vmatmul.mubr.f32.vlgmr.msra.gmra.mxu1 %v2512_v37  ;;  %2807 = vmatprep.subr.mxu0 %v2790_v36  ;;  %v2950_v36 = vld [vmem:[#allocation16 + $0x310] sm:$0xff]  ;;  %v2949_v37 = vld [vmem:[#allocation16 + $0x308] sm:$0xff] }
 0xa7b   :  { %5331 = vmatpush3.msra.mxu1 %v6406_v40  ;;  %v5329_v41 = vpop.f32.mrf.mxu0  ;;  %5338 = vmatprep.mubr.msk.f32.mxu1 %vm5729_vm3, %v5728_v10 }
 0xa7c   :  { %5332 = vmatprep.subr.mxu1 %v5728_v10  ;;  %2808 = vmatpush1.msra.mxu0 %v2789_v38  ;;  %v2948_v38 = vld [vmem:[#allocation16 + $0x300] sm:$0xff] }
 0xa7d   :  { %5333 = vmatpush3.msra.mxu1 %v6408_v42  ;;  %2809 = vmatprep.subr.mxu0 %v2788_v39 }
 0xa7e   :  { %5334 = vmatprep.subr.mxu1 %v5728_v10  ;;  %2810 = vmatpush1.msra.mxu0 %v2787_v46 }
 0xa7f   :  { %5335 = vmatpush3.msra.mxu1 %v6412_v43  ;;  %2811 = vmatprep.subr.mxu0 %v2786_v47 }
 0xa80   :  { %5336 = vmatprep.subr.mxu1 %v5728_v10  ;;  %2812 = vmatpush1.msra.mxu0 %v2785_v48 }
 0xa81   :  { %5337 = vmatpush3.msra.mxu1 %v6416_v44  ;;  %2813 = vmatprep.subr.mxu0 %v2784_v50 }
 0xa82   :  { %5339 = vmatmul.mubr.msk.f32.vlgmr.msra.gmra.mxu1 %vm2335_vm4, %v2692_v51  ;;  %5341 = vmatprep.subr.mxu1 %v5728_v10  ;;  %v3054_v51 = vld [vmem:[#allocation14 + $0x20] sm:$0xff] }
 0xa83   :  { %5342 = vmatpush3.msra.mxu1 %v6406_v40  ;;  %5349 = vmatprep.mubr.msk.f32.mxu1 %vm5729_vm3, %v5728_v10 }
 0xa84   :  { %5343 = vmatprep.subr.mxu1 %v5728_v10  ;;  %2814 = vmatpush1.msra.mxu0 %v2783_v53 }
 0xa85   :  { %5344 = vmatpush3.msra.mxu1 %v6408_v42  ;;  %2815 = vmatprep.subr.mxu0 %v2782_v54  ;;  %v3160_v54 = vld [vmem:[#allocation16 + $0x4f8] sm:$0xff] }
 0xa86   :  { %5345 = vmatprep.subr.mxu1 %v5728_v10  ;;  %2816 = vmatpush1.msra.mxu0 %v2781_v61  ;;  %v3152_v61 = vld [vmem:[#allocation16 + $0x4b8] sm:$0xff] }
 0xa87   :  { %5346 = vmatpush3.msra.mxu1 %v6412_v43  ;;  %2817 = vmatprep.subr.mxu0 %v2780_v3  ;;  %v3151_v3 = vld [vmem:[#allocation16 + $0x4b0] sm:$0xff] }
 0xa88   :  { %5347 = vmatprep.subr.mxu1 %v5728_v10  ;;  %2818 = vmatpush1.msra.mxu0 %v2779_v9  ;;  %v3150_v9 = vld [vmem:[#allocation16 + $0x4a8] sm:$0xff] }
 0xa89   :  { %5348 = vmatpush3.msra.mxu1 %v6416_v44  ;;  %2819 = vmatprep.subr.mxu0 %v2778_v15  ;;  %v3149_v15 = vld [vmem:[#allocation16 + $0x4a0] sm:$0xff] }
 0xa8a   :  { %5350 = vmatmul.mubr.msk.f32.vlgmr.msra.gmra.mxu1 %vm2335_vm4, %v2873_v56  ;;  %2980 = vmatprep.subr.mxu1 %v2979_v57  ;;  %v3159_v56 = vld [vmem:[#allocation16 + $0x4f0] sm:$0xff]  ;;  %v3158_v57 = vld [vmem:[#allocation16 + $0x4e8] sm:$0xff] }
 0xa8b   :  { %2981 = vmatpush1.msra.mxu1 %v2978_v59  ;;  %3044 = vmatprep.mubr.f32.mxu1 %v5728_v10 }
 0xa8c   :  { %2982 = vmatprep.subr.mxu1 %v2977_v60  ;;  %2820 = vmatpush1.msra.mxu0 %v2777_v19  ;;  %v3157_v60 = vld [vmem:[#allocation16 + $0x4e0] sm:$0xff]  ;;  %v3148_v19 = vld [vmem:[#allocation16 + $0x498] sm:$0xff] }
 0xa8d   :  { %2983 = vmatpush1.msra.mxu1 %v2976_v62  ;;  %2821 = vmatprep.subr.mxu0 %v2776_v21  ;;  %v3156_v62 = vld [vmem:[#allocation16 + $0x4d8] sm:$0xff]  ;;  %v3147_v21 = vld [vmem:[#allocation16 + $0x490] sm:$0xff] }
 0xa8e   :  { %2984 = vmatprep.subr.mxu1 %v2975_v45  ;;  %2822 = vmatpush1.msra.mxu0 %v2775_v1  ;;  %v3155_v45 = vld [vmem:[#allocation16 + $0x4d0] sm:$0xff]  ;;  %v3146_v1 = vld [vmem:[#allocation16 + $0x488] sm:$0xff] }
 0xa8f   :  { %2985 = vmatpush1.msra.mxu1 %v2974_v49  ;;  %2823 = vmatprep.subr.mxu0 %v2774_v4  ;;  %v3235_v49 = vld [vmem:[#allocation14 + $0x28] sm:$0xff] }
 0xa90   :  { %2986 = vmatprep.subr.mxu1 %v2973_v52  ;;  %2824 = vmatpush1.msra.mxu0 %v2773_v7  ;;  %v3154_v52 = vld [vmem:[#allocation16 + $0x4c8] sm:$0xff]  ;;  %v3145_v4 = vld [vmem:[#allocation16 + $0x480] sm:$0xff]  ;;  %v3144_v7 = vld [vmem:[#allocation16 + $0x478] sm:$0xff] }
 0xa91   :  { %2987 = vmatpush1.msra.mxu1 %v2972_v55  ;;  %2825 = vmatprep.subr.mxu0 %v2772_v11  ;;  %v3153_v55 = vld [vmem:[#allocation16 + $0x4c0] sm:$0xff]  ;;  %v3143_v11 = vld [vmem:[#allocation16 + $0x470] sm:$0xff] }
 0xa92   :  { %2988 = vmatprep.subr.mxu1 %v2971_v58  ;;  %2826 = vmatpush1.msra.mxu0 %v2771_v16  ;;  %v3341_v58 = vld [vmem:[#allocation16 + $0x5f8] sm:$0xff]  ;;  %v3142_v16 = vld [vmem:[#allocation16 + $0x468] sm:$0xff] }
 0xa93   :  { %2989 = vmatpush1.msra.mxu1 %v2970_v0  ;;  %2827 = vmatprep.subr.mxu0 %v2770_v23  ;;  %v3340_v0 = vld [vmem:[#allocation16 + $0x5f0] sm:$0xff]  ;;  %v3141_v23 = vld [vmem:[#allocation16 + $0x460] sm:$0xff] }
 0xa94   :  { %2990 = vmatprep.subr.mxu1 %v2969_v6  ;;  %2828 = vmatpush1.msra.mxu0 %v2769_v25  ;;  %v3339_v6 = vld [vmem:[#allocation16 + $0x5e8] sm:$0xff]  ;;  %v3140_v25 = vld [vmem:[#allocation16 + $0x458] sm:$0xff] }
 0xa95   :  { %2991 = vmatpush1.msra.mxu1 %v2968_v12  ;;  %2829 = vmatprep.subr.mxu0 %v2768_v27  ;;  %v3338_v12 = vld [vmem:[#allocation16 + $0x5e0] sm:$0xff]  ;;  %v3139_v27 = vld [vmem:[#allocation16 + $0x450] sm:$0xff] }
 0xa96   :  { %2992 = vmatprep.subr.mxu1 %v2967_v17  ;;  %2830 = vmatpush1.msra.mxu0 %v2767_v29  ;;  %v3337_v17 = vld [vmem:[#allocation16 + $0x5d8] sm:$0xff]  ;;  %v3138_v29 = vld [vmem:[#allocation16 + $0x448] sm:$0xff] }
 0xa97   :  { %2993 = vmatpush1.msra.mxu1 %v2966_v20  ;;  %5352 = vmatprep.subr.mxu0 %v5728_v10  ;;  %v3336_v20 = vld [vmem:[#allocation16 + $0x5d0] sm:$0xff] }
 0xa98   :  { %2994 = vmatprep.subr.mxu1 %v2965_v63  ;;  %v3335_v63 = vld [vmem:[#allocation16 + $0x5c8] sm:$0xff] }
 0xa99   :  { %2995 = vmatpush1.msra.mxu1 %v2964_v2  ;;  %v3334_v2 = vld [vmem:[#allocation16 + $0x5c0] sm:$0xff] }
 0xa9a   :  { %2996 = vmatprep.subr.mxu1 %v2963_v5  ;;  %v3333_v5 = vld [vmem:[#allocation16 + $0x5b8] sm:$0xff] }
 0xa9b   :  { %2997 = vmatpush1.msra.mxu1 %v2962_v8  ;;  %v3332_v8 = vld [vmem:[#allocation16 + $0x5b0] sm:$0xff] }
 0xa9c   :  { %2998 = vmatprep.subr.mxu1 %v2961_v13  ;;  %v3331_v13 = vld [vmem:[#allocation16 + $0x5a8] sm:$0xff] }
 0xa9d   :  { %2999 = vmatpush1.msra.mxu1 %v2960_v22  ;;  %v3330_v22 = vld [vmem:[#allocation16 + $0x5a0] sm:$0xff] }
 0xa9e   :  { %3000 = vmatprep.subr.mxu1 %v2959_v24  ;;  %v3329_v24 = vld [vmem:[#allocation16 + $0x598] sm:$0xff] }
 0xa9f   :  { %3001 = vmatpush1.msra.mxu1 %v2958_v26  ;;  %v3328_v26 = vld [vmem:[#allocation16 + $0x590] sm:$0xff] }
 0xaa0   :  { %3002 = vmatprep.subr.mxu1 %v2957_v28  ;;  %v3327_v28 = vld [vmem:[#allocation16 + $0x588] sm:$0xff] }
 0xaa1   :  { %3003 = vmatpush1.msra.mxu1 %v2956_v30  ;;  %v3326_v30 = vld [vmem:[#allocation16 + $0x580] sm:$0xff] }
 0xaa2   :  { %3004 = vmatprep.subr.mxu1 %v2955_v31  ;;  %v3137_v31 = vld [vmem:[#allocation16 + $0x440] sm:$0xff] }
 0xaa3   :  { %3005 = vmatpush1.msra.mxu1 %v2954_v32  ;;  %v3325_v32 = vld [vmem:[#allocation16 + $0x578] sm:$0xff] }
 0xaa4   :  { %3006 = vmatprep.subr.mxu1 %v2953_v33  ;;  %v3136_v33 = vld [vmem:[#allocation16 + $0x438] sm:$0xff] }
 0xaa5   :  { %3007 = vmatpush1.msra.mxu1 %v2952_v34  ;;  %v3135_v34 = vld [vmem:[#allocation16 + $0x430] sm:$0xff] }
 0xaa6   :  { %3008 = vmatprep.subr.mxu1 %v2951_v35  ;;  %v3324_v35 = vld [vmem:[#allocation16 + $0x570] sm:$0xff] }
 0xaa7   :  { %3009 = vmatpush1.msra.mxu1 %v2950_v36  ;;  %v3134_v36 = vld [vmem:[#allocation16 + $0x428] sm:$0xff] }
 0xaa8   :  { %3010 = vmatprep.subr.mxu1 %v2949_v37  ;;  %v3323_v37 = vld [vmem:[#allocation16 + $0x568] sm:$0xff] }
 0xaa9   :  { %3011 = vmatpush1.msra.mxu1 %v2948_v38  ;;  %v3133_v38 = vld [vmem:[#allocation16 + $0x420] sm:$0xff] }
 0xaaa   :  { %5363 = vmatprep.subr.mxu1 %v5728_v10 }
 0xb32   :  { %v2686_v39 = vpop.f32.mrf.mxu0 }
 0xb3a   :  { %v2615_v41 = vpop.f32.mrf.mxu1 }
 0xb3b   :  { %v6460_v46 = vadd.f32 %v2686_v39, %v2615_v41  ;;  %v3322_v39 = vld [vmem:[#allocation16 + $0x560] sm:$0xff]  ;;  %v3132_v41 = vld [vmem:[#allocation16 + $0x418] sm:$0xff] }
 0xb3c   :  { %v6462_v47 = vpop.f32.mrf.mxu1 }
 0xb42   :  { %v2762_v48 = vpop.f32.mrf.mxu1 }
 0xb43   :  { %2864 = vmatmul.mubr.f32.vlgmr.msra.gmra.mxu0 %v2762_v48  ;;  %v3321_v48 = vld [vmem:[#allocation16 + $0x558] sm:$0xff] }
 0xb44   :  { %5353 = vmatpush3.msra.mxu0 %v6406_v40  ;;  %v5340_v50 = vpop.f32.mrf.mxu1  ;;  %5360 = vmatprep.mubr.msk.f32.mxu0 %vm5729_vm3, %v5728_v10 }
 0xb45   :  { %5354 = vmatprep.subr.mxu0 %v5728_v10  ;;  %v3131_v50 = vld [vmem:[#allocation16 + $0x410] sm:$0xff] }
 0xb46   :  { %5355 = vmatpush3.msra.mxu0 %v6408_v42 }
 0xb47   :  { %5356 = vmatprep.subr.mxu0 %v5728_v10 }
 0xb48   :  { %5357 = vmatpush3.msra.mxu0 %v6412_v43 }
 0xb49   :  { %5358 = vmatprep.subr.mxu0 %v5728_v10 }
 0xb4a   :  { %5359 = vmatpush3.msra.mxu0 %v6416_v44  ;;  %v2943_v53 = vpop.f32.mrf.mxu1 }
 0xb4b   :  { %5361 = vmatmul.mubr.msk.f32.vlgmr.msra.gmra.mxu0 %vm2335_vm4, %v3054_v51  ;;  %3045 = vmatmul.mubr.f32.vlgmr.msra.gmra.mxu1 %v2943_v53  ;;  %v3320_v51 = vld [vmem:[#allocation16 + $0x550] sm:$0xff]  ;;  %v3130_v53 = vld [vmem:[#allocation16 + $0x408] sm:$0xff] }
 0xb4c   :  { %5364 = vmatpush3.msra.mxu1 %v6406_v40  ;;  %5371 = vmatprep.mubr.msk.f32.mxu1 %vm5729_vm3, %v5728_v10  ;;  %v5351_v59 = vpop.f32.mrf.mxu1 }
 0xb4d   :  { %5365 = vmatprep.subr.mxu1 %v5728_v10  ;;  %3161 = vmatprep.subr.mxu0 %v3160_v54  ;;  %v3319_v54 = vld [vmem:[#allocation16 + $0x548] sm:$0xff]  ;;  %v3317_v59 = vld [vmem:[#allocation16 + $0x538] sm:$0xff] }
 0xb4e   :  { %5366 = vmatpush3.msra.mxu1 %v6408_v42  ;;  %3162 = vmatpush1.msra.mxu0 %v3159_v56  ;;  %v3129_v56 = vld [vmem:[#allocation16 + $0x400] sm:$0xff] }
 0xb4f   :  { %5367 = vmatprep.subr.mxu1 %v5728_v10  ;;  %3163 = vmatprep.subr.mxu0 %v3158_v57  ;;  %v3318_v57 = vld [vmem:[#allocation16 + $0x540] sm:$0xff] }
 0xb50   :  { %5368 = vmatpush3.msra.mxu1 %v6412_v43  ;;  %3164 = vmatpush1.msra.mxu0 %v3157_v60  ;;  %v3316_v60 = vld [vmem:[#allocation16 + $0x530] sm:$0xff] }
 0xb51   :  { %5369 = vmatprep.subr.mxu1 %v5728_v10  ;;  %3165 = vmatprep.subr.mxu0 %v3156_v62  ;;  %v3315_v62 = vld [vmem:[#allocation16 + $0x528] sm:$0xff] }
 0xb52   :  { %5370 = vmatpush3.msra.mxu1 %v6416_v44  ;;  %3166 = vmatpush1.msra.mxu0 %v3155_v45  ;;  %v3314_v45 = vld [vmem:[#allocation16 + $0x520] sm:$0xff] }
 0xb53   :  { %5372 = vmatmul.mubr.msk.f32.vlgmr.msra.gmra.mxu1 %vm2335_vm4, %v3235_v49  ;;  %3167 = vmatprep.subr.mxu0 %v3154_v52  ;;  %v3313_v49 = vld [vmem:[#allocation16 + $0x518] sm:$0xff]  ;;  %v3312_v52 = vld [vmem:[#allocation16 + $0x510] sm:$0xff] }
 0xb54   :  { %3168 = vmatpush1.msra.mxu0 %v3153_v55  ;;  %3342 = vmatprep.subr.mxu1 %v3341_v58  ;;  %v3311_v55 = vld [vmem:[#allocation16 + $0x508] sm:$0xff]  ;;  %v3310_v58 = vld [vmem:[#allocation16 + $0x500] sm:$0xff] }
 0xb55   :  { %3169 = vmatprep.subr.mxu0 %v3152_v61  ;;  %3343 = vmatpush1.msra.mxu1 %v3340_v0  ;;  %v2688_v61 = vpop.f32.mrf.mxu0 }
 0xb56   :  { %3170 = vmatpush1.msra.mxu0 %v3151_v3  ;;  %3344 = vmatprep.subr.mxu1 %v3339_v6  ;;  %v2689_v3 = vadd.f32 %v2688_v61, %v6462_v47  ;;  %v3497_v61 = vld [vmem:[#allocation16 + $0x630] sm:$0xff] }
 0xb57   :  { %3171 = vmatprep.subr.mxu0 %v3150_v9  ;;  %3345 = vmatpush1.msra.mxu1 %v3338_v12 }
 0xb58   :  { %3172 = vmatpush1.msra.mxu0 %v3149_v15  ;;  %3346 = vmatprep.subr.mxu1 %v3337_v17 }
 0xb59   :  { %3173 = vmatprep.subr.mxu0 %v3148_v19  ;;  %3347 = vmatpush1.msra.mxu1 %v3336_v20 }
 0xb5a   :  { %3174 = vmatpush1.msra.mxu0 %v3147_v21  ;;  %3348 = vmatprep.subr.mxu1 %v3335_v63 }
 0xb5b   :  { %3175 = vmatprep.subr.mxu0 %v3146_v1  ;;  %3349 = vmatpush1.msra.mxu1 %v3334_v2  ;;  %v3522_v1 = vld [vmem:[#allocation16 + $0x6f8] sm:$0xff]  ;;  %v3521_v2 = vld [vmem:[#allocation16 + $0x6f0] sm:$0xff] }
 0xb5c   :  { %3176 = vmatpush1.msra.mxu0 %v3145_v4  ;;  %3350 = vmatprep.subr.mxu1 %v3333_v5  ;;  %v3520_v4 = vld [vmem:[#allocation16 + $0x6e8] sm:$0xff] }
 0xb5d   :  { %3177 = vmatprep.subr.mxu0 %v3144_v7  ;;  %3351 = vmatpush1.msra.mxu1 %v3332_v8  ;;  %v3519_v7 = vld [vmem:[#allocation16 + $0x6e0] sm:$0xff]  ;;  %v3518_v8 = vld [vmem:[#allocation16 + $0x6d8] sm:$0xff] }
 0xb5e   :  { %3178 = vmatpush1.msra.mxu0 %v3143_v11  ;;  %3352 = vmatprep.subr.mxu1 %v3331_v13  ;;  %v3517_v11 = vld [vmem:[#allocation16 + $0x6d0] sm:$0xff] }
 0xb5f   :  { %3179 = vmatprep.subr.mxu0 %v3142_v16  ;;  %3353 = vmatpush1.msra.mxu1 %v3330_v22  ;;  %v3597_v13 = vld [vmem:[#allocation14 + $0x38] sm:$0xff]  ;;  %v3516_v16 = vld [vmem:[#allocation16 + $0x6c8] sm:$0xff]  ;;  %v3515_v22 = vld [vmem:[#allocation16 + $0x6c0] sm:$0xff] }
 0xb60   :  { %3180 = vmatpush1.msra.mxu0 %v3141_v23  ;;  %3354 = vmatprep.subr.mxu1 %v3329_v24  ;;  %v3703_v23 = vld [vmem:[#allocation16 + $0x7f8] sm:$0xff] }
 0xb61   :  { %3181 = vmatprep.subr.mxu0 %v3140_v25  ;;  %3355 = vmatpush1.msra.mxu1 %v3328_v26  ;;  %v3514_v24 = vld [vmem:[#allocation16 + $0x6b8] sm:$0xff]  ;;  %v3702_v25 = vld [vmem:[#allocation16 + $0x7f0] sm:$0xff] }
 0xb62   :  { %3182 = vmatpush1.msra.mxu0 %v3139_v27  ;;  %3356 = vmatprep.subr.mxu1 %v3327_v28  ;;  %v3513_v26 = vld [vmem:[#allocation16 + $0x6b0] sm:$0xff]  ;;  %v3701_v27 = vld [vmem:[#allocation16 + $0x7e8] sm:$0xff] }
 0xb63   :  { %3183 = vmatprep.subr.mxu0 %v3138_v29  ;;  %3357 = vmatpush1.msra.mxu1 %v3326_v30  ;;  %v3512_v28 = vld [vmem:[#allocation16 + $0x6a8] sm:$0xff]  ;;  %v3700_v29 = vld [vmem:[#allocation16 + $0x7e0] sm:$0xff] }
 0xb64   :  { %3184 = vmatpush1.msra.mxu0 %v3137_v31  ;;  %3358 = vmatprep.subr.mxu1 %v3325_v32  ;;  %v3511_v30 = vld [vmem:[#allocation16 + $0x6a0] sm:$0xff]  ;;  %v3699_v31 = vld [vmem:[#allocation16 + $0x7d8] sm:$0xff] }
 0xb65   :  { %3185 = vmatprep.subr.mxu0 %v3136_v33  ;;  %3225 = vmatprep.mubr.f32.mxu0 %v5728_v10  ;;  %v3510_v32 = vld [vmem:[#allocation16 + $0x698] sm:$0xff]  ;;  %v3698_v33 = vld [vmem:[#allocation16 + $0x7d0] sm:$0xff] }
 0xb66   :  { %3406 = vmatprep.mubr.f32.mxu1 %v5728_v10  ;;  %3186 = vmatpush1.msra.mxu0 %v3135_v34  ;;  %v3509_v34 = vld [vmem:[#allocation16 + $0x690] sm:$0xff] }
 0xb67   :  { %3359 = vmatpush1.msra.mxu1 %v3324_v35  ;;  %3187 = vmatprep.subr.mxu0 %v3134_v36  ;;  %v3697_v35 = vld [vmem:[#allocation16 + $0x7c8] sm:$0xff] }
 0xb68   :  { %3360 = vmatprep.subr.mxu1 %v3323_v37  ;;  %3188 = vmatpush1.msra.mxu0 %v3133_v38  ;;  %v3508_v36 = vld [vmem:[#allocation16 + $0x688] sm:$0xff]  ;;  %v3696_v37 = vld [vmem:[#allocation16 + $0x7c0] sm:$0xff] }
 0xb69   :  { %3361 = vmatpush1.msra.mxu1 %v3322_v39  ;;  %3189 = vmatprep.subr.mxu0 %v3132_v41  ;;  %v3507_v38 = vld [vmem:[#allocation16 + $0x680] sm:$0xff]  ;;  %v3695_v39 = vld [vmem:[#allocation16 + $0x7b8] sm:$0xff] }
 0xb6a   :  { %3362 = vmatprep.subr.mxu1 %v3321_v48  ;;  %3190 = vmatpush1.msra.mxu0 %v3131_v50  ;;  %v3506_v41 = vld [vmem:[#allocation16 + $0x678] sm:$0xff]  ;;  %v3694_v48 = vld [vmem:[#allocation16 + $0x7b0] sm:$0xff] }
 0xb6b   :  { %3363 = vmatpush1.msra.mxu1 %v3320_v51  ;;  %3191 = vmatprep.subr.mxu0 %v3130_v53  ;;  %v3505_v50 = vld [vmem:[#allocation16 + $0x670] sm:$0xff]  ;;  %v3693_v51 = vld [vmem:[#allocation16 + $0x7a8] sm:$0xff] }
 0xb6c   :  { %3364 = vmatprep.subr.mxu1 %v3319_v54  ;;  %3192 = vmatpush1.msra.mxu0 %v3129_v56  ;;  %v3504_v53 = vld [vmem:[#allocation16 + $0x668] sm:$0xff]  ;;  %v3692_v54 = vld [vmem:[#allocation16 + $0x7a0] sm:$0xff] }
 0xb6d   :  { %3365 = vmatpush1.msra.mxu1 %v3318_v57  ;;  %5374 = vmatprep.subr.mxu0 %v5728_v10  ;;  %v3503_v56 = vld [vmem:[#allocation16 + $0x660] sm:$0xff]  ;;  %v3691_v57 = vld [vmem:[#allocation16 + $0x798] sm:$0xff] }
 0xb6e   :  { %3366 = vmatprep.subr.mxu1 %v3317_v59  ;;  %v3502_v59 = vld [vmem:[#allocation16 + $0x658] sm:$0xff] }
 0xb6f   :  { %3367 = vmatpush1.msra.mxu1 %v3316_v60  ;;  %v3690_v60 = vld [vmem:[#allocation16 + $0x790] sm:$0xff] }
 0xb70   :  { %3368 = vmatprep.subr.mxu1 %v3315_v62  ;;  %v3501_v62 = vld [vmem:[#allocation16 + $0x650] sm:$0xff] }
 0xb71   :  { %3369 = vmatpush1.msra.mxu1 %v3314_v45  ;;  %v3689_v45 = vld [vmem:[#allocation16 + $0x788] sm:$0xff] }
 0xb72   :  { %3370 = vmatprep.subr.mxu1 %v3313_v49  ;;  %v3500_v49 = vld [vmem:[#allocation16 + $0x648] sm:$0xff] }
 0xb73   :  { %3371 = vmatpush1.msra.mxu1 %v3312_v52  ;;  %v3688_v52 = vld [vmem:[#allocation16 + $0x780] sm:$0xff] }
 0xb74   :  { %3372 = vmatprep.subr.mxu1 %v3311_v55  ;;  %v3499_v55 = vld [vmem:[#allocation16 + $0x640] sm:$0xff] }
 0xb75   :  { %3373 = vmatpush1.msra.mxu1 %v3310_v58  ;;  %v3498_v58 = vld [vmem:[#allocation16 + $0x638] sm:$0xff] }
 0xb76   :  { %5385 = vmatprep.subr.mxu1 %v5728_v10 }
 0xc03   :  { %v2865_v0 = vpop.f32.mrf.mxu0 }
 0xc04   :  { %v2870_v6 = vadd.f32 %v2865_v0, %v6460_v46  ;;  %v3416_v46 = vld [vmem:[#allocation14 + $0x30] sm:$0xff]  ;;  %v3687_v0 = vld [vmem:[#allocation16 + $0x778] sm:$0xff] }
 0xc05   :  { %v2867_v9 = vpop.f32.mrf.mxu0 }
 0xc06   :  { %v2871_v12 = vadd.f32 %v2867_v9, %v2689_v3  ;;  %v3496_v3 = vld [vmem:[#allocation16 + $0x628] sm:$0xff]  ;;  %v3495_v9 = vld [vmem:[#allocation16 + $0x620] sm:$0xff] }
 0xc0b   :  { %v3124_v15 = vpop.f32.mrf.mxu0  ;;  %v3046_v17 = vpop.f32.mrf.mxu1 }
 0xc0c   :  { %v6490_v19 = vadd.f32 %v3046_v17, %v2870_v6  ;;  %3226 = vmatmul.mubr.f32.vlgmr.msra.gmra.mxu0 %v3124_v15  ;;  %v3686_v6 = vld [vmem:[#allocation16 + $0x770] sm:$0xff]  ;;  %v3494_v15 = vld [vmem:[#allocation16 + $0x618] sm:$0xff]  ;;  %v3684_v17 = vld [vmem:[#allocation16 + $0x760] sm:$0xff] }
 0xc0d   :  { %5375 = vmatpush3.msra.mxu0 %v6406_v40  ;;  %v5362_v20 = vpop.f32.mrf.mxu0  ;;  %v3048_v21 = vpop.f32.mrf.mxu1  ;;  %5382 = vmatprep.mubr.msk.f32.mxu0 %vm5729_vm3, %v5728_v10 }
 0xc0e   :  { %5376 = vmatprep.subr.mxu0 %v5728_v10  ;;  %v6496_v63 = vadd.f32 %v3048_v21, %v2871_v12  ;;  %v3685_v12 = vld [vmem:[#allocation16 + $0x768] sm:$0xff]  ;;  %v3493_v20 = vld [vmem:[#allocation16 + $0x610] sm:$0xff]  ;;  %v3683_v21 = vld [vmem:[#allocation16 + $0x758] sm:$0xff] }
 0xc0f   :  { %5377 = vmatpush3.msra.mxu0 %v6408_v42 }
 0xc10   :  { %5378 = vmatprep.subr.mxu0 %v5728_v10 }
 0xc11   :  { %5379 = vmatpush3.msra.mxu0 %v6412_v43 }
 0xc12   :  { %5380 = vmatprep.subr.mxu0 %v5728_v10 }
 0xc13   :  { %5381 = vmatpush3.msra.mxu0 %v6416_v44  ;;  %v3305_v47 = vpop.f32.mrf.mxu1 }
 0xc14   :  { %5383 = vmatmul.mubr.msk.f32.vlgmr.msra.gmra.mxu0 %vm2335_vm4, %v3416_v46  ;;  %3407 = vmatmul.mubr.f32.vlgmr.msra.gmra.mxu1 %v3305_v47  ;;  %v3492_v46 = vld [vmem:[#allocation16 + $0x608] sm:$0xff]  ;;  %v3682_v47 = vld [vmem:[#allocation16 + $0x750] sm:$0xff] }
 0xc15   :  { %5386 = vmatpush3.msra.mxu1 %v6406_v40  ;;  %5393 = vmatprep.mubr.msk.f32.mxu1 %vm5729_vm3, %v5728_v10  ;;  %v5373_v5 = vpop.f32.mrf.mxu1 }
 0xc16   :  { %5387 = vmatprep.subr.mxu1 %v5728_v10  ;;  %3523 = vmatprep.subr.mxu0 %v3522_v1  ;;  %v3491_v1 = vld [vmem:[#allocation16 + $0x600] sm:$0xff]  ;;  %v3679_v5 = vld [vmem:[#allocation16 + $0x738] sm:$0xff] }
 0xc17   :  { %5388 = vmatpush3.msra.mxu1 %v6408_v42  ;;  %3524 = vmatpush1.msra.mxu0 %v3521_v2  ;;  %v3681_v2 = vld [vmem:[#allocation16 + $0x748] sm:$0xff] }
 0xc18   :  { %5389 = vmatprep.subr.mxu1 %v5728_v10  ;;  %3525 = vmatprep.subr.mxu0 %v3520_v4  ;;  %v3680_v4 = vld [vmem:[#allocation16 + $0x740] sm:$0xff] }
 0xc19   :  { %5390 = vmatpush3.msra.mxu1 %v6412_v43  ;;  %3526 = vmatpush1.msra.mxu0 %v3519_v7  ;;  %v3678_v7 = vld [vmem:[#allocation16 + $0x730] sm:$0xff] }
 0xc1a   :  { %5391 = vmatprep.subr.mxu1 %v5728_v10  ;;  %3527 = vmatprep.subr.mxu0 %v3518_v8  ;;  %v3677_v8 = vld [vmem:[#allocation16 + $0x728] sm:$0xff] }
 0xc1b   :  { %5392 = vmatpush3.msra.mxu1 %v6416_v44  ;;  %3528 = vmatpush1.msra.mxu0 %v3517_v11  ;;  %v3676_v11 = vld [vmem:[#allocation16 + $0x720] sm:$0xff] }
 0xc1c   :  { %5394 = vmatmul.mubr.msk.f32.vlgmr.msra.gmra.mxu1 %vm2335_vm4, %v3597_v13  ;;  %3529 = vmatprep.subr.mxu0 %v3516_v16  ;;  %v3675_v13 = vld [vmem:[#allocation16 + $0x718] sm:$0xff]  ;;  %v3674_v16 = vld [vmem:[#allocation16 + $0x710] sm:$0xff] }
 0xc1d   :  { %3530 = vmatpush1.msra.mxu0 %v3515_v22  ;;  %3704 = vmatprep.subr.mxu1 %v3703_v23  ;;  %v3673_v22 = vld [vmem:[#allocation16 + $0x708] sm:$0xff]  ;;  %v3672_v23 = vld [vmem:[#allocation16 + $0x700] sm:$0xff] }
 0xc1e   :  { %3531 = vmatprep.subr.mxu0 %v3514_v24  ;;  %3705 = vmatpush1.msra.mxu1 %v3702_v25 }
 0xc1f   :  { %3532 = vmatpush1.msra.mxu0 %v3513_v26  ;;  %3706 = vmatprep.subr.mxu1 %v3701_v27 }
 0xc20   :  { %3533 = vmatprep.subr.mxu0 %v3512_v28  ;;  %3707 = vmatpush1.msra.mxu1 %v3700_v29 }
 0xc21   :  { %3534 = vmatpush1.msra.mxu0 %v3511_v30  ;;  %3708 = vmatprep.subr.mxu1 %v3699_v31 }
 0xc22   :  { %3535 = vmatprep.subr.mxu0 %v3510_v32  ;;  %3709 = vmatpush1.msra.mxu1 %v3698_v33 }
 0xc23   :  { %3536 = vmatpush1.msra.mxu0 %v3509_v34  ;;  %3710 = vmatprep.subr.mxu1 %v3697_v35  ;;  %v3883_v34 = vld [vmem:[#allocation16 + $0x8f0] sm:$0xff]  ;;  %v3882_v35 = vld [vmem:[#allocation16 + $0x8e8] sm:$0xff] }
 0xc24   :  { %3537 = vmatprep.subr.mxu0 %v3508_v36  ;;  %3711 = vmatpush1.msra.mxu1 %v3696_v37  ;;  %v3881_v36 = vld [vmem:[#allocation16 + $0x8e0] sm:$0xff] }
 0xc25   :  { %3538 = vmatpush1.msra.mxu0 %v3507_v38  ;;  %3712 = vmatprep.subr.mxu1 %v3695_v39  ;;  %v3878_v38 = vld [vmem:[#allocation16 + $0x8c8] sm:$0xff]  ;;  %v3877_v39 = vld [vmem:[#allocation16 + $0x8c0] sm:$0xff] }
 0xc26   :  { %3539 = vmatprep.subr.mxu0 %v3506_v41  ;;  %3713 = vmatpush1.msra.mxu1 %v3694_v48  ;;  %v3875_v41 = vld [vmem:[#allocation16 + $0x8b0] sm:$0xff]  ;;  %v3874_v48 = vld [vmem:[#allocation16 + $0x8a8] sm:$0xff] }
 0xc27   :  { %3540 = vmatpush1.msra.mxu0 %v3505_v50  ;;  %3714 = vmatprep.subr.mxu1 %v3693_v51  ;;  %v3873_v50 = vld [vmem:[#allocation16 + $0x8a0] sm:$0xff]  ;;  %v3872_v51 = vld [vmem:[#allocation16 + $0x898] sm:$0xff] }
 0xc28   :  { %3541 = vmatprep.subr.mxu0 %v3504_v53  ;;  %3715 = vmatpush1.msra.mxu1 %v3692_v54  ;;  %v3871_v53 = vld [vmem:[#allocation16 + $0x890] sm:$0xff]  ;;  %v3870_v54 = vld [vmem:[#allocation16 + $0x888] sm:$0xff] }
 0xc29   :  { %3542 = vmatpush1.msra.mxu0 %v3503_v56  ;;  %3716 = vmatprep.subr.mxu1 %v3691_v57  ;;  %v3869_v56 = vld [vmem:[#allocation16 + $0x880] sm:$0xff]  ;;  %v3868_v57 = vld [vmem:[#allocation16 + $0x878] sm:$0xff] }
 0xc2a   :  { %3543 = vmatprep.subr.mxu0 %v3502_v59  ;;  %3717 = vmatpush1.msra.mxu1 %v3690_v60  ;;  %v3867_v59 = vld [vmem:[#allocation16 + $0x870] sm:$0xff]  ;;  %v3866_v60 = vld [vmem:[#allocation16 + $0x868] sm:$0xff] }
 0xc2b   :  { %3544 = vmatpush1.msra.mxu0 %v3501_v62  ;;  %3718 = vmatprep.subr.mxu1 %v3689_v45  ;;  %v3865_v62 = vld [vmem:[#allocation16 + $0x860] sm:$0xff]  ;;  %v3864_v45 = vld [vmem:[#allocation16 + $0x858] sm:$0xff] }
 0xc2c   :  { %3545 = vmatprep.subr.mxu0 %v3500_v49  ;;  %3719 = vmatpush1.msra.mxu1 %v3688_v52  ;;  %v3863_v49 = vld [vmem:[#allocation16 + $0x850] sm:$0xff]  ;;  %v3862_v52 = vld [vmem:[#allocation16 + $0x848] sm:$0xff] }
 0xc2d   :  { %3546 = vmatpush1.msra.mxu0 %v3499_v55  ;;  %3587 = vmatprep.mubr.f32.mxu0 %v5728_v10  ;;  %v3861_v55 = vld [vmem:[#allocation16 + $0x840] sm:$0xff] }
 0xc2e   :  { %3547 = vmatprep.subr.mxu0 %v3498_v58  ;;  %3768 = vmatprep.mubr.f32.mxu1 %v5728_v10  ;;  %v3860_v58 = vld [vmem:[#allocation16 + $0x838] sm:$0xff] }
 0xc2f   :  { %3548 = vmatpush1.msra.mxu0 %v3497_v61  ;;  %3720 = vmatprep.subr.mxu1 %v3687_v0  ;;  %v3859_v61 = vld [vmem:[#allocation16 + $0x830] sm:$0xff]  ;;  %v3858_v0 = vld [vmem:[#allocation16 + $0x828] sm:$0xff] }
 0xc30   :  { %3549 = vmatprep.subr.mxu0 %v3496_v3  ;;  %3721 = vmatpush1.msra.mxu1 %v3686_v6  ;;  %v3857_v3 = vld [vmem:[#allocation16 + $0x820] sm:$0xff]  ;;  %v3856_v6 = vld [vmem:[#allocation16 + $0x818] sm:$0xff] }
 0xc31   :  { %3550 = vmatpush1.msra.mxu0 %v3495_v9  ;;  %3722 = vmatprep.subr.mxu1 %v3685_v12  ;;  %v3855_v9 = vld [vmem:[#allocation16 + $0x810] sm:$0xff]  ;;  %v3854_v12 = vld [vmem:[#allocation16 + $0x808] sm:$0xff] }
 0xc32   :  { %3551 = vmatprep.subr.mxu0 %v3494_v15  ;;  %3723 = vmatpush1.msra.mxu1 %v3684_v17  ;;  %v3853_v15 = vld [vmem:[#allocation16 + $0x800] sm:$0xff] }
 0xc33   :  { %3552 = vmatpush1.msra.mxu0 %v3493_v20  ;;  %3724 = vmatprep.subr.mxu1 %v3683_v21 }
 0xc34   :  { %3553 = vmatprep.subr.mxu0 %v3492_v46  ;;  %3725 = vmatpush1.msra.mxu1 %v3682_v47 }
 0xc35   :  { %3554 = vmatpush1.msra.mxu0 %v3491_v1  ;;  %3726 = vmatprep.subr.mxu1 %v3681_v2  ;;  %v4190_v2 = vld [vmem:[%s6666_s14 + $0xf8] sm:$0xff] }
 0xc36   :  { %3727 = vmatpush1.msra.mxu1 %v3680_v4  ;;  %5396 = vmatprep.subr.mxu0 %v5728_v10  ;;  %v4174_v4 = vld [vmem:[%s6666_s14 + $0x78] sm:$0xff] }
 0xc37   :  { %3728 = vmatprep.subr.mxu1 %v3679_v5  ;;  %v4189_v5 = vld [vmem:[%s6666_s14 + $0xf0] sm:$0xff] }
 0xc38   :  { %3729 = vmatpush1.msra.mxu1 %v3678_v7  ;;  %v4173_v7 = vld [vmem:[%s6666_s14 + $0x70] sm:$0xff] }
 0xc39   :  { %3730 = vmatprep.subr.mxu1 %v3677_v8  ;;  %v4172_v8 = vld [vmem:[%s6666_s14 + $0x68] sm:$0xff] }
 0xc3a   :  { %3731 = vmatpush1.msra.mxu1 %v3676_v11  ;;  %v4187_v11 = vld [vmem:[%s6666_s14 + $0xe0] sm:$0xff] }
 0xc3b   :  { %3732 = vmatprep.subr.mxu1 %v3675_v13  ;;  %v4171_v13 = vld [vmem:[%s6666_s14 + $0x60] sm:$0xff] }
 0xc3c   :  { %3733 = vmatpush1.msra.mxu1 %v3674_v16  ;;  %v4186_v16 = vld [vmem:[%s6666_s14 + $0xd8] sm:$0xff] }
 0xc3d   :  { %3734 = vmatprep.subr.mxu1 %v3673_v22  ;;  %v4170_v22 = vld [vmem:[%s6666_s14 + $0x58] sm:$0xff] }
 0xc3e   :  { %3735 = vmatpush1.msra.mxu1 %v3672_v23  ;;  %v4185_v23 = vld [vmem:[%s6666_s14 + $0xd0] sm:$0xff] }
 0xc3f   :  { %4705 = vmatprep.subr.mxu1 %v4190_v2 }
 0xccc   :  { %v3227_v24 = vpop.f32.mrf.mxu0 }
 0xccd   :  { %v3232_v25 = vadd.f32 %v3227_v24, %v6490_v19  ;;  %v3778_v19 = vld [vmem:[#allocation14 + $0x40] sm:$0xff]  ;;  %v4169_v24 = vld [vmem:[%s6666_s14 + $0x50] sm:$0xff] }
 0xcce   :  { %v3229_v26 = vpop.f32.mrf.mxu0 }
 0xccf   :  { %v3233_v27 = vadd.f32 %v3229_v26, %v6496_v63  ;;  %v3884_v63 = vld [vmem:[#allocation16 + $0x8f8] sm:$0xff]  ;;  %v4168_v26 = vld [vmem:[%s6666_s14 + $0x48] sm:$0xff] }
 0xcd4   :  { %v3486_v28 = vpop.f32.mrf.mxu0  ;;  %v3408_v29 = vpop.f32.mrf.mxu1 }
 0xcd5   :  { %v6519_v30 = vadd.f32 %v3408_v29, %v3232_v25  ;;  %3588 = vmatmul.mubr.f32.vlgmr.msra.gmra.mxu0 %v3486_v28  ;;  %v4184_v25 = vld [vmem:[%s6666_s14 + $0xc8] sm:$0xff]  ;;  %v4167_v28 = vld [vmem:[%s6666_s14 + $0x40] sm:$0xff]  ;;  %v4182_v29 = vld [vmem:[%s6666_s14 + $0xb8] sm:$0xff] }
 0xcd6   :  { %5397 = vmatpush3.msra.mxu0 %v6406_v40  ;;  %v5384_v31 = vpop.f32.mrf.mxu0  ;;  %v3410_v32 = vpop.f32.mrf.mxu1  ;;  %5404 = vmatprep.mubr.msk.f32.mxu0 %vm5729_vm3, %v5728_v10 }
 0xcd7   :  { %5398 = vmatprep.subr.mxu0 %v5728_v10  ;;  %v6525_v33 = vadd.f32 %v3410_v32, %v3233_v27  ;;  %v4183_v27 = vld [vmem:[%s6666_s14 + $0xc0] sm:$0xff]  ;;  %v4181_v31 = vld [vmem:[%s6666_s14 + $0xb0] sm:$0xff] }
 0xcd8   :  { %5399 = vmatpush3.msra.mxu0 %v6408_v42  ;;  %v3880_v42 = vld [vmem:[#allocation16 + $0x8d8] sm:$0xff]  ;;  %v4165_v32 = vld [vmem:[%s6666_s14 + $0x30] sm:$0xff] }
 0xcd9   :  { %5400 = vmatprep.subr.mxu0 %v5728_v10 }
 0xcda   :  { %5401 = vmatpush3.msra.mxu0 %v6412_v43  ;;  %v3879_v43 = vld [vmem:[#allocation16 + $0x8d0] sm:$0xff] }
 0xcdb   :  { %5402 = vmatprep.subr.mxu0 %v5728_v10 }
 0xcdc   :  { %5403 = vmatpush3.msra.mxu0 %v6416_v44  ;;  %v3667_v40 = vpop.f32.mrf.mxu1  ;;  %v3876_v44 = vld [vmem:[#allocation16 + $0x8b8] sm:$0xff] }
 0xcdd   :  { %5405 = vmatmul.mubr.msk.f32.vlgmr.msra.gmra.mxu0 %vm2335_vm4, %v3778_v19  ;;  %3769 = vmatmul.mubr.f32.vlgmr.msra.gmra.mxu1 %v3667_v40  ;;  %v4164_v19 = vld [vmem:[%s6666_s14 + $0x28] sm:$0xff]  ;;  %v4163_v40 = vld [vmem:[%s6666_s14 + $0x20] sm:$0xff] }
 0xcde   :  { %3885 = vmatprep.subr.mxu0 %v3884_v63  ;;  %v5395_v37 = vpop.f32.mrf.mxu1  ;;  %3949 = vmatprep.mubr.f32.mxu0 %v5728_v10  ;;  %v4179_v63 = vld [vmem:[%s6666_s14 + $0xa0] sm:$0xff] }
 0xcdf   :  { %3886 = vmatpush1.msra.mxu0 %v3883_v34  ;;  %4706 = vmatpush3.msra.mxu1 %v4174_v4  ;;  %v4178_v34 = vld [vmem:[%s6666_s14 + $0x98] sm:$0xff]  ;;  %v4161_v37 = vld [vmem:[%s6666_s14 + $0x10] sm:$0xff] }
 0xce0   :  { %3887 = vmatprep.subr.mxu0 %v3882_v35  ;;  %4707 = vmatprep.subr.mxu1 %v4189_v5  ;;  %v4162_v35 = vld [vmem:[%s6666_s14 + $0x18] sm:$0xff] }
 0xce1   :  { %3888 = vmatpush1.msra.mxu0 %v3881_v36  ;;  %4708 = vmatpush3.msra.mxu1 %v4173_v7  ;;  %v4177_v36 = vld [vmem:[%s6666_s14 + $0x90] sm:$0xff] }
 0xce2   :  { %3889 = vmatprep.subr.mxu0 %v3880_v42 }
 0xce3   :  { %3890 = vmatpush1.msra.mxu0 %v3879_v43  ;;  %v3958_v43 = vld [vmem:[#allocation17] sm:$0x3] }
 0xce4   :  { %3891 = vmatprep.subr.mxu0 %v3878_v38  ;;  %v6626_v38 = vsub.s32 1, %v6399_v14 }
 0xce5   :  { %3892 = vmatpush1.msra.mxu0 %v3877_v39 }
 0xce6   :  { %3893 = vmatprep.subr.mxu0 %v3876_v44 }
 0xce7   :  { %3894 = vmatpush1.msra.mxu0 %v3875_v41  ;;  %v3963_v41 = vrot.slane %v3958_v43, %v6402_v18 }
 0xce8   :  { %3895 = vmatprep.subr.mxu0 %v3874_v48 }
 0xce9   :  { %3896 = vmatpush1.msra.mxu0 %v3873_v50 }
 0xcea   :  { %3897 = vmatprep.subr.mxu0 %v3872_v51 }
 0xceb   :  { %3898 = vmatpush1.msra.mxu0 %v3871_v53  ;;  %v3967_v53 = vrot.slane %v3958_v43, %v6626_v38 }
 0xcec   :  { %3899 = vmatprep.subr.mxu0 %v3870_v54 }
 0xced   :  { %3900 = vmatpush1.msra.mxu0 %v3869_v56 }
 0xcee   :  { %3901 = vmatprep.subr.mxu0 %v3868_v57 }
 0xcef   :  { %3902 = vmatpush1.msra.mxu0 %v3867_v59 }
 0xcf0   :  { %3903 = vmatprep.subr.mxu0 %v3866_v60 }
 0xcf1   :  { %3904 = vmatpush1.msra.mxu0 %v3865_v62 }
 0xcf2   :  { %3905 = vmatprep.subr.mxu0 %v3864_v45 }
 0xcf3   :  { %3906 = vmatpush1.msra.mxu0 %v3863_v49 }
 0xcf4   :  { %3907 = vmatprep.subr.mxu0 %v3862_v52 }
 0xcf5   :  { %3908 = vmatpush1.msra.mxu0 %v3861_v55 }
 0xcf6   :  { %3909 = vmatprep.subr.mxu0 %v3860_v58 }
 0xcf7   :  { %3910 = vmatpush1.msra.mxu0 %v3859_v61 }
 0xcf8   :  { %3911 = vmatprep.subr.mxu0 %v3858_v0 }
 0xcf9   :  { %3912 = vmatpush1.msra.mxu0 %v3857_v3 }
 0xcfa   :  { %3913 = vmatprep.subr.mxu0 %v3856_v6 }
 0xcfb   :  { %3914 = vmatpush1.msra.mxu0 %v3855_v9 }
 0xcfc   :  { %3915 = vmatprep.subr.mxu0 %v3854_v12 }
 0xcfd   :  { %3916 = vmatpush1.msra.mxu0 %v3853_v15 }
 0xd95   :  { %v3589_v17 = vpop.f32.mrf.mxu0 }
 0xd96   :  { %v6535_v20 = vadd.f32 %v3589_v17, %v6519_v30  ;;  %v4166_v30 = vld [vmem:[%s6666_s14 + $0x38] sm:$0xff] }
 0xd97   :  { %v3591_v21 = vpop.f32.mrf.mxu0 }
 0xd98   :  { %v6538_v46 = vadd.f32 %v3591_v21, %v6525_v33  ;;  %v4180_v33 = vld [vmem:[%s6666_s14 + $0xa8] sm:$0xff] }
 0xd9d   :  { %v3848_v47 = vpop.f32.mrf.mxu0  ;;  %v3770_v42 = vpop.f32.mrf.mxu1 }
 0xd9e   :  { %3950 = vmatmul.mubr.f32.vlgmr.msra.gmra.mxu0 %v3848_v47  ;;  %v3775_v44 = vadd.f32 %v3770_v42, %v6535_v20 }
 0xd9f   :  { %v5406_v1 = vpop.f32.mrf.mxu0  ;;  %4152 = vmatprep.mubr.f32.mxu0 %v5728_v10  ;;  %v4188_v10 = vld [vmem:[%s6666_s14 + $0xe8] sm:$0xff]  ;;  %v3772_v39 = vpop.f32.mrf.mxu1 }
 0xda0   :  { %4709 = vmatprep.subr.mxu1 %v4188_v10  ;;  %v3776_v50 = vadd.f32 %v3772_v39, %v6538_v46 }
 0xda1   :  { %4710 = vmatpush3.msra.mxu1 %v4172_v8 }
 0xda2   :  { %4711 = vmatprep.subr.mxu1 %v4187_v11 }
 0xda3   :  { %4712 = vmatpush3.msra.mxu1 %v4171_v13 }
 0xda4   :  { %4713 = vmatprep.subr.mxu1 %v4186_v16 }
 0xda5   :  { %4714 = vmatpush3.msra.mxu1 %v4170_v22 }
 0xda6   :  { %4715 = vmatprep.subr.mxu1 %v4185_v23 }
 0xda7   :  { %4716 = vmatpush3.msra.mxu1 %v4169_v24 }
 0xda8   :  { %4717 = vmatprep.subr.mxu1 %v4184_v25 }
 0xda9   :  { %4718 = vmatpush3.msra.mxu1 %v4168_v26 }
 0xdaa   :  { %4719 = vmatprep.subr.mxu1 %v4183_v27 }
 0xdab   :  { %4720 = vmatpush3.msra.mxu1 %v4167_v28 }
 0xdac   :  { %4721 = vmatprep.subr.mxu1 %v4182_v29  ;;  %v5730_v29 = vmov 1966171168  }
 0xdad   :  { %4722 = vmatpush3.msra.mxu1 %v4166_v30  ;;  %v4016_v30 = vunpack.c.l.s4 %v5730_v29 }
 0xdae   :  { %4723 = vmatprep.subr.mxu1 %v4181_v31 }
 0xdaf   :  { %4724 = vmatpush3.msra.mxu1 %v4165_v32  ;;  %v4017_v31 = vunpack.c.0.s8 %v4016_v30 }
 0xdb0   :  { %4725 = vmatprep.subr.mxu1 %v4180_v33 }
 0xdb1   :  { %4726 = vmatpush3.msra.mxu1 %v4164_v19  ;;  %v4020_v33 = vsub.s32 %v4017_v31, %v6399_v14 }
 0xdb2   :  { %4727 = vmatprep.subr.mxu1 %v4179_v63 }
 0xdb3   :  { %4728 = vmatpush3.msra.mxu1 %v4163_v40 }
 0xdb4   :  { %4729 = vmatprep.subr.mxu1 %v4178_v34  ;;  %v4007_v34 = vld [vmem:[#allocation19] sm:$0x3] }
 0xdb5   :  { %4730 = vmatpush3.msra.mxu1 %v4162_v35 }
 0xdb6   :  { %4731 = vmatprep.subr.mxu1 %v4177_v36 }
 0xdb7   :  { %4732 = vmatpush3.msra.mxu1 %v4161_v37 }
 0xe5e   :  { %v3951_v48 = vpop.f32.mrf.mxu0 }
 0xe5f   :  { %v3956_v51 = vadd.f32 %v3951_v48, %v3775_v44 }
 0xe60   :  { %v3953_v54 = vpop.f32.mrf.mxu0 }
 0xe61   :  { %v3970_v56 = vadd.f32 %v3963_v41, %v3956_v51  ;;  %v3957_v57 = vadd.f32 %v3953_v54, %v3776_v50  ;;  %v4031_v51 = vld [vmem:[#allocation20] sm:$0x3] }
 0xe63   :  { %v3972_v59 = vrot.slane %v3970_v56, 4  ;;  %v3987_v60 = vmul.f32 %v3970_v56, %v3970_v56  ;;  %v3971_v62 = vadd.f32 %v3967_v53, %v3957_v57 }
 0xe65   :  { %v3973_v45 = vadd.f32 %v3972_v59, %v3970_v56  ;;  %v3989_v49 = vrot.slane %v3987_v60, 4  ;;  %v3978_v52 = vrot.slane %v3971_v62, 4  ;;  %v3988_v55 = vmul.f32 %v3971_v62, %v3971_v62 }
 0xe67   :  { %v3974_v58 = vrot.slane %v3973_v45, 2  ;;  %v3990_v61 = vadd.f32 %v3989_v49, %v3987_v60  ;;  %v3979_v0 = vadd.f32 %v3978_v52, %v3971_v62  ;;  %v3995_v3 = vrot.slane %v3988_v55, 4 }
 0xe69   :  { %v3975_v6 = vadd.f32 %v3974_v58, %v3973_v45  ;;  %v3991_v9 = vrot.slane %v3990_v61, 2  ;;  %v3980_v12 = vrot.slane %v3979_v0, 2  ;;  %v3996_v15 = vadd.f32 %v3995_v3, %v3988_v55  ;;  %v4083_v58 = vld [vmem:[#allocation22] sm:$0x3] }
 0xe6b   :  { %v3976_v17 = vrot.slane %v3975_v6, 1  ;;  %v3992_v20 = vadd.f32 %v3991_v9, %v3990_v61  ;;  %v3981_v21 = vadd.f32 %v3980_v12, %v3979_v0  ;;  %v3997_v46 = vrot.slane %v3996_v15, 2 }
 0xe6d   :  { %v3977_v47 = vadd.f32 %v3976_v17, %v3975_v6  ;;  %v3993_v1 = vrot.slane %v3992_v20, 1  ;;  %v3982_v2 = vrot.slane %v3981_v21, 1  ;;  %v3998_v4 = vadd.f32 %v3997_v46, %v3996_v15  ;;  %v4352_v6 = vld [vmem:[#allocation2] ss:$0 sm:$0xff] }
 0xe6f   :  { %v3985_v5 = vmul.f32 0.125, %v3977_v47  ;;  %v3994_v7 = vadd.f32 %v3993_v1, %v3992_v20  ;;  %v3999_v10 = vrot.slane %v3998_v4, 1  ;;  %v3983_v8 = vadd.f32 %v3982_v2, %v3981_v21 }
 0xe71   :  { %v4001_v11 = vmul.f32 0.125, %v3994_v7  ;;  %v4003_v13 = vmul.f32 %v3985_v5, %v3985_v5  ;;  %v4000_v16 = vadd.f32 %v3999_v10, %v3998_v4  ;;  %v3986_v22 = vmul.f32 0.125, %v3983_v8 }
 0xe73   :  { %v4005_v23 = vsub.f32 %v4001_v11, %v4003_v13  ;;  %v4002_v24 = vmul.f32 0.125, %v4000_v16  ;;  %v4004_v25 = vmul.f32 %v3986_v22, %v3986_v22 }
 0xe75   :  { %v4008_v26 = vadd.f32 1e-05, %v4005_v23  ;;  %v4006_v27 = vsub.f32 %v4002_v24, %v4004_v25 }
 0xe77   :  { %v4009_v28 = vadd.f32 1e-05, %v4006_v27  ;;  %5429 = vrsqrt.f32 %v4008_v26 }
 0xe79   :  { %5431 = vrsqrt.f32 %v4009_v28 }
 0xe84   :  { %v5430_v32 = vpop.eup %5429 }
 0xe86   :  { %v5432_v19 = vpop.eup %5431 }
 0xe87   :  { %v4014_v63 = vcombine.low %v5430_v32, %v5432_v19 }
 0xe89   :  { %v4021_v40 = vrot.slane %v4014_v63, %v4020_v33 }
 0xe8b   :  { %v4028_v35 = vrot.slane %v4021_v40, %v4020_v33 }
 0xe8d   :  { %v4030_v36 = vmul.f32 %v4028_v35, %v4007_v34 }
 0xe8f   :  { %v4036_v37 = vrot.slane %v4030_v36, %v6402_v18  ;;  %v4040_v42 = vrot.slane %v4030_v36, %v6626_v38 }
 0xe91   :  { %v4043_v43 = vmul.f32 %v4036_v37, %v3985_v5  ;;  %v4044_v39 = vmul.f32 %v4040_v42, %v3986_v22  ;;  %v4065_v44 = vmul.f32 %v4040_v42, %v3971_v62  ;;  %v4064_v41 = vmul.f32 %v4036_v37, %v3970_v56  ;;  %v4176_v56 = vld [vmem:[%s6666_s14 + $0x88] sm:$0xff]  ;;  %v4159_v62 = vld [vmem:[%s6666_s14] sm:$0xff] }
 0xe92   :  { %4733 = vmatprep.subr.mxu1 %v4176_v56 }
 0xe93   :  { %v4047_v48 = vcombine.low %v4043_v43, %v4044_v39 }
 0xe95   :  { %v4054_v50 = vrot.slane %v4047_v48, %v4020_v33 }
 0xe97   :  { %v4061_v53 = vrot.slane %v4054_v50, %v4020_v33 }
 0xe99   :  { %v4063_v54 = vsub.f32 %v4031_v51, %v4061_v53 }
 0xe9b   :  { %v4074_v14 = vrot.slane %v4063_v54, %v6626_v38  ;;  %v4070_v57 = vrot.slane %v4063_v54, %v6402_v18  ;;  %v4160_v18 = vld [vmem:[%s6666_s14 + $0x8] sm:$0xff]  ;;  %v4175_v38 = vld [vmem:[%s6666_s14 + $0x80] sm:$0xff] }
 0xe9c   :  { %4734 = vmatpush3.msra.mxu1 %v4160_v18 }
 0xe9d   :  { %v4078_v59 = vadd.f32 %v4074_v14, %v4065_v44  ;;  %v4077_v60 = vadd.f32 %v4070_v57, %v4064_v41  ;;  %4735 = vmatprep.subr.mxu1 %v4175_v38 }
 0xe9e   :  { %4736 = vmatpush3.msra.mxu1 %v4159_v62 }
 0xe9f   :  { %v4080_v45 = vmul.f32 0.2, %v4078_v59  ;;  %v4079_v49 = vmul.f32 0.2, %v4077_v60 }
 0xea1   :  { %v4082_v52 = vmax.f32 %v4078_v59, %v4080_v45  ;;  %v4081_v55 = vmax.f32 %v4077_v60, %v4079_v49 }
 0xea3   :  { %4118 = vmatprep.subr.mxu0 %v4082_v52 }
 0xea4   :  { %4119 = vmatpush1.msra.mxu0 %v4081_v55 }
 0xea5   :  { %4351 = vmatmul.mubr.msk.f32.vlgmr.msra.gmra.mxu0 %vm4084_vm5, %v4083_v58 }
 0xf65   :  { %v4154_v61 = vpop.f32.mrf.mxu0 }
 0xf67   :  { %v4156_v0 = vpop.f32.mrf.mxu0 }
 0xf68   :  { %4262 = vmatprep.mubr.f32.mxu1 %v4156_v0 }
 0xf69   :  { %4263 = vmatmul.mubr.f32.vlgmr.msra.gmra.mxu1 %v4154_v61 }
0x1029   :  { %v4737_v3 = vpop.f32.mrf.mxu1 }
0x102b   :  { %v4738_v9 = vpop.f32.mrf.mxu1 }
0x102c   :  { %v4739_v12 = vadd.f32 %v4738_v9, %v4737_v3 }
0x102e   :  { %v4265_v15 = vadd.f32 %v4739_v12, %v4352_v6 }
0x1030   :  { %v4353_v17 = vmul.f32 -1.442695, %v4265_v15 }
0x1032   :  { %5433 = vpow2.f32 %v4353_v17 }
0x103f   :  { %v5434_v20 = vpop.eup %5433 }
0x1040   :  { %v4271_v21 = vadd.f32 1.0, %v5434_v20 }
0x1042   :  { %5435 = vrcp.f32 %v4271_v21 }
0x104f   :  { %v5436_v46 = vpop.eup %5435 }
0x1050   :  { %4275 = vst.msk [vmem:[%s6668_s16] sm:$0x3] %vm4274_vm6, %v5436_v46 }
0x1051   :  { %4280 = vsyncpa [#allocation4], 1 }
0x1052   :  { %4281 = vsyncpa [#allocation6], 1 }
0x1053   :  { %4282 = vsyncpa [#allocation9], 1 }
0x1054   :  { %4283 = vsyncpa [#allocation12], 1 }
0x1055   :  { %4284 = vsyncpa [#allocation15], 1 }
0x1056   :  { %4285 = vsyncpa [#allocation18], 1 }
0x1057   :  { %4286 = vsyncpa [#allocation21], 1 }

</bundles_post_ra>
